<compile_context>
chip_gen: v7x
topology: tpu7x:2x2x1
jax: 0.10.0
libtpu: 0.0.40
codegen_flags: <defaults>
</compile_context>

<pallas_src>
import functools

import jax
import jax.numpy as jnp
from jax.experimental import pallas as pl
from jax.experimental.pallas import tpu as pltpu


def _round_up(x, m):
    return (x + m - 1) // m * m


# --------------------------------------------------------------------------
# Pallas kernel 1: tiled bf16 matmul + bias (+ optional tanh) epilogue
# --------------------------------------------------------------------------
def conv_matmul_kernel(a_ref, b_ref, bias_ref, o_ref, acc_ref, *, act):
    @pl.when(pl.program_id(2) == 0)
    def _():
        acc_ref[...] = jnp.zeros_like(acc_ref)

    acc_ref[...] += jnp.dot(a_ref[...], b_ref[...],
                            preferred_element_type=jnp.float32)

    @pl.when(pl.program_id(2) == pl.num_programs(2) - 1)
    def _():
        y = acc_ref[...] + bias_ref[...]
        if act == "tanh":
            y = jnp.tanh(y)
        o_ref[...] = y.astype(o_ref.dtype)


def conv_matmul(a, b, bias, act="none", tm=256, tn=256, tk=512):
    """a:(M,K) @ b:(K,N) + bias:(N,) -> (M, Np) bf16 (Np = N padded to tile)."""
    M, K = a.shape
    _, N = b.shape
    tm = min(tm, _round_up(M, 8))
    tn = min(tn, _round_up(N, 128))
    tk = min(tk, _round_up(K, 128))
    Mp, Np, Kp = _round_up(M, tm), _round_up(N, tn), _round_up(K, tk)

    a = a.astype(jnp.bfloat16)
    b = b.astype(jnp.bfloat16)
    if (Mp, Kp) != (M, K):
        a = jnp.pad(a, ((0, Mp - M), (0, Kp - K)))
    if (Kp, Np) != (K, N):
        b = jnp.pad(b, ((0, Kp - K), (0, Np - N)))
    bias2 = bias.astype(jnp.float32).reshape(1, -1)
    if Np != N:
        bias2 = jnp.pad(bias2, ((0, 0), (0, Np - N)))

    out = pl.pallas_call(
        functools.partial(conv_matmul_kernel, act=act),
        out_shape=jax.ShapeDtypeStruct((Mp, Np), jnp.bfloat16),
        grid_spec=pltpu.PrefetchScalarGridSpec(
            num_scalar_prefetch=0,
            grid=(Mp // tm, Np // tn, Kp // tk),
            in_specs=[
                pl.BlockSpec((tm, tk), lambda i, j, k: (i, k)),
                pl.BlockSpec((tk, tn), lambda i, j, k: (k, j)),
                pl.BlockSpec((1, tn), lambda i, j, k: (0, j)),
            ],
            out_specs=pl.BlockSpec((tm, tn), lambda i, j, k: (i, j)),
            scratch_shapes=[pltpu.VMEM((tm, tn), jnp.float32)]),
        compiler_params=pltpu.CompilerParams(
            dimension_semantics=("parallel", "parallel", "arbitrary")),
    )(a, b, bias2)
    if Mp != M:
        out = out[:M]
    return out  # (M, Np) bf16, channel-padded


# --------------------------------------------------------------------------
# Pallas kernel 2: per-channel sum / sum-of-squares reduction (BN statistics)
# --------------------------------------------------------------------------
def stats_kernel(x_ref, sum_ref, ssq_ref, sum_acc, ssq_acc, *, m_valid, tm):
    i = pl.program_id(0)

    @pl.when(i == 0)
    def _():
        sum_acc[...] = jnp.zeros_like(sum_acc)
        ssq_acc[...] = jnp.zeros_like(ssq_acc)

    x = x_ref[...].astype(jnp.float32)
    if m_valid is not None:
        row = jax.lax.broadcasted_iota(jnp.int32, x.shape, 0) + i * tm
        x = jnp.where(row < m_valid, x, 0.0)
    sum_acc[...] += jnp.sum(x, axis=0, keepdims=True)
    ssq_acc[...] += jnp.sum(x * x, axis=0, keepdims=True)

    @pl.when(i == pl.num_programs(0) - 1)
    def _():
        sum_ref[...] = sum_acc[...]
        ssq_ref[...] = ssq_acc[...]


def channel_stats(x2d, tm=512):
    """x2d:(M, Np) bf16 -> (sum:(Np,), sumsq:(Np,)) in f32."""
    M, Np = x2d.shape
    tm = min(tm, _round_up(M, 8))
    Mp = _round_up(M, tm)
    m_valid = M if Mp != M else None
    if Mp != M:
        x2d = jnp.pad(x2d, ((0, Mp - M), (0, 0)))
    s, ss = pl.pallas_call(
        functools.partial(stats_kernel, m_valid=m_valid, tm=tm),
        out_shape=(jax.ShapeDtypeStruct((1, Np), jnp.float32),
                   jax.ShapeDtypeStruct((1, Np), jnp.float32)),
        grid_spec=pltpu.PrefetchScalarGridSpec(
            num_scalar_prefetch=0,
            grid=(Mp // tm,),
            in_specs=[pl.BlockSpec((tm, Np), lambda i: (i, 0))],
            out_specs=[pl.BlockSpec((1, Np), lambda i: (0, 0)),
                       pl.BlockSpec((1, Np), lambda i: (0, 0))],
            scratch_shapes=[pltpu.VMEM((1, Np), jnp.float32),
                            pltpu.VMEM((1, Np), jnp.float32)]),
        compiler_params=pltpu.CompilerParams(
            dimension_semantics=("arbitrary",)),
    )(x2d)
    return s[0], ss[0]


# --------------------------------------------------------------------------
# Pallas kernel 3: fused BN apply + ReLU + residual add (bf16 in / bf16 out)
# --------------------------------------------------------------------------
def bn_act_kernel(x_ref, scale_ref, shift_ref, *rest, relu, has_res, out_c):
    if has_res:
        res_ref, o_ref = rest
    else:
        (o_ref,) = rest
    y = x_ref[...].astype(jnp.float32) * scale_ref[...] + shift_ref[...]
    if relu:
        y = jnp.maximum(y, 0.0)
    y = y[:, :out_c]  # drop channel padding inside the kernel (no HBM slice pass)
    if has_res:
        y = y + res_ref[...].astype(jnp.float32)
    o_ref[...] = y.astype(o_ref.dtype)


def bn_apply(x2d, scale, shift, out_c, residual=None, relu=False, tm=512):
    """x2d:(M, Np) bf16 channel-padded raw conv output -> (M, out_c) bf16."""
    M, Np = x2d.shape
    tm = min(tm, _round_up(M, 8))
    Mp = _round_up(M, tm)
    if Mp != M:
        x2d = jnp.pad(x2d, ((0, Mp - M), (0, 0)))
        if residual is not None:
            residual = jnp.pad(residual, ((0, Mp - M), (0, 0)))

    ins = [x2d,
           scale.reshape(1, -1).astype(jnp.float32),
           shift.reshape(1, -1).astype(jnp.float32)]
    in_specs = [pl.BlockSpec((tm, Np), lambda i: (i, 0)),
                pl.BlockSpec((1, Np), lambda i: (0, 0)),
                pl.BlockSpec((1, Np), lambda i: (0, 0))]
    if residual is not None:
        ins.append(residual.astype(jnp.bfloat16))
        in_specs.append(pl.BlockSpec((tm, out_c), lambda i: (i, 0)))

    out = pl.pallas_call(
        functools.partial(bn_act_kernel, relu=relu,
                          has_res=residual is not None, out_c=out_c),
        out_shape=jax.ShapeDtypeStruct((Mp, out_c), jnp.bfloat16),
        grid_spec=pltpu.PrefetchScalarGridSpec(
            num_scalar_prefetch=0,
            grid=(Mp // tm,),
            in_specs=in_specs,
            out_specs=pl.BlockSpec((tm, out_c), lambda i: (i, 0))),
        compiler_params=pltpu.CompilerParams(
            dimension_semantics=("parallel",)),
    )(*ins)
    if Mp != M:
        out = out[:M]
    return out


# --------------------------------------------------------------------------
# Conv layers: im2col (JAX glue, bf16) + Pallas matmul; BN via Pallas kernels
# --------------------------------------------------------------------------
def _extract_patches(x, kh, kw, stride, pad):
    # x: (N,H,W,C) bf16 -> (N*Ho*Wo, kh*kw*C); patch order (kh, kw, Cin)
    N, H, W, C = x.shape
    if pad:
        x = jnp.pad(x, ((0, 0), (pad, pad), (pad, pad), (0, 0)))
    Ho = (H + 2 * pad - kh) // stride + 1
    Wo = (W + 2 * pad - kw) // stride + 1
    patches = []
    for di in range(kh):
        for dj in range(kw):
            patches.append(
                x[:, di:di + stride * Ho:stride, dj:dj + stride * Wo:stride, :])
    p = jnp.stack(patches, axis=3)  # (N, Ho, Wo, kh*kw, C)
    return p.reshape(N * Ho * Wo, kh * kw * C), N, Ho, Wo


def conv2d_raw(x, w, b, stride=1, pad=0, act="none"):
    # x: (N,H,W,Cin) bf16; w: PyTorch Conv2d weight (Cout, Cin, kh, kw); b: (Cout,)
    Cout, Cin, kh, kw = w.shape
    cols, N, Ho, Wo = _extract_patches(x, kh, kw, stride, pad)
    w2 = jnp.transpose(w, (2, 3, 1, 0)).reshape(kh * kw * Cin, Cout)
    y = conv_matmul(cols, w2, b, act=act)          # (N*Ho*Wo, Np) bf16
    return y, (N, Ho, Wo, Cout)


def bn_scale_shift(y_raw, gamma, beta, eps=1e-5):
    # Training-mode BatchNorm2d: batch stats per channel, biased variance.
    M, Np = y_raw.shape
    s, ss = channel_stats(y_raw)
    mean = s / M
    var = jnp.maximum(ss / M - mean * mean, 0.0)
    C = gamma.shape[0]
    gamma_p = jnp.pad(gamma.astype(jnp.float32), (0, Np - C), constant_values=1.0)
    beta_p = jnp.pad(beta.astype(jnp.float32), (0, Np - C))
    scale = gamma_p * jax.lax.rsqrt(var + eps)
    shift = beta_p - mean * scale
    return scale, shift


def conv_bn_layer(x, conv_p, bn_p, *, stride, pad, relu, residual=None):
    w, b = conv_p["w"], conv_p["b"]
    Cout = w.shape[0]
    y_raw, (N, Ho, Wo, _) = conv2d_raw(x, w, b, stride=stride, pad=pad)
    scale, shift = bn_scale_shift(y_raw, bn_p["gamma"], bn_p["beta"])
    res2d = residual.reshape(-1, Cout) if residual is not None else None
    y = bn_apply(y_raw, scale, shift, out_c=Cout, residual=res2d, relu=relu)
    return y.reshape(N, Ho, Wo, Cout)


def conv_transpose_bn_relu(x, conv_p, bn_p):
    # ConvTranspose2d(k=3, stride=2, pad=1, output_padding=1) via sub-pixel
    # phase decomposition: y[2m+r, 2n+s] is a small stride-1 conv of x.
    w, b = conv_p["w"], conv_p["b"]            # w: (Cin, Cout, 3, 3)
    Cout = w.shape[1]
    N, H, W, _ = x.shape
    xp = jnp.pad(x, ((0, 0), (0, 1), (0, 1), (0, 0)))
    taps = {0: (1,), 1: (2, 0)}                # kernel taps per output parity
    phases = []
    for r in (0, 1):
        for s_ in (0, 1):
            kh_t, kw_t = taps[r], taps[s_]
            wf = jnp.take(w, jnp.array(kh_t), axis=2)
            wf = jnp.take(wf, jnp.array(kw_t), axis=3)      # (Cin,Cout,ka,kb)
            wf = jnp.transpose(wf, (1, 0, 2, 3))            # (Cout,Cin,ka,kb)
            xin = xp[:, :H + len(kh_t) - 1, :W + len(kw_t) - 1, :]
            y_raw, (_, Ho, Wo, _) = conv2d_raw(xin, wf, b, stride=1, pad=0)
            phases.append(y_raw.reshape(N, H, W, -1))
    Np = phases[0].shape[-1]
    stk = jnp.stack(phases, axis=0).reshape(2, 2, N, H, W, Np)
    full = jnp.transpose(stk, (2, 3, 0, 4, 1, 5)).reshape(N, 2 * H, 2 * W, Np)
    y_raw_full = full.reshape(N * 2 * H * 2 * W, Np)
    scale, shift = bn_scale_shift(y_raw_full, bn_p["gamma"], bn_p["beta"])
    y = bn_apply(y_raw_full, scale, shift, out_c=Cout, relu=True)
    return y.reshape(N, 2 * H, 2 * W, Cout)


# --------------------------------------------------------------------------
# Parameters (deterministic synthetic init, shapes match the nn.Module)
# --------------------------------------------------------------------------
def _make_conv(key, cin, cout, k):
    k1, k2 = jax.random.split(key)
    return {"w": 0.05 * jax.random.normal(k1, (cout, cin, k, k), jnp.float32),
            "b": 0.05 * jax.random.normal(k2, (cout,), jnp.float32)}


def _make_convT(key, cin, cout, k):
    k1, k2 = jax.random.split(key)
    return {"w": 0.05 * jax.random.normal(k1, (cin, cout, k, k), jnp.float32),
            "b": 0.05 * jax.random.normal(k2, (cout,), jnp.float32)}


def _make_bn(c):
    return {"gamma": jnp.ones((c,), jnp.float32),
            "beta": jnp.zeros((c,), jnp.float32)}


def init_resnet_generator(key, input_nc, output_nc, ngf=64, n_blocks=6):
    keys = iter(jax.random.split(key, 9 + 2 * n_blocks))
    p = {"c0": _make_conv(next(keys), input_nc, ngf, 7), "bn0": _make_bn(ngf)}
    p["down"] = []
    for i in range(2):
        mult = 2 ** i
        p["down"].append({"conv": _make_conv(next(keys), ngf * mult, ngf * mult * 2, 3),
                          "bn": _make_bn(ngf * mult * 2)})
    mult = 4
    p["blocks"] = []
    for _ in range(n_blocks):
        p["blocks"].append({
            "conv1": _make_conv(next(keys), ngf * mult, ngf * mult, 3),
            "bn1": _make_bn(ngf * mult),
            "conv2": _make_conv(next(keys), ngf * mult, ngf * mult, 3),
            "bn2": _make_bn(ngf * mult)})
    p["up"] = []
    for i in range(2):
        m = 2 ** (2 - i)
        p["up"].append({"conv": _make_convT(next(keys), ngf * m, ngf * m // 2, 3),
                        "bn": _make_bn(ngf * m // 2)})
    p["cout"] = _make_conv(next(keys), ngf, output_nc, 7)
    return p


# --------------------------------------------------------------------------
# Forward pass (matches nn.Sequential order; use_dropout=False)
# --------------------------------------------------------------------------
def resnet_generator_forward(params, x_nchw):
    x = jnp.transpose(x_nchw, (0, 2, 3, 1)).astype(jnp.bfloat16)  # NCHW -> NHWC

    x = conv_bn_layer(x, params["c0"], params["bn0"], stride=1, pad=3, relu=True)

    for d in params["down"]:
        x = conv_bn_layer(x, d["conv"], d["bn"], stride=2, pad=1, relu=True)

    for blk in params["blocks"]:
        r = conv_bn_layer(x, blk["conv1"], blk["bn1"], stride=1, pad=1, relu=True)
        # second conv: BN (no ReLU) + residual add fused in the Pallas epilogue
        x = conv_bn_layer(r, blk["conv2"], blk["bn2"], stride=1, pad=1,
                          relu=False, residual=x)

    for u in params["up"]:
        x = conv_transpose_bn_relu(x, u["conv"], u["bn"])

    # final 7x7 conv with Tanh fused into the matmul epilogue
    w, b = params["cout"]["w"], params["cout"]["b"]
    Cout = w.shape[0]
    y_raw, (N, Ho, Wo, _) = conv2d_raw(x, w, b, stride=1, pad=3, act="tanh")
    y = y_raw[:, :Cout].reshape(N, Ho, Wo, Cout)

    return jnp.transpose(y, (0, 3, 1, 2)).astype(jnp.float32)  # NHWC -> NCHW


if __name__ == "__main__":
    key = jax.random.PRNGKey(0)
    kp, kx = jax.random.split(key)

    # small synthetic config: input_nc=3, output_nc=3, ngf=8, n_blocks=2
    input_nc, output_nc, ngf, n_blocks = 3, 3, 8, 2
    params = init_resnet_generator(kp, input_nc, output_nc, ngf, n_blocks)

    x = jax.random.normal(kx, (2, input_nc, 16, 16), jnp.float32)  # NCHW like PyTorch

    fwd = jax.jit(resnet_generator_forward)
    y = fwd(params, x)
    jax.block_until_ready(y)

    assert y.shape == (2, output_nc, 16, 16), y.shape
    assert bool(jnp.all(jnp.isfinite(y)))
    assert bool(jnp.all(jnp.abs(y) <= 1.0))  # tanh range
    print("KERNEL_OK")
</pallas_src>

<mosaic_0001>
module attributes {stable_mosaic.version = 11 : i64} {
  func.func @stats_kernel(%arg0: i32, %arg1: memref<512x128xbf16, #tpu.memory_space<vmem>>, %arg2: memref<1x128xf32, #tpu.memory_space<vmem>>, %arg3: memref<1x128xf32, #tpu.memory_space<vmem>>, %arg4: memref<1x128xf32, #tpu.memory_space<vmem>>, %arg5: memref<1x128xf32, #tpu.memory_space<vmem>>) attributes {dimension_semantics = [#tpu.dimension_semantics<arbitrary>], iteration_bounds = array<i64: 1>, scalar_prefetch = 0 : i64, scratch_operands = 2 : i64, tpu.core_type = #tpu.core_type<tc>, window_params = [{transform_indices = @transform_0, window_bounds = array<i64: 512, 128>}, {pipeline_mode = #tpu.pipeline_mode<synchronous>, transform_indices = @transform_1, window_bounds = array<i64: 1, 128>}, {pipeline_mode = #tpu.pipeline_mode<synchronous>, transform_indices = @transform_2, window_bounds = array<i64: 1, 128>}]} {
    %c0_i32 = arith.constant 0 : i32
    %0 = arith.cmpi eq, %arg0, %c0_i32 : i32
    %1 = arith.extui %0 : i1 to i32
    %c0_i32_0 = arith.constant 0 : i32
    %2 = arith.cmpi ne, %1, %c0_i32_0 : i32
    scf.if %2 {
      %cst_13 = arith.constant 0.000000e+00 : f32
      %19 = vector.broadcast %cst_13 : f32 to vector<1x128xf32>
      %c0_14 = arith.constant 0 : index
      %c0_15 = arith.constant 0 : index
      %20 = vector.load %arg4[%c0_14, %c0_15] : memref<1x128xf32, #tpu.memory_space<vmem>>, vector<1x128xf32>
      tpu.vector_store %arg4[%c0_14, %c0_15], %19 {strides = array<i32>} : memref<1x128xf32, #tpu.memory_space<vmem>>, vector<1x128xf32>,
      %cst_16 = arith.constant 0.000000e+00 : f32
      %21 = vector.broadcast %cst_16 : f32 to vector<1x128xf32>
      %c0_17 = arith.constant 0 : index
      %c0_18 = arith.constant 0 : index
      %22 = vector.load %arg5[%c0_17, %c0_18] : memref<1x128xf32, #tpu.memory_space<vmem>>, vector<1x128xf32>
      tpu.vector_store %arg5[%c0_17, %c0_18], %21 {strides = array<i32>} : memref<1x128xf32, #tpu.memory_space<vmem>>, vector<1x128xf32>,
    } else {
    }
    %c0 = arith.constant 0 : index
    %c0_1 = arith.constant 0 : index
    %3 = vector.load %arg1[%c0, %c0_1] : memref<512x128xbf16, #tpu.memory_space<vmem>>, vector<512x128xbf16>
    %4 = arith.extf %3 : vector<512x128xbf16> to vector<512x128xf32>
    %c0_2 = arith.constant 0 : index
    %c0_3 = arith.constant 0 : index
    %5 = vector.load %arg4[%c0_2, %c0_3] : memref<1x128xf32, #tpu.memory_space<vmem>>, vector<1x128xf32>
    %cst = arith.constant dense<0.000000e+00> : vector<128xf32>
    %6 = vector.multi_reduction <add>, %4, %cst [0] : vector<512x128xf32> to vector<128xf32>
    %7 = vector.shape_cast %6 : vector<128xf32> to vector<1x128xf32>
    %8 = arith.addf %5, %7 : vector<1x128xf32>
    %c0_4 = arith.constant 0 : index
    %c0_5 = arith.constant 0 : index
    %9 = vector.load %arg4[%c0_4, %c0_5] : memref<1x128xf32, #tpu.memory_space<vmem>>, vector<1x128xf32>
    tpu.vector_store %arg4[%c0_4, %c0_5], %8 {strides = array<i32>} : memref<1x128xf32, #tpu.memory_space<vmem>>, vector<1x128xf32>,
    %c0_6 = arith.constant 0 : index
    %c0_7 = arith.constant 0 : index
    %10 = vector.load %arg5[%c0_6, %c0_7] : memref<1x128xf32, #tpu.memory_space<vmem>>, vector<1x128xf32>
    %11 = arith.mulf %4, %4 : vector<512x128xf32>
    %cst_8 = arith.constant dense<0.000000e+00> : vector<128xf32>
    %12 = vector.multi_reduction <add>, %11, %cst_8 [0] : vector<512x128xf32> to vector<128xf32>
    %13 = vector.shape_cast %12 : vector<128xf32> to vector<1x128xf32>
    %14 = arith.addf %10, %13 : vector<1x128xf32>
    %c0_9 = arith.constant 0 : index
    %c0_10 = arith.constant 0 : index
    %15 = vector.load %arg5[%c0_9, %c0_10] : memref<1x128xf32, #tpu.memory_space<vmem>>, vector<1x128xf32>
    tpu.vector_store %arg5[%c0_9, %c0_10], %14 {strides = array<i32>} : memref<1x128xf32, #tpu.memory_space<vmem>>, vector<1x128xf32>,
    %c0_i32_11 = arith.constant 0 : i32
    %16 = arith.cmpi eq, %arg0, %c0_i32_11 : i32
    %17 = arith.extui %16 : i1 to i32
    %c0_i32_12 = arith.constant 0 : i32
    %18 = arith.cmpi ne, %17, %c0_i32_12 : i32
    scf.if %18 {
      %c0_13 = arith.constant 0 : index
      %c0_14 = arith.constant 0 : index
      %19 = vector.load %arg4[%c0_13, %c0_14] : memref<1x128xf32, #tpu.memory_space<vmem>>, vector<1x128xf32>
      %c0_15 = arith.constant 0 : index
      %c0_16 = arith.constant 0 : index
      %20 = vector.load %arg2[%c0_15, %c0_16] : memref<1x128xf32, #tpu.memory_space<vmem>>, vector<1x128xf32>
      tpu.vector_store %arg2[%c0_15, %c0_16], %19 {strides = array<i32>} : memref<1x128xf32, #tpu.memory_space<vmem>>, vector<1x128xf32>,
      %c0_17 = arith.constant 0 : index
      %c0_18 = arith.constant 0 : index
      %21 = vector.load %arg5[%c0_17, %c0_18] : memref<1x128xf32, #tpu.memory_space<vmem>>, vector<1x128xf32>
      %c0_19 = arith.constant 0 : index
      %c0_20 = arith.constant 0 : index
      %22 = vector.load %arg3[%c0_19, %c0_20] : memref<1x128xf32, #tpu.memory_space<vmem>>, vector<1x128xf32>
      tpu.vector_store %arg3[%c0_19, %c0_20], %21 {strides = array<i32>} : memref<1x128xf32, #tpu.memory_space<vmem>>, vector<1x128xf32>,
    } else {
    }
    return
  }
  func.func @transform_0(%arg0: i32) -> (i32, i32) {
    %c0_i32 = arith.constant 0 : i32
    %c0_i32_0 = arith.constant 0 : i32
    return %arg0, %c0_i32 : i32, i32
  }
  func.func @transform_1(%arg0: i32) -> (i32, i32) {
    %c0_i32 = arith.constant 0 : i32
    %c0_i32_0 = arith.constant 0 : i32
    %c0_i32_1 = arith.constant 0 : i32
    return %c0_i32, %c0_i32_0 : i32, i32
  }
  func.func @transform_2(%arg0: i32) -> (i32, i32) {
    %c0_i32 = arith.constant 0 : i32
    %c0_i32_0 = arith.constant 0 : i32
    %c0_i32_1 = arith.constant 0 : i32
    return %c0_i32, %c0_i32_0 : i32, i32
  }
}

module attributes {stable_mosaic.version = 11 : i64} {
  func.func @conv_matmul_kernel(%arg0: i32, %arg1: i32, %arg2: i32, %arg3: memref<256x256xbf16, #tpu.memory_space<vmem>>, %arg4: memref<256x128xbf16, #tpu.memory_space<vmem>>, %arg5: memref<1x128xf32, #tpu.memory_space<vmem>>, %arg6: memref<256x128xbf16, #tpu.memory_space<vmem>>, %arg7: memref<256x128xf32, #tpu.memory_space<vmem>>) attributes {dimension_semantics = [#tpu.dimension_semantics<parallel>, #tpu.dimension_semantics<parallel>, #tpu.dimension_semantics<arbitrary>], iteration_bounds = array<i64: 2, 1, 1>, scalar_prefetch = 0 : i64, scratch_operands = 1 : i64, tpu.core_type = #tpu.core_type<tc>, window_params = [{transform_indices = @transform_0, window_bounds = array<i64: 256, 256>}, {transform_indices = @transform_1, window_bounds = array<i64: 256, 128>}, {transform_indices = @transform_2, window_bounds = array<i64: 1, 128>}, {transform_indices = @transform_3, window_bounds = array<i64: 256, 128>}]} {
    %c0_i32 = arith.constant 0 : i32
    %0 = arith.cmpi eq, %arg2, %c0_i32 : i32
    %1 = arith.extui %0 : i1 to i32
    %c0_i32_0 = arith.constant 0 : i32
    %2 = arith.cmpi ne, %1, %c0_i32_0 : i32
    scf.if %2 {
      %cst_10 = arith.constant 0.000000e+00 : f32
      %12 = vector.broadcast %cst_10 : f32 to vector<256x128xf32>
      %c0_11 = arith.constant 0 : index
      %c0_12 = arith.constant 0 : index
      %13 = vector.load %arg7[%c0_11, %c0_12] : memref<256x128xf32, #tpu.memory_space<vmem>>, vector<256x128xf32>
      tpu.vector_store %arg7[%c0_11, %c0_12], %12 {strides = array<i32>} : memref<256x128xf32, #tpu.memory_space<vmem>>, vector<256x128xf32>,
    } else {
    }
    %c0 = arith.constant 0 : index
    %c0_1 = arith.constant 0 : index
    %3 = vector.load %arg7[%c0, %c0_1] : memref<256x128xf32, #tpu.memory_space<vmem>>, vector<256x128xf32>
    %c0_2 = arith.constant 0 : index
    %c0_3 = arith.constant 0 : index
    %4 = vector.load %arg3[%c0_2, %c0_3] : memref<256x256xbf16, #tpu.memory_space<vmem>>, vector<256x256xbf16>
    %c0_4 = arith.constant 0 : index
    %c0_5 = arith.constant 0 : index
    %5 = vector.load %arg4[%c0_4, %c0_5] : memref<256x128xbf16, #tpu.memory_space<vmem>>, vector<256x128xbf16>
    %cst = arith.constant dense<0.000000e+00> : vector<256x128xf32>
    %6 = tpu.matmul %4, %5, %cst {dimension_numbers = #tpu.dot_dimension_numbers<[1], [0], [0], [1], [0, 0, 1, 1], [], []>} : vector<256x256xbf16>, vector<256x128xbf16>, vector<256x128xf32> -> vector<256x128xf32>
    %7 = arith.addf %3, %6 : vector<256x128xf32>
    %c0_6 = arith.constant 0 : index
    %c0_7 = arith.constant 0 : index
    %8 = vector.load %arg7[%c0_6, %c0_7] : memref<256x128xf32, #tpu.memory_space<vmem>>, vector<256x128xf32>
    tpu.vector_store %arg7[%c0_6, %c0_7], %7 {strides = array<i32>} : memref<256x128xf32, #tpu.memory_space<vmem>>, vector<256x128xf32>,
    %c0_i32_8 = arith.constant 0 : i32
    %9 = arith.cmpi eq, %arg2, %c0_i32_8 : i32
    %10 = arith.extui %9 : i1 to i32
    %c0_i32_9 = arith.constant 0 : i32
    %11 = arith.cmpi ne, %10, %c0_i32_9 : i32
    scf.if %11 {
      %c0_10 = arith.constant 0 : index
      %c0_11 = arith.constant 0 : index
      %12 = vector.load %arg7[%c0_10, %c0_11] : memref<256x128xf32, #tpu.memory_space<vmem>>, vector<256x128xf32>
      %c0_12 = arith.constant 0 : index
      %c0_13 = arith.constant 0 : index
      %13 = vector.load %arg5[%c0_12, %c0_13] : memref<1x128xf32, #tpu.memory_space<vmem>>, vector<1x128xf32>
      %14 = vector.broadcast %13 : vector<1x128xf32> to vector<256x128xf32>
      %15 = arith.addf %12, %14 : vector<256x128xf32>
      %16 = arith.truncf %15 : vector<256x128xf32> to vector<256x128xbf16>
      %c0_14 = arith.constant 0 : index
      %c0_15 = arith.constant 0 : index
      %17 = vector.load %arg6[%c0_14, %c0_15] : memref<256x128xbf16, #tpu.memory_space<vmem>>, vector<256x128xbf16>
      tpu.vector_store %arg6[%c0_14, %c0_15], %16 {strides = array<i32>} : memref<256x128xbf16, #tpu.memory_space<vmem>>, vector<256x128xbf16>,
    } else {
    }
    return
  }
  func.func @transform_0(%arg0: i32, %arg1: i32, %arg2: i32) -> (i32, i32) {
    %c0_i32 = arith.constant 0 : i32
    return %arg0, %arg2 : i32, i32
  }
  func.func @transform_1(%arg0: i32, %arg1: i32, %arg2: i32) -> (i32, i32) {
    %c0_i32 = arith.constant 0 : i32
    return %arg2, %arg1 : i32, i32
  }
  func.func @transform_2(%arg0: i32, %arg1: i32, %arg2: i32) -> (i32, i32) {
    %c0_i32 = arith.constant 0 : i32
    %c0_i32_0 = arith.constant 0 : i32
    return %c0_i32, %arg1 : i32, i32
  }
  func.func @transform_3(%arg0: i32, %arg1: i32, %arg2: i32) -> (i32, i32) {
    %c0_i32 = arith.constant 0 : i32
    return %arg0, %arg1 : i32, i32
  }
}

module attributes {stable_mosaic.version = 11 : i64} {
  func.func @bn_act_kernel(%arg0: i32, %arg1: memref<512x128xbf16, #tpu.memory_space<vmem>>, %arg2: memref<1x128xf32, #tpu.memory_space<vmem>>, %arg3: memref<1x128xf32, #tpu.memory_space<vmem>>, %arg4: memref<512x8xbf16, #tpu.memory_space<vmem>>) attributes {dimension_semantics = [#tpu.dimension_semantics<parallel>], iteration_bounds = array<i64: 1>, scalar_prefetch = 0 : i64, scratch_operands = 0 : i64, tpu.core_type = #tpu.core_type<tc>, window_params = [{transform_indices = @transform_0, window_bounds = array<i64: 512, 128>}, {pipeline_mode = #tpu.pipeline_mode<synchronous>, transform_indices = @transform_1, window_bounds = array<i64: 1, 128>}, {pipeline_mode = #tpu.pipeline_mode<synchronous>, transform_indices = @transform_2, window_bounds = array<i64: 1, 128>}, {transform_indices = @transform_3, window_bounds = array<i64: 512, 8>}]} {
    %c0 = arith.constant 0 : index
    %c0_0 = arith.constant 0 : index
    %0 = vector.load %arg1[%c0, %c0_0] : memref<512x128xbf16, #tpu.memory_space<vmem>>, vector<512x128xbf16>
    %1 = arith.extf %0 : vector<512x128xbf16> to vector<512x128xf32>
    %c0_1 = arith.constant 0 : index
    %c0_2 = arith.constant 0 : index
    %2 = vector.load %arg2[%c0_1, %c0_2] : memref<1x128xf32, #tpu.memory_space<vmem>>, vector<1x128xf32>
    %3 = vector.broadcast %2 : vector<1x128xf32> to vector<512x128xf32>
    %4 = arith.mulf %1, %3 : vector<512x128xf32>
    %c0_3 = arith.constant 0 : index
    %c0_4 = arith.constant 0 : index
    %5 = vector.load %arg3[%c0_3, %c0_4] : memref<1x128xf32, #tpu.memory_space<vmem>>, vector<1x128xf32>
    %6 = vector.broadcast %5 : vector<1x128xf32> to vector<512x128xf32>
    %7 = arith.addf %4, %6 : vector<512x128xf32>
    %cst = arith.constant 0.000000e+00 : f32
    %8 = vector.broadcast %cst : f32 to vector<512x128xf32>
    %9 = arith.maximumf %7, %8 : vector<512x128xf32>
    %10 = vector.extract_strided_slice %9 {offsets = [0, 0], sizes = [512, 8], strides = [1, 1]} : vector<512x128xf32> to vector<512x8xf32>
    %11 = arith.truncf %10 : vector<512x8xf32> to vector<512x8xbf16>
    %c0_5 = arith.constant 0 : index
    %c0_6 = arith.constant 0 : index
    %12 = vector.load %arg4[%c0_5, %c0_6] : memref<512x8xbf16, #tpu.memory_space<vmem>>, vector<512x8xbf16>
    tpu.vector_store %arg4[%c0_5, %c0_6], %11 {strides = array<i32>} : memref<512x8xbf16, #tpu.memory_space<vmem>>, vector<512x8xbf16>,
    return
  }
  func.func @transform_0(%arg0: i32) -> (i32, i32) {
    %c0_i32 = arith.constant 0 : i32
    %c0_i32_0 = arith.constant 0 : i32
    return %arg0, %c0_i32 : i32, i32
  }
  func.func @transform_1(%arg0: i32) -> (i32, i32) {
    %c0_i32 = arith.constant 0 : i32
    %c0_i32_0 = arith.constant 0 : i32
    %c0_i32_1 = arith.constant 0 : i32
    return %c0_i32, %c0_i32_0 : i32, i32
  }
  func.func @transform_2(%arg0: i32) -> (i32, i32) {
    %c0_i32 = arith.constant 0 : i32
    %c0_i32_0 = arith.constant 0 : i32
    %c0_i32_1 = arith.constant 0 : i32
    return %c0_i32, %c0_i32_0 : i32, i32
  }
  func.func @transform_3(%arg0: i32) -> (i32, i32) {
    %c0_i32 = arith.constant 0 : i32
    %c0_i32_0 = arith.constant 0 : i32
    return %arg0, %c0_i32 : i32, i32
  }
}

module attributes {stable_mosaic.version = 11 : i64} {
  func.func @conv_matmul_kernel(%arg0: i32, %arg1: i32, %arg2: i32, %arg3: memref<128x128xbf16, #tpu.memory_space<vmem>>, %arg4: memref<128x128xbf16, #tpu.memory_space<vmem>>, %arg5: memref<1x128xf32, #tpu.memory_space<vmem>>, %arg6: memref<128x128xbf16, #tpu.memory_space<vmem>>, %arg7: memref<128x128xf32, #tpu.memory_space<vmem>>) attributes {dimension_semantics = [#tpu.dimension_semantics<parallel>, #tpu.dimension_semantics<parallel>, #tpu.dimension_semantics<arbitrary>], iteration_bounds = array<i64: 1, 1, 1>, scalar_prefetch = 0 : i64, scratch_operands = 1 : i64, tpu.core_type = #tpu.core_type<tc>, window_params = [{transform_indices = @transform_0, window_bounds = array<i64: 128, 128>}, {transform_indices = @transform_1, window_bounds = array<i64: 128, 128>}, {transform_indices = @transform_2, window_bounds = array<i64: 1, 128>}, {transform_indices = @transform_3, window_bounds = array<i64: 128, 128>}]} {
    %c0_i32 = arith.constant 0 : i32
    %0 = arith.cmpi eq, %arg2, %c0_i32 : i32
    %1 = arith.extui %0 : i1 to i32
    %c0_i32_0 = arith.constant 0 : i32
    %2 = arith.cmpi ne, %1, %c0_i32_0 : i32
    scf.if %2 {
      %cst_10 = arith.constant 0.000000e+00 : f32
      %12 = vector.broadcast %cst_10 : f32 to vector<128x128xf32>
      %c0_11 = arith.constant 0 : index
      %c0_12 = arith.constant 0 : index
      %13 = vector.load %arg7[%c0_11, %c0_12] : memref<128x128xf32, #tpu.memory_space<vmem>>, vector<128x128xf32>
      tpu.vector_store %arg7[%c0_11, %c0_12], %12 {strides = array<i32>} : memref<128x128xf32, #tpu.memory_space<vmem>>, vector<128x128xf32>,
    } else {
    }
    %c0 = arith.constant 0 : index
    %c0_1 = arith.constant 0 : index
    %3 = vector.load %arg7[%c0, %c0_1] : memref<128x128xf32, #tpu.memory_space<vmem>>, vector<128x128xf32>
    %c0_2 = arith.constant 0 : index
    %c0_3 = arith.constant 0 : index
    %4 = vector.load %arg3[%c0_2, %c0_3] : memref<128x128xbf16, #tpu.memory_space<vmem>>, vector<128x128xbf16>
    %c0_4 = arith.constant 0 : index
    %c0_5 = arith.constant 0 : index
    %5 = vector.load %arg4[%c0_4, %c0_5] : memref<128x128xbf16, #tpu.memory_space<vmem>>, vector<128x128xbf16>
    %cst = arith.constant dense<0.000000e+00> : vector<128x128xf32>
    %6 = tpu.matmul %4, %5, %cst {dimension_numbers = #tpu.dot_dimension_numbers<[1], [0], [0], [1], [0, 0, 1, 1], [], []>} : vector<128x128xbf16>, vector<128x128xbf16>, vector<128x128xf32> -> vector<128x128xf32>
    %7 = arith.addf %3, %6 : vector<128x128xf32>
    %c0_6 = arith.constant 0 : index
    %c0_7 = arith.constant 0 : index
    %8 = vector.load %arg7[%c0_6, %c0_7] : memref<128x128xf32, #tpu.memory_space<vmem>>, vector<128x128xf32>
    tpu.vector_store %arg7[%c0_6, %c0_7], %7 {strides = array<i32>} : memref<128x128xf32, #tpu.memory_space<vmem>>, vector<128x128xf32>,
    %c0_i32_8 = arith.constant 0 : i32
    %9 = arith.cmpi eq, %arg2, %c0_i32_8 : i32
    %10 = arith.extui %9 : i1 to i32
    %c0_i32_9 = arith.constant 0 : i32
    %11 = arith.cmpi ne, %10, %c0_i32_9 : i32
    scf.if %11 {
      %c0_10 = arith.constant 0 : index
      %c0_11 = arith.constant 0 : index
      %12 = vector.load %arg7[%c0_10, %c0_11] : memref<128x128xf32, #tpu.memory_space<vmem>>, vector<128x128xf32>
      %c0_12 = arith.constant 0 : index
      %c0_13 = arith.constant 0 : index
      %13 = vector.load %arg5[%c0_12, %c0_13] : memref<1x128xf32, #tpu.memory_space<vmem>>, vector<1x128xf32>
      %14 = vector.broadcast %13 : vector<1x128xf32> to vector<128x128xf32>
      %15 = arith.addf %12, %14 : vector<128x128xf32>
      %16 = arith.truncf %15 : vector<128x128xf32> to vector<128x128xbf16>
      %c0_14 = arith.constant 0 : index
      %c0_15 = arith.constant 0 : index
      %17 = vector.load %arg6[%c0_14, %c0_15] : memref<128x128xbf16, #tpu.memory_space<vmem>>, vector<128x128xbf16>
      tpu.vector_store %arg6[%c0_14, %c0_15], %16 {strides = array<i32>} : memref<128x128xbf16, #tpu.memory_space<vmem>>, vector<128x128xbf16>,
    } else {
    }
    return
  }
  func.func @transform_0(%arg0: i32, %arg1: i32, %arg2: i32) -> (i32, i32) {
    %c0_i32 = arith.constant 0 : i32
    return %arg0, %arg2 : i32, i32
  }
  func.func @transform_1(%arg0: i32, %arg1: i32, %arg2: i32) -> (i32, i32) {
    %c0_i32 = arith.constant 0 : i32
    return %arg2, %arg1 : i32, i32
  }
  func.func @transform_2(%arg0: i32, %arg1: i32, %arg2: i32) -> (i32, i32) {
    %c0_i32 = arith.constant 0 : i32
    %c0_i32_0 = arith.constant 0 : i32
    return %c0_i32, %arg1 : i32, i32
  }
  func.func @transform_3(%arg0: i32, %arg1: i32, %arg2: i32) -> (i32, i32) {
    %c0_i32 = arith.constant 0 : i32
    return %arg0, %arg1 : i32, i32
  }
}

module attributes {stable_mosaic.version = 11 : i64} {
  func.func @stats_kernel(%arg0: i32, %arg1: memref<128x128xbf16, #tpu.memory_space<vmem>>, %arg2: memref<1x128xf32, #tpu.memory_space<vmem>>, %arg3: memref<1x128xf32, #tpu.memory_space<vmem>>, %arg4: memref<1x128xf32, #tpu.memory_space<vmem>>, %arg5: memref<1x128xf32, #tpu.memory_space<vmem>>) attributes {dimension_semantics = [#tpu.dimension_semantics<arbitrary>], iteration_bounds = array<i64: 1>, scalar_prefetch = 0 : i64, scratch_operands = 2 : i64, tpu.core_type = #tpu.core_type<tc>, window_params = [{transform_indices = @transform_0, window_bounds = array<i64: 128, 128>}, {pipeline_mode = #tpu.pipeline_mode<synchronous>, transform_indices = @transform_1, window_bounds = array<i64: 1, 128>}, {pipeline_mode = #tpu.pipeline_mode<synchronous>, transform_indices = @transform_2, window_bounds = array<i64: 1, 128>}]} {
    %c0_i32 = arith.constant 0 : i32
    %0 = arith.cmpi eq, %arg0, %c0_i32 : i32
    %1 = arith.extui %0 : i1 to i32
    %c0_i32_0 = arith.constant 0 : i32
    %2 = arith.cmpi ne, %1, %c0_i32_0 : i32
    scf.if %2 {
      %cst_13 = arith.constant 0.000000e+00 : f32
      %19 = vector.broadcast %cst_13 : f32 to vector<1x128xf32>
      %c0_14 = arith.constant 0 : index
      %c0_15 = arith.constant 0 : index
      %20 = vector.load %arg4[%c0_14, %c0_15] : memref<1x128xf32, #tpu.memory_space<vmem>>, vector<1x128xf32>
      tpu.vector_store %arg4[%c0_14, %c0_15], %19 {strides = array<i32>} : memref<1x128xf32, #tpu.memory_space<vmem>>, vector<1x128xf32>,
      %cst_16 = arith.constant 0.000000e+00 : f32
      %21 = vector.broadcast %cst_16 : f32 to vector<1x128xf32>
      %c0_17 = arith.constant 0 : index
      %c0_18 = arith.constant 0 : index
      %22 = vector.load %arg5[%c0_17, %c0_18] : memref<1x128xf32, #tpu.memory_space<vmem>>, vector<1x128xf32>
      tpu.vector_store %arg5[%c0_17, %c0_18], %21 {strides = array<i32>} : memref<1x128xf32, #tpu.memory_space<vmem>>, vector<1x128xf32>,
    } else {
    }
    %c0 = arith.constant 0 : index
    %c0_1 = arith.constant 0 : index
    %3 = vector.load %arg1[%c0, %c0_1] : memref<128x128xbf16, #tpu.memory_space<vmem>>, vector<128x128xbf16>
    %4 = arith.extf %3 : vector<128x128xbf16> to vector<128x128xf32>
    %c0_2 = arith.constant 0 : index
    %c0_3 = arith.constant 0 : index
    %5 = vector.load %arg4[%c0_2, %c0_3] : memref<1x128xf32, #tpu.memory_space<vmem>>, vector<1x128xf32>
    %cst = arith.constant dense<0.000000e+00> : vector<128xf32>
    %6 = vector.multi_reduction <add>, %4, %cst [0] : vector<128x128xf32> to vector<128xf32>
    %7 = vector.shape_cast %6 : vector<128xf32> to vector<1x128xf32>
    %8 = arith.addf %5, %7 : vector<1x128xf32>
    %c0_4 = arith.constant 0 : index
    %c0_5 = arith.constant 0 : index
    %9 = vector.load %arg4[%c0_4, %c0_5] : memref<1x128xf32, #tpu.memory_space<vmem>>, vector<1x128xf32>
    tpu.vector_store %arg4[%c0_4, %c0_5], %8 {strides = array<i32>} : memref<1x128xf32, #tpu.memory_space<vmem>>, vector<1x128xf32>,
    %c0_6 = arith.constant 0 : index
    %c0_7 = arith.constant 0 : index
    %10 = vector.load %arg5[%c0_6, %c0_7] : memref<1x128xf32, #tpu.memory_space<vmem>>, vector<1x128xf32>
    %11 = arith.mulf %4, %4 : vector<128x128xf32>
    %cst_8 = arith.constant dense<0.000000e+00> : vector<128xf32>
    %12 = vector.multi_reduction <add>, %11, %cst_8 [0] : vector<128x128xf32> to vector<128xf32>
    %13 = vector.shape_cast %12 : vector<128xf32> to vector<1x128xf32>
    %14 = arith.addf %10, %13 : vector<1x128xf32>
    %c0_9 = arith.constant 0 : index
    %c0_10 = arith.constant 0 : index
    %15 = vector.load %arg5[%c0_9, %c0_10] : memref<1x128xf32, #tpu.memory_space<vmem>>, vector<1x128xf32>
    tpu.vector_store %arg5[%c0_9, %c0_10], %14 {strides = array<i32>} : memref<1x128xf32, #tpu.memory_space<vmem>>, vector<1x128xf32>,
    %c0_i32_11 = arith.constant 0 : i32
    %16 = arith.cmpi eq, %arg0, %c0_i32_11 : i32
    %17 = arith.extui %16 : i1 to i32
    %c0_i32_12 = arith.constant 0 : i32
    %18 = arith.cmpi ne, %17, %c0_i32_12 : i32
    scf.if %18 {
      %c0_13 = arith.constant 0 : index
      %c0_14 = arith.constant 0 : index
      %19 = vector.load %arg4[%c0_13, %c0_14] : memref<1x128xf32, #tpu.memory_space<vmem>>, vector<1x128xf32>
      %c0_15 = arith.constant 0 : index
      %c0_16 = arith.constant 0 : index
      %20 = vector.load %arg2[%c0_15, %c0_16] : memref<1x128xf32, #tpu.memory_space<vmem>>, vector<1x128xf32>
      tpu.vector_store %arg2[%c0_15, %c0_16], %19 {strides = array<i32>} : memref<1x128xf32, #tpu.memory_space<vmem>>, vector<1x128xf32>,
      %c0_17 = arith.constant 0 : index
      %c0_18 = arith.constant 0 : index
      %21 = vector.load %arg5[%c0_17, %c0_18] : memref<1x128xf32, #tpu.memory_space<vmem>>, vector<1x128xf32>
      %c0_19 = arith.constant 0 : index
      %c0_20 = arith.constant 0 : index
      %22 = vector.load %arg3[%c0_19, %c0_20] : memref<1x128xf32, #tpu.memory_space<vmem>>, vector<1x128xf32>
      tpu.vector_store %arg3[%c0_19, %c0_20], %21 {strides = array<i32>} : memref<1x128xf32, #tpu.memory_space<vmem>>, vector<1x128xf32>,
    } else {
    }
    return
  }
  func.func @transform_0(%arg0: i32) -> (i32, i32) {
    %c0_i32 = arith.constant 0 : i32
    %c0_i32_0 = arith.constant 0 : i32
    return %arg0, %c0_i32 : i32, i32
  }
  func.func @transform_1(%arg0: i32) -> (i32, i32) {
    %c0_i32 = arith.constant 0 : i32
    %c0_i32_0 = arith.constant 0 : i32
    %c0_i32_1 = arith.constant 0 : i32
    return %c0_i32, %c0_i32_0 : i32, i32
  }
  func.func @transform_2(%arg0: i32) -> (i32, i32) {
    %c0_i32 = arith.constant 0 : i32
    %c0_i32_0 = arith.constant 0 : i32
    %c0_i32_1 = arith.constant 0 : i32
    return %c0_i32, %c0_i32_0 : i32, i32
  }
}

module attributes {stable_mosaic.version = 11 : i64} {
  func.func @bn_act_kernel(%arg0: i32, %arg1: memref<128x128xbf16, #tpu.memory_space<vmem>>, %arg2: memref<1x128xf32, #tpu.memory_space<vmem>>, %arg3: memref<1x128xf32, #tpu.memory_space<vmem>>, %arg4: memref<128x16xbf16, #tpu.memory_space<vmem>>) attributes {dimension_semantics = [#tpu.dimension_semantics<parallel>], iteration_bounds = array<i64: 1>, scalar_prefetch = 0 : i64, scratch_operands = 0 : i64, tpu.core_type = #tpu.core_type<tc>, window_params = [{transform_indices = @transform_0, window_bounds = array<i64: 128, 128>}, {pipeline_mode = #tpu.pipeline_mode<synchronous>, transform_indices = @transform_1, window_bounds = array<i64: 1, 128>}, {pipeline_mode = #tpu.pipeline_mode<synchronous>, transform_indices = @transform_2, window_bounds = array<i64: 1, 128>}, {transform_indices = @transform_3, window_bounds = array<i64: 128, 16>}]} {
    %c0 = arith.constant 0 : index
    %c0_0 = arith.constant 0 : index
    %0 = vector.load %arg1[%c0, %c0_0] : memref<128x128xbf16, #tpu.memory_space<vmem>>, vector<128x128xbf16>
    %1 = arith.extf %0 : vector<128x128xbf16> to vector<128x128xf32>
    %c0_1 = arith.constant 0 : index
    %c0_2 = arith.constant 0 : index
    %2 = vector.load %arg2[%c0_1, %c0_2] : memref<1x128xf32, #tpu.memory_space<vmem>>, vector<1x128xf32>
    %3 = vector.broadcast %2 : vector<1x128xf32> to vector<128x128xf32>
    %4 = arith.mulf %1, %3 : vector<128x128xf32>
    %c0_3 = arith.constant 0 : index
    %c0_4 = arith.constant 0 : index
    %5 = vector.load %arg3[%c0_3, %c0_4] : memref<1x128xf32, #tpu.memory_space<vmem>>, vector<1x128xf32>
    %6 = vector.broadcast %5 : vector<1x128xf32> to vector<128x128xf32>
    %7 = arith.addf %4, %6 : vector<128x128xf32>
    %cst = arith.constant 0.000000e+00 : f32
    %8 = vector.broadcast %cst : f32 to vector<128x128xf32>
    %9 = arith.maximumf %7, %8 : vector<128x128xf32>
    %10 = vector.extract_strided_slice %9 {offsets = [0, 0], sizes = [128, 16], strides = [1, 1]} : vector<128x128xf32> to vector<128x16xf32>
    %11 = arith.truncf %10 : vector<128x16xf32> to vector<128x16xbf16>
    %c0_5 = arith.constant 0 : index
    %c0_6 = arith.constant 0 : index
    %12 = vector.load %arg4[%c0_5, %c0_6] : memref<128x16xbf16, #tpu.memory_space<vmem>>, vector<128x16xbf16>
    tpu.vector_store %arg4[%c0_5, %c0_6], %11 {strides = array<i32>} : memref<128x16xbf16, #tpu.memory_space<vmem>>, vector<128x16xbf16>,
    return
  }
  func.func @transform_0(%arg0: i32) -> (i32, i32) {
    %c0_i32 = arith.constant 0 : i32
    %c0_i32_0 = arith.constant 0 : i32
    return %arg0, %c0_i32 : i32, i32
  }
  func.func @transform_1(%arg0: i32) -> (i32, i32) {
    %c0_i32 = arith.constant 0 : i32
    %c0_i32_0 = arith.constant 0 : i32
    %c0_i32_1 = arith.constant 0 : i32
    return %c0_i32, %c0_i32_0 : i32, i32
  }
  func.func @transform_2(%arg0: i32) -> (i32, i32) {
    %c0_i32 = arith.constant 0 : i32
    %c0_i32_0 = arith.constant 0 : i32
    %c0_i32_1 = arith.constant 0 : i32
    return %c0_i32, %c0_i32_0 : i32, i32
  }
  func.func @transform_3(%arg0: i32) -> (i32, i32) {
    %c0_i32 = arith.constant 0 : i32
    %c0_i32_0 = arith.constant 0 : i32
    return %arg0, %c0_i32 : i32, i32
  }
}

module attributes {stable_mosaic.version = 11 : i64} {
  func.func @conv_matmul_kernel(%arg0: i32, %arg1: i32, %arg2: i32, %arg3: memref<32x256xbf16, #tpu.memory_space<vmem>>, %arg4: memref<256x128xbf16, #tpu.memory_space<vmem>>, %arg5: memref<1x128xf32, #tpu.memory_space<vmem>>, %arg6: memref<32x128xbf16, #tpu.memory_space<vmem>>, %arg7: memref<32x128xf32, #tpu.memory_space<vmem>>) attributes {dimension_semantics = [#tpu.dimension_semantics<parallel>, #tpu.dimension_semantics<parallel>, #tpu.dimension_semantics<arbitrary>], iteration_bounds = array<i64: 1, 1, 1>, scalar_prefetch = 0 : i64, scratch_operands = 1 : i64, tpu.core_type = #tpu.core_type<tc>, window_params = [{transform_indices = @transform_0, window_bounds = array<i64: 32, 256>}, {transform_indices = @transform_1, window_bounds = array<i64: 256, 128>}, {transform_indices = @transform_2, window_bounds = array<i64: 1, 128>}, {transform_indices = @transform_3, window_bounds = array<i64: 32, 128>}]} {
    %c0_i32 = arith.constant 0 : i32
    %0 = arith.cmpi eq, %arg2, %c0_i32 : i32
    %1 = arith.extui %0 : i1 to i32
    %c0_i32_0 = arith.constant 0 : i32
    %2 = arith.cmpi ne, %1, %c0_i32_0 : i32
    scf.if %2 {
      %cst_10 = arith.constant 0.000000e+00 : f32
      %12 = vector.broadcast %cst_10 : f32 to vector<32x128xf32>
      %c0_11 = arith.constant 0 : index
      %c0_12 = arith.constant 0 : index
      %13 = vector.load %arg7[%c0_11, %c0_12] : memref<32x128xf32, #tpu.memory_space<vmem>>, vector<32x128xf32>
      tpu.vector_store %arg7[%c0_11, %c0_12], %12 {strides = array<i32>} : memref<32x128xf32, #tpu.memory_space<vmem>>, vector<32x128xf32>,
    } else {
    }
    %c0 = arith.constant 0 : index
    %c0_1 = arith.constant 0 : index
    %3 = vector.load %arg7[%c0, %c0_1] : memref<32x128xf32, #tpu.memory_space<vmem>>, vector<32x128xf32>
    %c0_2 = arith.constant 0 : index
    %c0_3 = arith.constant 0 : index
    %4 = vector.load %arg3[%c0_2, %c0_3] : memref<32x256xbf16, #tpu.memory_space<vmem>>, vector<32x256xbf16>
    %c0_4 = arith.constant 0 : index
    %c0_5 = arith.constant 0 : index
    %5 = vector.load %arg4[%c0_4, %c0_5] : memref<256x128xbf16, #tpu.memory_space<vmem>>, vector<256x128xbf16>
    %cst = arith.constant dense<0.000000e+00> : vector<32x128xf32>
    %6 = tpu.matmul %4, %5, %cst {dimension_numbers = #tpu.dot_dimension_numbers<[1], [0], [0], [1], [0, 0, 1, 1], [], []>} : vector<32x256xbf16>, vector<256x128xbf16>, vector<32x128xf32> -> vector<32x128xf32>
    %7 = arith.addf %3, %6 : vector<32x128xf32>
    %c0_6 = arith.constant 0 : index
    %c0_7 = arith.constant 0 : index
    %8 = vector.load %arg7[%c0_6, %c0_7] : memref<32x128xf32, #tpu.memory_space<vmem>>, vector<32x128xf32>
    tpu.vector_store %arg7[%c0_6, %c0_7], %7 {strides = array<i32>} : memref<32x128xf32, #tpu.memory_space<vmem>>, vector<32x128xf32>,
    %c0_i32_8 = arith.constant 0 : i32
    %9 = arith.cmpi eq, %arg2, %c0_i32_8 : i32
    %10 = arith.extui %9 : i1 to i32
    %c0_i32_9 = arith.constant 0 : i32
    %11 = arith.cmpi ne, %10, %c0_i32_9 : i32
    scf.if %11 {
      %c0_10 = arith.constant 0 : index
      %c0_11 = arith.constant 0 : index
      %12 = vector.load %arg7[%c0_10, %c0_11] : memref<32x128xf32, #tpu.memory_space<vmem>>, vector<32x128xf32>
      %c0_12 = arith.constant 0 : index
      %c0_13 = arith.constant 0 : index
      %13 = vector.load %arg5[%c0_12, %c0_13] : memref<1x128xf32, #tpu.memory_space<vmem>>, vector<1x128xf32>
      %14 = vector.broadcast %13 : vector<1x128xf32> to vector<32x128xf32>
      %15 = arith.addf %12, %14 : vector<32x128xf32>
      %16 = arith.truncf %15 : vector<32x128xf32> to vector<32x128xbf16>
      %c0_14 = arith.constant 0 : index
      %c0_15 = arith.constant 0 : index
      %17 = vector.load %arg6[%c0_14, %c0_15] : memref<32x128xbf16, #tpu.memory_space<vmem>>, vector<32x128xbf16>
      tpu.vector_store %arg6[%c0_14, %c0_15], %16 {strides = array<i32>} : memref<32x128xbf16, #tpu.memory_space<vmem>>, vector<32x128xbf16>,
    } else {
    }
    return
  }
  func.func @transform_0(%arg0: i32, %arg1: i32, %arg2: i32) -> (i32, i32) {
    %c0_i32 = arith.constant 0 : i32
    return %arg0, %arg2 : i32, i32
  }
  func.func @transform_1(%arg0: i32, %arg1: i32, %arg2: i32) -> (i32, i32) {
    %c0_i32 = arith.constant 0 : i32
    return %arg2, %arg1 : i32, i32
  }
  func.func @transform_2(%arg0: i32, %arg1: i32, %arg2: i32) -> (i32, i32) {
    %c0_i32 = arith.constant 0 : i32
    %c0_i32_0 = arith.constant 0 : i32
    return %c0_i32, %arg1 : i32, i32
  }
  func.func @transform_3(%arg0: i32, %arg1: i32, %arg2: i32) -> (i32, i32) {
    %c0_i32 = arith.constant 0 : i32
    return %arg0, %arg1 : i32, i32
  }
}

module attributes {stable_mosaic.version = 11 : i64} {
  func.func @stats_kernel(%arg0: i32, %arg1: memref<32x128xbf16, #tpu.memory_space<vmem>>, %arg2: memref<1x128xf32, #tpu.memory_space<vmem>>, %arg3: memref<1x128xf32, #tpu.memory_space<vmem>>, %arg4: memref<1x128xf32, #tpu.memory_space<vmem>>, %arg5: memref<1x128xf32, #tpu.memory_space<vmem>>) attributes {dimension_semantics = [#tpu.dimension_semantics<arbitrary>], iteration_bounds = array<i64: 1>, scalar_prefetch = 0 : i64, scratch_operands = 2 : i64, tpu.core_type = #tpu.core_type<tc>, window_params = [{transform_indices = @transform_0, window_bounds = array<i64: 32, 128>}, {pipeline_mode = #tpu.pipeline_mode<synchronous>, transform_indices = @transform_1, window_bounds = array<i64: 1, 128>}, {pipeline_mode = #tpu.pipeline_mode<synchronous>, transform_indices = @transform_2, window_bounds = array<i64: 1, 128>}]} {
    %c0_i32 = arith.constant 0 : i32
    %0 = arith.cmpi eq, %arg0, %c0_i32 : i32
    %1 = arith.extui %0 : i1 to i32
    %c0_i32_0 = arith.constant 0 : i32
    %2 = arith.cmpi ne, %1, %c0_i32_0 : i32
    scf.if %2 {
      %cst_13 = arith.constant 0.000000e+00 : f32
      %19 = vector.broadcast %cst_13 : f32 to vector<1x128xf32>
      %c0_14 = arith.constant 0 : index
      %c0_15 = arith.constant 0 : index
      %20 = vector.load %arg4[%c0_14, %c0_15] : memref<1x128xf32, #tpu.memory_space<vmem>>, vector<1x128xf32>
      tpu.vector_store %arg4[%c0_14, %c0_15], %19 {strides = array<i32>} : memref<1x128xf32, #tpu.memory_space<vmem>>, vector<1x128xf32>,
      %cst_16 = arith.constant 0.000000e+00 : f32
      %21 = vector.broadcast %cst_16 : f32 to vector<1x128xf32>
      %c0_17 = arith.constant 0 : index
      %c0_18 = arith.constant 0 : index
      %22 = vector.load %arg5[%c0_17, %c0_18] : memref<1x128xf32, #tpu.memory_space<vmem>>, vector<1x128xf32>
      tpu.vector_store %arg5[%c0_17, %c0_18], %21 {strides = array<i32>} : memref<1x128xf32, #tpu.memory_space<vmem>>, vector<1x128xf32>,
    } else {
    }
    %c0 = arith.constant 0 : index
    %c0_1 = arith.constant 0 : index
    %3 = vector.load %arg1[%c0, %c0_1] : memref<32x128xbf16, #tpu.memory_space<vmem>>, vector<32x128xbf16>
    %4 = arith.extf %3 : vector<32x128xbf16> to vector<32x128xf32>
    %c0_2 = arith.constant 0 : index
    %c0_3 = arith.constant 0 : index
    %5 = vector.load %arg4[%c0_2, %c0_3] : memref<1x128xf32, #tpu.memory_space<vmem>>, vector<1x128xf32>
    %cst = arith.constant dense<0.000000e+00> : vector<128xf32>
    %6 = vector.multi_reduction <add>, %4, %cst [0] : vector<32x128xf32> to vector<128xf32>
    %7 = vector.shape_cast %6 : vector<128xf32> to vector<1x128xf32>
    %8 = arith.addf %5, %7 : vector<1x128xf32>
    %c0_4 = arith.constant 0 : index
    %c0_5 = arith.constant 0 : index
    %9 = vector.load %arg4[%c0_4, %c0_5] : memref<1x128xf32, #tpu.memory_space<vmem>>, vector<1x128xf32>
    tpu.vector_store %arg4[%c0_4, %c0_5], %8 {strides = array<i32>} : memref<1x128xf32, #tpu.memory_space<vmem>>, vector<1x128xf32>,
    %c0_6 = arith.constant 0 : index
    %c0_7 = arith.constant 0 : index
    %10 = vector.load %arg5[%c0_6, %c0_7] : memref<1x128xf32, #tpu.memory_space<vmem>>, vector<1x128xf32>
    %11 = arith.mulf %4, %4 : vector<32x128xf32>
    %cst_8 = arith.constant dense<0.000000e+00> : vector<128xf32>
    %12 = vector.multi_reduction <add>, %11, %cst_8 [0] : vector<32x128xf32> to vector<128xf32>
    %13 = vector.shape_cast %12 : vector<128xf32> to vector<1x128xf32>
    %14 = arith.addf %10, %13 : vector<1x128xf32>
    %c0_9 = arith.constant 0 : index
    %c0_10 = arith.constant 0 : index
    %15 = vector.load %arg5[%c0_9, %c0_10] : memref<1x128xf32, #tpu.memory_space<vmem>>, vector<1x128xf32>
    tpu.vector_store %arg5[%c0_9, %c0_10], %14 {strides = array<i32>} : memref<1x128xf32, #tpu.memory_space<vmem>>, vector<1x128xf32>,
    %c0_i32_11 = arith.constant 0 : i32
    %16 = arith.cmpi eq, %arg0, %c0_i32_11 : i32
    %17 = arith.extui %16 : i1 to i32
    %c0_i32_12 = arith.constant 0 : i32
    %18 = arith.cmpi ne, %17, %c0_i32_12 : i32
    scf.if %18 {
      %c0_13 = arith.constant 0 : index
      %c0_14 = arith.constant 0 : index
      %19 = vector.load %arg4[%c0_13, %c0_14] : memref<1x128xf32, #tpu.memory_space<vmem>>, vector<1x128xf32>
      %c0_15 = arith.constant 0 : index
      %c0_16 = arith.constant 0 : index
      %20 = vector.load %arg2[%c0_15, %c0_16] : memref<1x128xf32, #tpu.memory_space<vmem>>, vector<1x128xf32>
      tpu.vector_store %arg2[%c0_15, %c0_16], %19 {strides = array<i32>} : memref<1x128xf32, #tpu.memory_space<vmem>>, vector<1x128xf32>,
      %c0_17 = arith.constant 0 : index
      %c0_18 = arith.constant 0 : index
      %21 = vector.load %arg5[%c0_17, %c0_18] : memref<1x128xf32, #tpu.memory_space<vmem>>, vector<1x128xf32>
      %c0_19 = arith.constant 0 : index
      %c0_20 = arith.constant 0 : index
      %22 = vector.load %arg3[%c0_19, %c0_20] : memref<1x128xf32, #tpu.memory_space<vmem>>, vector<1x128xf32>
      tpu.vector_store %arg3[%c0_19, %c0_20], %21 {strides = array<i32>} : memref<1x128xf32, #tpu.memory_space<vmem>>, vector<1x128xf32>,
    } else {
    }
    return
  }
  func.func @transform_0(%arg0: i32) -> (i32, i32) {
    %c0_i32 = arith.constant 0 : i32
    %c0_i32_0 = arith.constant 0 : i32
    return %arg0, %c0_i32 : i32, i32
  }
  func.func @transform_1(%arg0: i32) -> (i32, i32) {
    %c0_i32 = arith.constant 0 : i32
    %c0_i32_0 = arith.constant 0 : i32
    %c0_i32_1 = arith.constant 0 : i32
    return %c0_i32, %c0_i32_0 : i32, i32
  }
  func.func @transform_2(%arg0: i32) -> (i32, i32) {
    %c0_i32 = arith.constant 0 : i32
    %c0_i32_0 = arith.constant 0 : i32
    %c0_i32_1 = arith.constant 0 : i32
    return %c0_i32, %c0_i32_0 : i32, i32
  }
}

module attributes {stable_mosaic.version = 11 : i64} {
  func.func @bn_act_kernel(%arg0: i32, %arg1: memref<32x128xbf16, #tpu.memory_space<vmem>>, %arg2: memref<1x128xf32, #tpu.memory_space<vmem>>, %arg3: memref<1x128xf32, #tpu.memory_space<vmem>>, %arg4: memref<32x32xbf16, #tpu.memory_space<vmem>>) attributes {dimension_semantics = [#tpu.dimension_semantics<parallel>], iteration_bounds = array<i64: 1>, scalar_prefetch = 0 : i64, scratch_operands = 0 : i64, tpu.core_type = #tpu.core_type<tc>, window_params = [{transform_indices = @transform_0, window_bounds = array<i64: 32, 128>}, {pipeline_mode = #tpu.pipeline_mode<synchronous>, transform_indices = @transform_1, window_bounds = array<i64: 1, 128>}, {pipeline_mode = #tpu.pipeline_mode<synchronous>, transform_indices = @transform_2, window_bounds = array<i64: 1, 128>}, {transform_indices = @transform_3, window_bounds = array<i64: 32, 32>}]} {
    %c0 = arith.constant 0 : index
    %c0_0 = arith.constant 0 : index
    %0 = vector.load %arg1[%c0, %c0_0] : memref<32x128xbf16, #tpu.memory_space<vmem>>, vector<32x128xbf16>
    %1 = arith.extf %0 : vector<32x128xbf16> to vector<32x128xf32>
    %c0_1 = arith.constant 0 : index
    %c0_2 = arith.constant 0 : index
    %2 = vector.load %arg2[%c0_1, %c0_2] : memref<1x128xf32, #tpu.memory_space<vmem>>, vector<1x128xf32>
    %3 = vector.broadcast %2 : vector<1x128xf32> to vector<32x128xf32>
    %4 = arith.mulf %1, %3 : vector<32x128xf32>
    %c0_3 = arith.constant 0 : index
    %c0_4 = arith.constant 0 : index
    %5 = vector.load %arg3[%c0_3, %c0_4] : memref<1x128xf32, #tpu.memory_space<vmem>>, vector<1x128xf32>
    %6 = vector.broadcast %5 : vector<1x128xf32> to vector<32x128xf32>
    %7 = arith.addf %4, %6 : vector<32x128xf32>
    %cst = arith.constant 0.000000e+00 : f32
    %8 = vector.broadcast %cst : f32 to vector<32x128xf32>
    %9 = arith.maximumf %7, %8 : vector<32x128xf32>
    %10 = vector.extract_strided_slice %9 {offsets = [0, 0], sizes = [32, 32], strides = [1, 1]} : vector<32x128xf32> to vector<32x32xf32>
    %11 = arith.truncf %10 : vector<32x32xf32> to vector<32x32xbf16>
    %c0_5 = arith.constant 0 : index
    %c0_6 = arith.constant 0 : index
    %12 = vector.load %arg4[%c0_5, %c0_6] : memref<32x32xbf16, #tpu.memory_space<vmem>>, vector<32x32xbf16>
    tpu.vector_store %arg4[%c0_5, %c0_6], %11 {strides = array<i32>} : memref<32x32xbf16, #tpu.memory_space<vmem>>, vector<32x32xbf16>,
    return
  }
  func.func @transform_0(%arg0: i32) -> (i32, i32) {
    %c0_i32 = arith.constant 0 : i32
    %c0_i32_0 = arith.constant 0 : i32
    return %arg0, %c0_i32 : i32, i32
  }
  func.func @transform_1(%arg0: i32) -> (i32, i32) {
    %c0_i32 = arith.constant 0 : i32
    %c0_i32_0 = arith.constant 0 : i32
    %c0_i32_1 = arith.constant 0 : i32
    return %c0_i32, %c0_i32_0 : i32, i32
  }
  func.func @transform_2(%arg0: i32) -> (i32, i32) {
    %c0_i32 = arith.constant 0 : i32
    %c0_i32_0 = arith.constant 0 : i32
    %c0_i32_1 = arith.constant 0 : i32
    return %c0_i32, %c0_i32_0 : i32, i32
  }
  func.func @transform_3(%arg0: i32) -> (i32, i32) {
    %c0_i32 = arith.constant 0 : i32
    %c0_i32_0 = arith.constant 0 : i32
    return %arg0, %c0_i32 : i32, i32
  }
}

module attributes {stable_mosaic.version = 11 : i64} {
  func.func @conv_matmul_kernel(%arg0: i32, %arg1: i32, %arg2: i32, %arg3: memref<32x384xbf16, #tpu.memory_space<vmem>>, %arg4: memref<384x128xbf16, #tpu.memory_space<vmem>>, %arg5: memref<1x128xf32, #tpu.memory_space<vmem>>, %arg6: memref<32x128xbf16, #tpu.memory_space<vmem>>, %arg7: memref<32x128xf32, #tpu.memory_space<vmem>>) attributes {dimension_semantics = [#tpu.dimension_semantics<parallel>, #tpu.dimension_semantics<parallel>, #tpu.dimension_semantics<arbitrary>], iteration_bounds = array<i64: 1, 1, 1>, scalar_prefetch = 0 : i64, scratch_operands = 1 : i64, tpu.core_type = #tpu.core_type<tc>, window_params = [{transform_indices = @transform_0, window_bounds = array<i64: 32, 384>}, {transform_indices = @transform_1, window_bounds = array<i64: 384, 128>}, {transform_indices = @transform_2, window_bounds = array<i64: 1, 128>}, {transform_indices = @transform_3, window_bounds = array<i64: 32, 128>}]} {
    %c0_i32 = arith.constant 0 : i32
    %0 = arith.cmpi eq, %arg2, %c0_i32 : i32
    %1 = arith.extui %0 : i1 to i32
    %c0_i32_0 = arith.constant 0 : i32
    %2 = arith.cmpi ne, %1, %c0_i32_0 : i32
    scf.if %2 {
      %cst_10 = arith.constant 0.000000e+00 : f32
      %12 = vector.broadcast %cst_10 : f32 to vector<32x128xf32>
      %c0_11 = arith.constant 0 : index
      %c0_12 = arith.constant 0 : index
      %13 = vector.load %arg7[%c0_11, %c0_12] : memref<32x128xf32, #tpu.memory_space<vmem>>, vector<32x128xf32>
      tpu.vector_store %arg7[%c0_11, %c0_12], %12 {strides = array<i32>} : memref<32x128xf32, #tpu.memory_space<vmem>>, vector<32x128xf32>,
    } else {
    }
    %c0 = arith.constant 0 : index
    %c0_1 = arith.constant 0 : index
    %3 = vector.load %arg7[%c0, %c0_1] : memref<32x128xf32, #tpu.memory_space<vmem>>, vector<32x128xf32>
    %c0_2 = arith.constant 0 : index
    %c0_3 = arith.constant 0 : index
    %4 = vector.load %arg3[%c0_2, %c0_3] : memref<32x384xbf16, #tpu.memory_space<vmem>>, vector<32x384xbf16>
    %c0_4 = arith.constant 0 : index
    %c0_5 = arith.constant 0 : index
    %5 = vector.load %arg4[%c0_4, %c0_5] : memref<384x128xbf16, #tpu.memory_space<vmem>>, vector<384x128xbf16>
    %cst = arith.constant dense<0.000000e+00> : vector<32x128xf32>
    %6 = tpu.matmul %4, %5, %cst {dimension_numbers = #tpu.dot_dimension_numbers<[1], [0], [0], [1], [0, 0, 1, 1], [], []>} : vector<32x384xbf16>, vector<384x128xbf16>, vector<32x128xf32> -> vector<32x128xf32>
    %7 = arith.addf %3, %6 : vector<32x128xf32>
    %c0_6 = arith.constant 0 : index
    %c0_7 = arith.constant 0 : index
    %8 = vector.load %arg7[%c0_6, %c0_7] : memref<32x128xf32, #tpu.memory_space<vmem>>, vector<32x128xf32>
    tpu.vector_store %arg7[%c0_6, %c0_7], %7 {strides = array<i32>} : memref<32x128xf32, #tpu.memory_space<vmem>>, vector<32x128xf32>,
    %c0_i32_8 = arith.constant 0 : i32
    %9 = arith.cmpi eq, %arg2, %c0_i32_8 : i32
    %10 = arith.extui %9 : i1 to i32
    %c0_i32_9 = arith.constant 0 : i32
    %11 = arith.cmpi ne, %10, %c0_i32_9 : i32
    scf.if %11 {
      %c0_10 = arith.constant 0 : index
      %c0_11 = arith.constant 0 : index
      %12 = vector.load %arg7[%c0_10, %c0_11] : memref<32x128xf32, #tpu.memory_space<vmem>>, vector<32x128xf32>
      %c0_12 = arith.constant 0 : index
      %c0_13 = arith.constant 0 : index
      %13 = vector.load %arg5[%c0_12, %c0_13] : memref<1x128xf32, #tpu.memory_space<vmem>>, vector<1x128xf32>
      %14 = vector.broadcast %13 : vector<1x128xf32> to vector<32x128xf32>
      %15 = arith.addf %12, %14 : vector<32x128xf32>
      %16 = arith.truncf %15 : vector<32x128xf32> to vector<32x128xbf16>
      %c0_14 = arith.constant 0 : index
      %c0_15 = arith.constant 0 : index
      %17 = vector.load %arg6[%c0_14, %c0_15] : memref<32x128xbf16, #tpu.memory_space<vmem>>, vector<32x128xbf16>
      tpu.vector_store %arg6[%c0_14, %c0_15], %16 {strides = array<i32>} : memref<32x128xbf16, #tpu.memory_space<vmem>>, vector<32x128xbf16>,
    } else {
    }
    return
  }
  func.func @transform_0(%arg0: i32, %arg1: i32, %arg2: i32) -> (i32, i32) {
    %c0_i32 = arith.constant 0 : i32
    return %arg0, %arg2 : i32, i32
  }
  func.func @transform_1(%arg0: i32, %arg1: i32, %arg2: i32) -> (i32, i32) {
    %c0_i32 = arith.constant 0 : i32
    return %arg2, %arg1 : i32, i32
  }
  func.func @transform_2(%arg0: i32, %arg1: i32, %arg2: i32) -> (i32, i32) {
    %c0_i32 = arith.constant 0 : i32
    %c0_i32_0 = arith.constant 0 : i32
    return %c0_i32, %arg1 : i32, i32
  }
  func.func @transform_3(%arg0: i32, %arg1: i32, %arg2: i32) -> (i32, i32) {
    %c0_i32 = arith.constant 0 : i32
    return %arg0, %arg1 : i32, i32
  }
}

module attributes {stable_mosaic.version = 11 : i64} {
  func.func @bn_act_kernel(%arg0: i32, %arg1: memref<32x128xbf16, #tpu.memory_space<vmem>>, %arg2: memref<1x128xf32, #tpu.memory_space<vmem>>, %arg3: memref<1x128xf32, #tpu.memory_space<vmem>>, %arg4: memref<32x32xbf16, #tpu.memory_space<vmem>>, %arg5: memref<32x32xbf16, #tpu.memory_space<vmem>>) attributes {dimension_semantics = [#tpu.dimension_semantics<parallel>], iteration_bounds = array<i64: 1>, scalar_prefetch = 0 : i64, scratch_operands = 0 : i64, tpu.core_type = #tpu.core_type<tc>, window_params = [{transform_indices = @transform_0, window_bounds = array<i64: 32, 128>}, {pipeline_mode = #tpu.pipeline_mode<synchronous>, transform_indices = @transform_1, window_bounds = array<i64: 1, 128>}, {pipeline_mode = #tpu.pipeline_mode<synchronous>, transform_indices = @transform_2, window_bounds = array<i64: 1, 128>}, {transform_indices = @transform_3, window_bounds = array<i64: 32, 32>}, {transform_indices = @transform_4, window_bounds = array<i64: 32, 32>}]} {
    %c0 = arith.constant 0 : index
    %c0_0 = arith.constant 0 : index
    %0 = vector.load %arg1[%c0, %c0_0] : memref<32x128xbf16, #tpu.memory_space<vmem>>, vector<32x128xbf16>
    %1 = arith.extf %0 : vector<32x128xbf16> to vector<32x128xf32>
    %c0_1 = arith.constant 0 : index
    %c0_2 = arith.constant 0 : index
    %2 = vector.load %arg2[%c0_1, %c0_2] : memref<1x128xf32, #tpu.memory_space<vmem>>, vector<1x128xf32>
    %3 = vector.broadcast %2 : vector<1x128xf32> to vector<32x128xf32>
    %4 = arith.mulf %1, %3 : vector<32x128xf32>
    %c0_3 = arith.constant 0 : index
    %c0_4 = arith.constant 0 : index
    %5 = vector.load %arg3[%c0_3, %c0_4] : memref<1x128xf32, #tpu.memory_space<vmem>>, vector<1x128xf32>
    %6 = vector.broadcast %5 : vector<1x128xf32> to vector<32x128xf32>
    %7 = arith.addf %4, %6 : vector<32x128xf32>
    %8 = vector.extract_strided_slice %7 {offsets = [0, 0], sizes = [32, 32], strides = [1, 1]} : vector<32x128xf32> to vector<32x32xf32>
    %c0_5 = arith.constant 0 : index
    %c0_6 = arith.constant 0 : index
    %9 = vector.load %arg4[%c0_5, %c0_6] : memref<32x32xbf16, #tpu.memory_space<vmem>>, vector<32x32xbf16>
    %10 = arith.extf %9 : vector<32x32xbf16> to vector<32x32xf32>
    %11 = arith.addf %8, %10 : vector<32x32xf32>
    %12 = arith.truncf %11 : vector<32x32xf32> to vector<32x32xbf16>
    %c0_7 = arith.constant 0 : index
    %c0_8 = arith.constant 0 : index
    %13 = vector.load %arg5[%c0_7, %c0_8] : memref<32x32xbf16, #tpu.memory_space<vmem>>, vector<32x32xbf16>
    tpu.vector_store %arg5[%c0_7, %c0_8], %12 {strides = array<i32>} : memref<32x32xbf16, #tpu.memory_space<vmem>>, vector<32x32xbf16>,
    return
  }
  func.func @transform_0(%arg0: i32) -> (i32, i32) {
    %c0_i32 = arith.constant 0 : i32
    %c0_i32_0 = arith.constant 0 : i32
    return %arg0, %c0_i32 : i32, i32
  }
  func.func @transform_1(%arg0: i32) -> (i32, i32) {
    %c0_i32 = arith.constant 0 : i32
    %c0_i32_0 = arith.constant 0 : i32
    %c0_i32_1 = arith.constant 0 : i32
    return %c0_i32, %c0_i32_0 : i32, i32
  }
  func.func @transform_2(%arg0: i32) -> (i32, i32) {
    %c0_i32 = arith.constant 0 : i32
    %c0_i32_0 = arith.constant 0 : i32
    %c0_i32_1 = arith.constant 0 : i32
    return %c0_i32, %c0_i32_0 : i32, i32
  }
  func.func @transform_3(%arg0: i32) -> (i32, i32) {
    %c0_i32 = arith.constant 0 : i32
    %c0_i32_0 = arith.constant 0 : i32
    return %arg0, %c0_i32 : i32, i32
  }
  func.func @transform_4(%arg0: i32) -> (i32, i32) {
    %c0_i32 = arith.constant 0 : i32
    %c0_i32_0 = arith.constant 0 : i32
    return %arg0, %c0_i32 : i32, i32
  }
}

module attributes {stable_mosaic.version = 11 : i64} {
  func.func @conv_matmul_kernel(%arg0: i32, %arg1: i32, %arg2: i32, %arg3: memref<32x128xbf16, #tpu.memory_space<vmem>>, %arg4: memref<128x128xbf16, #tpu.memory_space<vmem>>, %arg5: memref<1x128xf32, #tpu.memory_space<vmem>>, %arg6: memref<32x128xbf16, #tpu.memory_space<vmem>>, %arg7: memref<32x128xf32, #tpu.memory_space<vmem>>) attributes {dimension_semantics = [#tpu.dimension_semantics<parallel>, #tpu.dimension_semantics<parallel>, #tpu.dimension_semantics<arbitrary>], iteration_bounds = array<i64: 1, 1, 1>, scalar_prefetch = 0 : i64, scratch_operands = 1 : i64, tpu.core_type = #tpu.core_type<tc>, window_params = [{transform_indices = @transform_0, window_bounds = array<i64: 32, 128>}, {transform_indices = @transform_1, window_bounds = array<i64: 128, 128>}, {transform_indices = @transform_2, window_bounds = array<i64: 1, 128>}, {transform_indices = @transform_3, window_bounds = array<i64: 32, 128>}]} {
    %c0_i32 = arith.constant 0 : i32
    %0 = arith.cmpi eq, %arg2, %c0_i32 : i32
    %1 = arith.extui %0 : i1 to i32
    %c0_i32_0 = arith.constant 0 : i32
    %2 = arith.cmpi ne, %1, %c0_i32_0 : i32
    scf.if %2 {
      %cst_10 = arith.constant 0.000000e+00 : f32
      %12 = vector.broadcast %cst_10 : f32 to vector<32x128xf32>
      %c0_11 = arith.constant 0 : index
      %c0_12 = arith.constant 0 : index
      %13 = vector.load %arg7[%c0_11, %c0_12] : memref<32x128xf32, #tpu.memory_space<vmem>>, vector<32x128xf32>
      tpu.vector_store %arg7[%c0_11, %c0_12], %12 {strides = array<i32>} : memref<32x128xf32, #tpu.memory_space<vmem>>, vector<32x128xf32>,
    } else {
    }
    %c0 = arith.constant 0 : index
    %c0_1 = arith.constant 0 : index
    %3 = vector.load %arg7[%c0, %c0_1] : memref<32x128xf32, #tpu.memory_space<vmem>>, vector<32x128xf32>
    %c0_2 = arith.constant 0 : index
    %c0_3 = arith.constant 0 : index
    %4 = vector.load %arg3[%c0_2, %c0_3] : memref<32x128xbf16, #tpu.memory_space<vmem>>, vector<32x128xbf16>
    %c0_4 = arith.constant 0 : index
    %c0_5 = arith.constant 0 : index
    %5 = vector.load %arg4[%c0_4, %c0_5] : memref<128x128xbf16, #tpu.memory_space<vmem>>, vector<128x128xbf16>
    %cst = arith.constant dense<0.000000e+00> : vector<32x128xf32>
    %6 = tpu.matmul %4, %5, %cst {dimension_numbers = #tpu.dot_dimension_numbers<[1], [0], [0], [1], [0, 0, 1, 1], [], []>} : vector<32x128xbf16>, vector<128x128xbf16>, vector<32x128xf32> -> vector<32x128xf32>
    %7 = arith.addf %3, %6 : vector<32x128xf32>
    %c0_6 = arith.constant 0 : index
    %c0_7 = arith.constant 0 : index
    %8 = vector.load %arg7[%c0_6, %c0_7] : memref<32x128xf32, #tpu.memory_space<vmem>>, vector<32x128xf32>
    tpu.vector_store %arg7[%c0_6, %c0_7], %7 {strides = array<i32>} : memref<32x128xf32, #tpu.memory_space<vmem>>, vector<32x128xf32>,
    %c0_i32_8 = arith.constant 0 : i32
    %9 = arith.cmpi eq, %arg2, %c0_i32_8 : i32
    %10 = arith.extui %9 : i1 to i32
    %c0_i32_9 = arith.constant 0 : i32
    %11 = arith.cmpi ne, %10, %c0_i32_9 : i32
    scf.if %11 {
      %c0_10 = arith.constant 0 : index
      %c0_11 = arith.constant 0 : index
      %12 = vector.load %arg7[%c0_10, %c0_11] : memref<32x128xf32, #tpu.memory_space<vmem>>, vector<32x128xf32>
      %c0_12 = arith.constant 0 : index
      %c0_13 = arith.constant 0 : index
      %13 = vector.load %arg5[%c0_12, %c0_13] : memref<1x128xf32, #tpu.memory_space<vmem>>, vector<1x128xf32>
      %14 = vector.broadcast %13 : vector<1x128xf32> to vector<32x128xf32>
      %15 = arith.addf %12, %14 : vector<32x128xf32>
      %16 = arith.truncf %15 : vector<32x128xf32> to vector<32x128xbf16>
      %c0_14 = arith.constant 0 : index
      %c0_15 = arith.constant 0 : index
      %17 = vector.load %arg6[%c0_14, %c0_15] : memref<32x128xbf16, #tpu.memory_space<vmem>>, vector<32x128xbf16>
      tpu.vector_store %arg6[%c0_14, %c0_15], %16 {strides = array<i32>} : memref<32x128xbf16, #tpu.memory_space<vmem>>, vector<32x128xbf16>,
    } else {
    }
    return
  }
  func.func @transform_0(%arg0: i32, %arg1: i32, %arg2: i32) -> (i32, i32) {
    %c0_i32 = arith.constant 0 : i32
    return %arg0, %arg2 : i32, i32
  }
  func.func @transform_1(%arg0: i32, %arg1: i32, %arg2: i32) -> (i32, i32) {
    %c0_i32 = arith.constant 0 : i32
    return %arg2, %arg1 : i32, i32
  }
  func.func @transform_2(%arg0: i32, %arg1: i32, %arg2: i32) -> (i32, i32) {
    %c0_i32 = arith.constant 0 : i32
    %c0_i32_0 = arith.constant 0 : i32
    return %c0_i32, %arg1 : i32, i32
  }
  func.func @transform_3(%arg0: i32, %arg1: i32, %arg2: i32) -> (i32, i32) {
    %c0_i32 = arith.constant 0 : i32
    return %arg0, %arg1 : i32, i32
  }
}

module attributes {stable_mosaic.version = 11 : i64} {
  func.func @conv_matmul_kernel(%arg0: i32, %arg1: i32, %arg2: i32, %arg3: memref<256x512xbf16, #tpu.memory_space<vmem>>, %arg4: memref<512x128xbf16, #tpu.memory_space<vmem>>, %arg5: memref<1x128xf32, #tpu.memory_space<vmem>>, %arg6: memref<256x128xbf16, #tpu.memory_space<vmem>>, %arg7: memref<256x128xf32, #tpu.memory_space<vmem>>) attributes {dimension_semantics = [#tpu.dimension_semantics<parallel>, #tpu.dimension_semantics<parallel>, #tpu.dimension_semantics<arbitrary>], iteration_bounds = array<i64: 2, 1, 1>, scalar_prefetch = 0 : i64, scratch_operands = 1 : i64, tpu.core_type = #tpu.core_type<tc>, window_params = [{transform_indices = @transform_0, window_bounds = array<i64: 256, 512>}, {transform_indices = @transform_1, window_bounds = array<i64: 512, 128>}, {transform_indices = @transform_2, window_bounds = array<i64: 1, 128>}, {transform_indices = @transform_3, window_bounds = array<i64: 256, 128>}]} {
    %c0_i32 = arith.constant 0 : i32
    %0 = arith.cmpi eq, %arg2, %c0_i32 : i32
    %1 = arith.extui %0 : i1 to i32
    %c0_i32_0 = arith.constant 0 : i32
    %2 = arith.cmpi ne, %1, %c0_i32_0 : i32
    scf.if %2 {
      %cst_10 = arith.constant 0.000000e+00 : f32
      %12 = vector.broadcast %cst_10 : f32 to vector<256x128xf32>
      %c0_11 = arith.constant 0 : index
      %c0_12 = arith.constant 0 : index
      %13 = vector.load %arg7[%c0_11, %c0_12] : memref<256x128xf32, #tpu.memory_space<vmem>>, vector<256x128xf32>
      tpu.vector_store %arg7[%c0_11, %c0_12], %12 {strides = array<i32>} : memref<256x128xf32, #tpu.memory_space<vmem>>, vector<256x128xf32>,
    } else {
    }
    %c0 = arith.constant 0 : index
    %c0_1 = arith.constant 0 : index
    %3 = vector.load %arg7[%c0, %c0_1] : memref<256x128xf32, #tpu.memory_space<vmem>>, vector<256x128xf32>
    %c0_2 = arith.constant 0 : index
    %c0_3 = arith.constant 0 : index
    %4 = vector.load %arg3[%c0_2, %c0_3] : memref<256x512xbf16, #tpu.memory_space<vmem>>, vector<256x512xbf16>
    %c0_4 = arith.constant 0 : index
    %c0_5 = arith.constant 0 : index
    %5 = vector.load %arg4[%c0_4, %c0_5] : memref<512x128xbf16, #tpu.memory_space<vmem>>, vector<512x128xbf16>
    %cst = arith.constant dense<0.000000e+00> : vector<256x128xf32>
    %6 = tpu.matmul %4, %5, %cst {dimension_numbers = #tpu.dot_dimension_numbers<[1], [0], [0], [1], [0, 0, 1, 1], [], []>} : vector<256x512xbf16>, vector<512x128xbf16>, vector<256x128xf32> -> vector<256x128xf32>
    %7 = arith.addf %3, %6 : vector<256x128xf32>
    %c0_6 = arith.constant 0 : index
    %c0_7 = arith.constant 0 : index
    %8 = vector.load %arg7[%c0_6, %c0_7] : memref<256x128xf32, #tpu.memory_space<vmem>>, vector<256x128xf32>
    tpu.vector_store %arg7[%c0_6, %c0_7], %7 {strides = array<i32>} : memref<256x128xf32, #tpu.memory_space<vmem>>, vector<256x128xf32>,
    %c0_i32_8 = arith.constant 0 : i32
    %9 = arith.cmpi eq, %arg2, %c0_i32_8 : i32
    %10 = arith.extui %9 : i1 to i32
    %c0_i32_9 = arith.constant 0 : i32
    %11 = arith.cmpi ne, %10, %c0_i32_9 : i32
    scf.if %11 {
      %c0_10 = arith.constant 0 : index
      %c0_11 = arith.constant 0 : index
      %12 = vector.load %arg7[%c0_10, %c0_11] : memref<256x128xf32, #tpu.memory_space<vmem>>, vector<256x128xf32>
      %c0_12 = arith.constant 0 : index
      %c0_13 = arith.constant 0 : index
      %13 = vector.load %arg5[%c0_12, %c0_13] : memref<1x128xf32, #tpu.memory_space<vmem>>, vector<1x128xf32>
      %14 = vector.broadcast %13 : vector<1x128xf32> to vector<256x128xf32>
      %15 = arith.addf %12, %14 : vector<256x128xf32>
      %16 = math.tanh %15 : vector<256x128xf32>
      %17 = arith.truncf %16 : vector<256x128xf32> to vector<256x128xbf16>
      %c0_14 = arith.constant 0 : index
      %c0_15 = arith.constant 0 : index
      %18 = vector.load %arg6[%c0_14, %c0_15] : memref<256x128xbf16, #tpu.memory_space<vmem>>, vector<256x128xbf16>
      tpu.vector_store %arg6[%c0_14, %c0_15], %17 {strides = array<i32>} : memref<256x128xbf16, #tpu.memory_space<vmem>>, vector<256x128xbf16>,
    } else {
    }
    return
  }
  func.func @transform_0(%arg0: i32, %arg1: i32, %arg2: i32) -> (i32, i32) {
    %c0_i32 = arith.constant 0 : i32
    return %arg0, %arg2 : i32, i32
  }
  func.func @transform_1(%arg0: i32, %arg1: i32, %arg2: i32) -> (i32, i32) {
    %c0_i32 = arith.constant 0 : i32
    return %arg2, %arg1 : i32, i32
  }
  func.func @transform_2(%arg0: i32, %arg1: i32, %arg2: i32) -> (i32, i32) {
    %c0_i32 = arith.constant 0 : i32
    %c0_i32_0 = arith.constant 0 : i32
    return %c0_i32, %arg1 : i32, i32
  }
  func.func @transform_3(%arg0: i32, %arg1: i32, %arg2: i32) -> (i32, i32) {
    %c0_i32 = arith.constant 0 : i32
    return %arg0, %arg1 : i32, i32
  }
}

</mosaic_0001>

<bundles_post_ra>
// kernel: resnet_generator_forward.35
= control target key start
LH: loop header
LB: loop body
LE: loop exit
PB: predicated region body
PF: predicated region fallthrough
CT: control target
= control target key end

     0   :  { %v527_v0 = vmov 0.0   ;;  %s645_s0 = inlined_call_operand.vmem [shape: bf16[512,128], index: 0, kind: input, shape index: {}]   ;;  %s646_s1 = inlined_call_operand.vmem [shape: f32[1,128], index: 1, kind: output, shape index: {0}]   ;;  %s647_s2 = inlined_call_operand.vmem [shape: f32[1,128], index: 2, kind: output, shape index: {1}]  }
   0x1   :  { %14 = vst [vmem:[#allocation2] sm:$0x1] %v527_v0  ;;  %15 = vst [vmem:[#allocation3] sm:$0x1] %v527_v0  ;;  %v368_v1 = vld [vmem:[%s645_s0] sm:$0xff]   ;;  %v495_v2 = vld [vmem:[%s645_s0 + $0x8] sm:$0xff]  }
   0x2   :  { %v369_v3 = vunpack.c.l.bf16 %v368_v1  ;;  %v370_v4 = vunpack.c.h.bf16 %v368_v1  ;;  %v373_v5 = vunpack.c.l.bf16 %v495_v2  ;;  %v496_v7 = vld [vmem:[%s645_s0 + $0x10] sm:$0xff]   ;;  %v374_v8 = vunpack.c.h.bf16 %v495_v2  ;;  %v497_v12 = vld [vmem:[%s645_s0 + $0x18] sm:$0xff]   ;;  %v498_v17 = vld [vmem:[%s645_s0 + $0x20] sm:$0xff]  }
   0x3   :  { %v377_v10 = vunpack.c.l.bf16 %v496_v7  ;;  %v378_v13 = vunpack.c.h.bf16 %v496_v7  ;;  %v381_v15 = vunpack.c.l.bf16 %v497_v12  ;;  %v382_v18 = vunpack.c.h.bf16 %v497_v12  ;;  %v499_v22 = vld [vmem:[%s645_s0 + $0x28] sm:$0xff]   ;;  %v500_v30 = vld [vmem:[%s645_s0 + $0x30] sm:$0xff]   ;;  %v501_v39 = vld [vmem:[%s645_s0 + $0x38] sm:$0xff]  }
   0x4   :  { %v145_v6 = vadd.f32 %v370_v4, %v369_v3  ;;  %v385_v20 = vunpack.c.l.bf16 %v498_v17  ;;  %v386_v23 = vunpack.c.h.bf16 %v498_v17  ;;  %v217_v25 = vmul.f32 %v369_v3, %v369_v3  ;;  %v502_v48 = vld [vmem:[%s645_s0 + $0x40] sm:$0xff]   ;;  %v503_v57 = vld [vmem:[%s645_s0 + $0x48] sm:$0xff]   ;;  %v504_v2 = vld [vmem:[%s645_s0 + $0x50] sm:$0xff]  }
   0x5   :  { %v218_v26 = vmul.f32 %v370_v4, %v370_v4  ;;  %v389_v27 = vunpack.c.l.bf16 %v499_v22  ;;  %v219_v29 = vmul.f32 %v373_v5, %v373_v5  ;;  %v390_v31 = vunpack.c.h.bf16 %v499_v22 }
   0x6   :  { %v146_v9 = vadd.f32 %v373_v5, %v145_v6  ;;  %v220_v33 = vmul.f32 %v374_v8, %v374_v8  ;;  %v393_v35 = vunpack.c.l.bf16 %v500_v30  ;;  %v221_v37 = vmul.f32 %v377_v10, %v377_v10 }
   0x7   :  { %v281_v34 = vadd.f32 %v218_v26, %v217_v25  ;;  %v394_v40 = vunpack.c.h.bf16 %v500_v30  ;;  %v222_v42 = vmul.f32 %v378_v13, %v378_v13  ;;  %v397_v44 = vunpack.c.l.bf16 %v501_v39 }
   0x8   :  { %v147_v11 = vadd.f32 %v374_v8, %v146_v9  ;;  %v223_v46 = vmul.f32 %v381_v15, %v381_v15  ;;  %v398_v49 = vunpack.c.h.bf16 %v501_v39  ;;  %v224_v51 = vmul.f32 %v382_v18, %v382_v18 }
   0x9   :  { %v282_v38 = vadd.f32 %v281_v34, %v219_v29  ;;  %v401_v53 = vunpack.c.l.bf16 %v502_v48  ;;  %v225_v55 = vmul.f32 %v385_v20, %v385_v20  ;;  %v402_v58 = vunpack.c.h.bf16 %v502_v48  ;;  %v507_v29 = vld [vmem:[%s645_s0 + $0x68] sm:$0xff]  }
   0xa   :  { %v148_v14 = vadd.f32 %v377_v10, %v147_v11  ;;  %v226_v60 = vmul.f32 %v386_v23, %v386_v23  ;;  %v405_v62 = vunpack.c.l.bf16 %v503_v57  ;;  %v227_v0 = vmul.f32 %v389_v27, %v389_v27  ;;  %v505_v11 = vld [vmem:[%s645_s0 + $0x58] sm:$0xff]  }
   0xb   :  { %v283_v43 = vadd.f32 %v282_v38, %v220_v33  ;;  %v406_v3 = vunpack.c.h.bf16 %v503_v57  ;;  %v228_v5 = vmul.f32 %v390_v31, %v390_v31  ;;  %v409_v7 = vunpack.c.l.bf16 %v504_v2  ;;  %v508_v38 = vld [vmem:[%s645_s0 + $0x70] sm:$0xff]  }
   0xc   :  { %v149_v16 = vadd.f32 %v378_v13, %v148_v14  ;;  %v229_v9 = vmul.f32 %v393_v35, %v393_v35  ;;  %v410_v12 = vunpack.c.h.bf16 %v504_v2  ;;  %v230_v14 = vmul.f32 %v394_v40, %v394_v40 }
   0xd   :  { %v284_v47 = vadd.f32 %v283_v43, %v221_v37  ;;  %v421_v34 = vunpack.c.l.bf16 %v507_v29  ;;  %v422_v39 = vunpack.c.h.bf16 %v507_v29  ;;  %v425_v43 = vunpack.c.l.bf16 %v508_v38 }
   0xe   :  { %v150_v19 = vadd.f32 %v381_v15, %v149_v16  ;;  %v413_v16 = vunpack.c.l.bf16 %v505_v11  ;;  %v426_v48 = vunpack.c.h.bf16 %v508_v38 }
   0xf   :  { %v285_v52 = vadd.f32 %v284_v47, %v222_v42  ;;  %v509_v47 = vld [vmem:[%s645_s0 + $0x78] sm:$0xff]  }
  0x10   :  { %v151_v21 = vadd.f32 %v382_v18, %v150_v19  ;;  %v231_v18 = vmul.f32 %v397_v44, %v397_v44  ;;  %v430_v57 = vunpack.c.h.bf16 %v509_v47 }
  0x11   :  { %v286_v56 = vadd.f32 %v285_v52, %v223_v46  ;;  %v429_v52 = vunpack.c.l.bf16 %v509_v47 }
  0x12   :  { %v152_v24 = vadd.f32 %v385_v20, %v151_v21  ;;  %v506_v20 = vld [vmem:[%s645_s0 + $0x60] sm:$0xff]   ;;  %v414_v21 = vunpack.c.h.bf16 %v505_v11 }
  0x13   :  { %v287_v61 = vadd.f32 %v286_v56, %v224_v51  ;;  %v417_v25 = vunpack.c.l.bf16 %v506_v20  ;;  %v418_v30 = vunpack.c.h.bf16 %v506_v20  ;;  %v510_v56 = vld [vmem:[%s645_s0 + $0x80] sm:$0xff]  }
  0x14   :  { %v153_v28 = vadd.f32 %v386_v23, %v152_v24  ;;  %v232_v23 = vmul.f32 %v398_v49, %v398_v49  ;;  %v434_v2 = vunpack.c.h.bf16 %v510_v56 }
  0x15   :  { %v288_v1 = vadd.f32 %v287_v61, %v225_v55  ;;  %v433_v61 = vunpack.c.l.bf16 %v510_v56 }
  0x16   :  { %v154_v32 = vadd.f32 %v389_v27, %v153_v28  ;;  %v233_v27 = vmul.f32 %v401_v53, %v401_v53 }
  0x17   :  { %v289_v6 = vadd.f32 %v288_v1, %v226_v60  ;;  %v511_v1 = vld [vmem:[%s645_s0 + $0x88] sm:$0xff]  }
  0x18   :  { %v155_v36 = vadd.f32 %v390_v31, %v154_v32  ;;  %v234_v32 = vmul.f32 %v402_v58, %v402_v58  ;;  %v438_v11 = vunpack.c.h.bf16 %v511_v1 }
  0x19   :  { %v290_v10 = vadd.f32 %v289_v6, %v227_v0  ;;  %v437_v6 = vunpack.c.l.bf16 %v511_v1 }
  0x1a   :  { %v156_v41 = vadd.f32 %v393_v35, %v155_v36  ;;  %v235_v36 = vmul.f32 %v405_v62, %v405_v62 }
  0x1b   :  { %v291_v15 = vadd.f32 %v290_v10, %v228_v5  ;;  %v512_v10 = vld [vmem:[%s645_s0 + $0x90] sm:$0xff]  }
  0x1c   :  { %v157_v45 = vadd.f32 %v394_v40, %v156_v41  ;;  %v236_v41 = vmul.f32 %v406_v3, %v406_v3  ;;  %v442_v20 = vunpack.c.h.bf16 %v512_v10 }
  0x1d   :  { %v292_v19 = vadd.f32 %v291_v15, %v229_v9  ;;  %v441_v15 = vunpack.c.l.bf16 %v512_v10 }
  0x1e   :  { %v158_v50 = vadd.f32 %v397_v44, %v157_v45  ;;  %v237_v45 = vmul.f32 %v409_v7, %v409_v7 }
  0x1f   :  { %v293_v24 = vadd.f32 %v292_v19, %v230_v14  ;;  %v513_v19 = vld [vmem:[%s645_s0 + $0x98] sm:$0xff]  }
  0x20   :  { %v159_v54 = vadd.f32 %v398_v49, %v158_v50  ;;  %v238_v50 = vmul.f32 %v410_v12, %v410_v12  ;;  %v446_v29 = vunpack.c.h.bf16 %v513_v19 }
  0x21   :  { %v294_v28 = vadd.f32 %v293_v24, %v231_v18  ;;  %v445_v24 = vunpack.c.l.bf16 %v513_v19 }
  0x22   :  { %v160_v59 = vadd.f32 %v401_v53, %v159_v54  ;;  %v239_v54 = vmul.f32 %v413_v16, %v413_v16 }
  0x23   :  { %v295_v33 = vadd.f32 %v294_v28, %v232_v23  ;;  %v514_v28 = vld [vmem:[%s645_s0 + $0xa0] sm:$0xff]  }
  0x24   :  { %v161_v63 = vadd.f32 %v402_v58, %v160_v59  ;;  %v240_v59 = vmul.f32 %v414_v21, %v414_v21  ;;  %v450_v38 = vunpack.c.h.bf16 %v514_v28 }
  0x25   :  { %v296_v37 = vadd.f32 %v295_v33, %v233_v27  ;;  %v449_v33 = vunpack.c.l.bf16 %v514_v28 }
  0x26   :  { %v162_v4 = vadd.f32 %v405_v62, %v161_v63  ;;  %v241_v63 = vmul.f32 %v417_v25, %v417_v25 }
  0x27   :  { %v297_v42 = vadd.f32 %v296_v37, %v234_v32  ;;  %v515_v37 = vld [vmem:[%s645_s0 + $0xa8] sm:$0xff]  }
  0x28   :  { %v163_v8 = vadd.f32 %v406_v3, %v162_v4  ;;  %v242_v4 = vmul.f32 %v418_v30, %v418_v30  ;;  %v454_v47 = vunpack.c.h.bf16 %v515_v37 }
  0x29   :  { %v298_v46 = vadd.f32 %v297_v42, %v235_v36  ;;  %v453_v42 = vunpack.c.l.bf16 %v515_v37 }
  0x2a   :  { %v164_v13 = vadd.f32 %v409_v7, %v163_v8  ;;  %v243_v8 = vmul.f32 %v421_v34, %v421_v34 }
  0x2b   :  { %v299_v51 = vadd.f32 %v298_v46, %v236_v41  ;;  %v516_v46 = vld [vmem:[%s645_s0 + $0xb0] sm:$0xff]  }
  0x2c   :  { %v165_v17 = vadd.f32 %v410_v12, %v164_v13  ;;  %v244_v13 = vmul.f32 %v422_v39, %v422_v39  ;;  %v458_v56 = vunpack.c.h.bf16 %v516_v46 }
  0x2d   :  { %v300_v55 = vadd.f32 %v299_v51, %v237_v45  ;;  %v457_v51 = vunpack.c.l.bf16 %v516_v46 }
  0x2e   :  { %v166_v22 = vadd.f32 %v413_v16, %v165_v17  ;;  %v245_v17 = vmul.f32 %v425_v43, %v425_v43 }
  0x2f   :  { %v301_v60 = vadd.f32 %v300_v55, %v238_v50  ;;  %v517_v55 = vld [vmem:[%s645_s0 + $0xb8] sm:$0xff]  }
  0x30   :  { %v167_v26 = vadd.f32 %v414_v21, %v166_v22  ;;  %v246_v22 = vmul.f32 %v426_v48, %v426_v48  ;;  %v462_v1 = vunpack.c.h.bf16 %v517_v55 }
  0x31   :  { %v302_v0 = vadd.f32 %v301_v60, %v239_v54  ;;  %v461_v60 = vunpack.c.l.bf16 %v517_v55 }
  0x32   :  { %v168_v31 = vadd.f32 %v417_v25, %v167_v26  ;;  %v247_v26 = vmul.f32 %v429_v52, %v429_v52 }
  0x33   :  { %v303_v5 = vadd.f32 %v302_v0, %v240_v59  ;;  %v518_v0 = vld [vmem:[%s645_s0 + $0xc0] sm:$0xff]  }
  0x34   :  { %v169_v35 = vadd.f32 %v418_v30, %v168_v31  ;;  %v248_v31 = vmul.f32 %v430_v57, %v430_v57  ;;  %v466_v10 = vunpack.c.h.bf16 %v518_v0 }
  0x35   :  { %v304_v9 = vadd.f32 %v303_v5, %v241_v63  ;;  %v465_v5 = vunpack.c.l.bf16 %v518_v0 }
  0x36   :  { %v170_v40 = vadd.f32 %v421_v34, %v169_v35  ;;  %v249_v35 = vmul.f32 %v433_v61, %v433_v61 }
  0x37   :  { %v305_v14 = vadd.f32 %v304_v9, %v242_v4  ;;  %v519_v9 = vld [vmem:[%s645_s0 + $0xc8] sm:$0xff]  }
  0x38   :  { %v171_v44 = vadd.f32 %v422_v39, %v170_v40  ;;  %v250_v40 = vmul.f32 %v434_v2, %v434_v2  ;;  %v470_v19 = vunpack.c.h.bf16 %v519_v9 }
  0x39   :  { %v306_v18 = vadd.f32 %v305_v14, %v243_v8  ;;  %v469_v14 = vunpack.c.l.bf16 %v519_v9 }
  0x3a   :  { %v172_v49 = vadd.f32 %v425_v43, %v171_v44  ;;  %v251_v44 = vmul.f32 %v437_v6, %v437_v6 }
  0x3b   :  { %v307_v23 = vadd.f32 %v306_v18, %v244_v13  ;;  %v520_v18 = vld [vmem:[%s645_s0 + $0xd0] sm:$0xff]  }
  0x3c   :  { %v173_v53 = vadd.f32 %v426_v48, %v172_v49  ;;  %v252_v49 = vmul.f32 %v438_v11, %v438_v11  ;;  %v474_v28 = vunpack.c.h.bf16 %v520_v18 }
  0x3d   :  { %v308_v27 = vadd.f32 %v307_v23, %v245_v17  ;;  %v473_v23 = vunpack.c.l.bf16 %v520_v18 }
  0x3e   :  { %v174_v58 = vadd.f32 %v429_v52, %v173_v53  ;;  %v253_v53 = vmul.f32 %v441_v15, %v441_v15 }
  0x3f   :  { %v309_v32 = vadd.f32 %v308_v27, %v246_v22  ;;  %v521_v27 = vld [vmem:[%s645_s0 + $0xd8] sm:$0xff]  }
  0x40   :  { %v175_v62 = vadd.f32 %v430_v57, %v174_v58  ;;  %v254_v58 = vmul.f32 %v442_v20, %v442_v20  ;;  %v478_v37 = vunpack.c.h.bf16 %v521_v27 }
  0x41   :  { %v310_v36 = vadd.f32 %v309_v32, %v247_v26  ;;  %v477_v32 = vunpack.c.l.bf16 %v521_v27 }
  0x42   :  { %v176_v3 = vadd.f32 %v433_v61, %v175_v62  ;;  %v255_v62 = vmul.f32 %v445_v24, %v445_v24 }
  0x43   :  { %v311_v41 = vadd.f32 %v310_v36, %v248_v31  ;;  %v522_v36 = vld [vmem:[%s645_s0 + $0xe0] sm:$0xff]  }
  0x44   :  { %v177_v7 = vadd.f32 %v434_v2, %v176_v3  ;;  %v256_v3 = vmul.f32 %v446_v29, %v446_v29  ;;  %v482_v46 = vunpack.c.h.bf16 %v522_v36 }
  0x45   :  { %v312_v45 = vadd.f32 %v311_v41, %v249_v35  ;;  %v481_v41 = vunpack.c.l.bf16 %v522_v36 }
  0x46   :  { %v178_v12 = vadd.f32 %v437_v6, %v177_v7  ;;  %v257_v7 = vmul.f32 %v449_v33, %v449_v33 }
  0x47   :  { %v313_v50 = vadd.f32 %v312_v45, %v250_v40  ;;  %v523_v45 = vld [vmem:[%s645_s0 + $0xe8] sm:$0xff]  }
  0x48   :  { %v179_v16 = vadd.f32 %v438_v11, %v178_v12  ;;  %v258_v12 = vmul.f32 %v450_v38, %v450_v38  ;;  %v486_v55 = vunpack.c.h.bf16 %v523_v45 }
  0x49   :  { %v314_v54 = vadd.f32 %v313_v50, %v251_v44  ;;  %v485_v50 = vunpack.c.l.bf16 %v523_v45  ;;  %v216_v45 = vld [vmem:[#allocation3] sm:$0x1] }
  0x4a   :  { %v180_v21 = vadd.f32 %v441_v15, %v179_v16  ;;  %v259_v16 = vmul.f32 %v453_v42, %v453_v42 }
  0x4b   :  { %v315_v59 = vadd.f32 %v314_v54, %v252_v49  ;;  %v524_v54 = vld [vmem:[%s645_s0 + $0xf0] sm:$0xff]  }
  0x4c   :  { %v181_v25 = vadd.f32 %v442_v20, %v180_v21  ;;  %v260_v21 = vmul.f32 %v454_v47, %v454_v47  ;;  %v490_v0 = vunpack.c.h.bf16 %v524_v54 }
  0x4d   :  { %v316_v63 = vadd.f32 %v315_v59, %v253_v53  ;;  %v489_v59 = vunpack.c.l.bf16 %v524_v54 }
  0x4e   :  { %v182_v30 = vadd.f32 %v445_v24, %v181_v25  ;;  %v261_v25 = vmul.f32 %v457_v51, %v457_v51 }
  0x4f   :  { %v317_v4 = vadd.f32 %v316_v63, %v254_v58  ;;  %v525_v63 = vld [vmem:[%s645_s0 + $0xf8] sm:$0xff]  }
  0x50   :  { %v183_v34 = vadd.f32 %v446_v29, %v182_v30  ;;  %v262_v30 = vmul.f32 %v458_v56, %v458_v56 }
  0x51   :  { %v318_v8 = vadd.f32 %v317_v4, %v255_v62  ;;  %v493_v4 = vunpack.c.l.bf16 %v525_v63 }
  0x52   :  { %v184_v39 = vadd.f32 %v449_v33, %v183_v34  ;;  %v263_v34 = vmul.f32 %v461_v60, %v461_v60 }
  0x53   :  { %v319_v13 = vadd.f32 %v318_v8, %v256_v3  ;;  %v494_v8 = vunpack.c.h.bf16 %v525_v63 }
  0x54   :  { %v185_v43 = vadd.f32 %v450_v38, %v184_v39  ;;  %v264_v39 = vmul.f32 %v462_v1, %v462_v1 }
  0x55   :  { %v320_v17 = vadd.f32 %v319_v13, %v257_v7  ;;  %v273_v13 = vmul.f32 %v481_v41, %v481_v41 }
  0x56   :  { %v186_v48 = vadd.f32 %v453_v42, %v185_v43  ;;  %v265_v43 = vmul.f32 %v465_v5, %v465_v5 }
  0x57   :  { %v321_v22 = vadd.f32 %v320_v17, %v258_v12 }
  0x58   :  { %v187_v52 = vadd.f32 %v454_v47, %v186_v48  ;;  %v266_v48 = vmul.f32 %v466_v10, %v466_v10 }
  0x59   :  { %v322_v26 = vadd.f32 %v321_v22, %v259_v16  ;;  %v274_v16 = vmul.f32 %v482_v46, %v482_v46  ;;  %v276_v22 = vmul.f32 %v486_v55, %v486_v55 }
  0x5a   :  { %v188_v57 = vadd.f32 %v457_v51, %v187_v52  ;;  %v267_v52 = vmul.f32 %v469_v14, %v469_v14 }
  0x5b   :  { %v323_v31 = vadd.f32 %v322_v26, %v260_v21 }
  0x5c   :  { %v189_v61 = vadd.f32 %v458_v56, %v188_v57  ;;  %v268_v57 = vmul.f32 %v470_v19, %v470_v19 }
  0x5d   :  { %v324_v35 = vadd.f32 %v323_v31, %v261_v25  ;;  %v277_v25 = vmul.f32 %v489_v59, %v489_v59 }
  0x5e   :  { %v190_v2 = vadd.f32 %v461_v60, %v189_v61  ;;  %v269_v61 = vmul.f32 %v473_v23, %v473_v23 }
  0x5f   :  { %v325_v40 = vadd.f32 %v324_v35, %v262_v30  ;;  %v144_v30 = vld [vmem:[#allocation2] sm:$0x1]  ;;  %v280_v35 = vmul.f32 %v494_v8, %v494_v8 }
  0x60   :  { %v191_v6 = vadd.f32 %v462_v1, %v190_v2  ;;  %v270_v2 = vmul.f32 %v474_v28, %v474_v28 }
  0x61   :  { %v326_v44 = vadd.f32 %v325_v40, %v263_v34 }
  0x62   :  { %v192_v11 = vadd.f32 %v465_v5, %v191_v6  ;;  %v271_v6 = vmul.f32 %v477_v32, %v477_v32 }
  0x63   :  { %v327_v49 = vadd.f32 %v326_v44, %v264_v39 }
  0x64   :  { %v193_v15 = vadd.f32 %v466_v10, %v192_v11  ;;  %v272_v10 = vmul.f32 %v478_v37, %v478_v37 }
  0x65   :  { %v328_v53 = vadd.f32 %v327_v49, %v265_v43 }
  0x66   :  { %v194_v20 = vadd.f32 %v469_v14, %v193_v15 }
  0x67   :  { %v329_v58 = vadd.f32 %v328_v53, %v266_v48 }
  0x68   :  { %v195_v24 = vadd.f32 %v470_v19, %v194_v20  ;;  %v275_v19 = vmul.f32 %v485_v50, %v485_v50 }
  0x69   :  { %v330_v62 = vadd.f32 %v329_v58, %v267_v52 }
  0x6a   :  { %v196_v29 = vadd.f32 %v473_v23, %v195_v24 }
  0x6b   :  { %v331_v3 = vadd.f32 %v330_v62, %v268_v57 }
  0x6c   :  { %v197_v33 = vadd.f32 %v474_v28, %v196_v29  ;;  %v278_v28 = vmul.f32 %v490_v0, %v490_v0 }
  0x6d   :  { %v332_v7 = vadd.f32 %v331_v3, %v269_v61 }
  0x6e   :  { %v198_v38 = vadd.f32 %v477_v32, %v197_v33  ;;  %v279_v32 = vmul.f32 %v493_v4, %v493_v4 }
  0x6f   :  { %v333_v11 = vadd.f32 %v332_v7, %v270_v2 }
  0x70   :  { %v199_v42 = vadd.f32 %v478_v37, %v198_v38 }
  0x71   :  { %v334_v14 = vadd.f32 %v333_v11, %v271_v6 }
  0x72   :  { %v200_v47 = vadd.f32 %v481_v41, %v199_v42 }
  0x73   :  { %v335_v17 = vadd.f32 %v334_v14, %v272_v10 }
  0x74   :  { %v201_v51 = vadd.f32 %v482_v46, %v200_v47 }
  0x75   :  { %v336_v20 = vadd.f32 %v335_v17, %v273_v13 }
  0x76   :  { %v202_v56 = vadd.f32 %v485_v50, %v201_v51 }
  0x77   :  { %v337_v23 = vadd.f32 %v336_v20, %v274_v16 }
  0x78   :  { %v203_v60 = vadd.f32 %v486_v55, %v202_v56 }
  0x79   :  { %v338_v26 = vadd.f32 %v337_v23, %v275_v19 }
  0x7a   :  { %v204_v1 = vadd.f32 %v489_v59, %v203_v60 }
  0x7b   :  { %v339_v29 = vadd.f32 %v338_v26, %v276_v22 }
  0x7c   :  { %v205_v5 = vadd.f32 %v490_v0, %v204_v1 }
  0x7d   :  { %v340_v33 = vadd.f32 %v339_v29, %v277_v25 }
  0x7e   :  { %v206_v9 = vadd.f32 %v493_v4, %v205_v5 }
  0x7f   :  { %v341_v36 = vadd.f32 %v340_v33, %v278_v28 }
  0x80   :  { %v207_v12 = vadd.f32 %v494_v8, %v206_v9 }
  0x81   :  { %v342_v37 = vadd.f32 %v341_v36, %v279_v32 }
  0x82   :  { %v208_v15 = vrot.slane %v207_v12, 4 }
  0x83   :  { %v343_v38 = vadd.f32 %v342_v37, %v280_v35 }
  0x84   :  { %v209_v18 = vadd.f32 %v208_v15, %v207_v12 }
  0x85   :  { %v344_v39 = vrot.slane %v343_v38, 4 }
  0x86   :  { %v210_v21 = vrot.slane %v209_v18, 2 }
  0x87   :  { %v345_v40 = vadd.f32 %v344_v39, %v343_v38 }
  0x88   :  { %v211_v24 = vadd.f32 %v210_v21, %v209_v18 }
  0x89   :  { %v346_v42 = vrot.slane %v345_v40, 2 }
  0x8a   :  { %v212_v27 = vrot.slane %v211_v24, 1 }
  0x8b   :  { %v347_v43 = vadd.f32 %v346_v42, %v345_v40 }
  0x8c   :  { %v213_v31 = vadd.f32 %v212_v27, %v211_v24 }
  0x8d   :  { %v348_v44 = vrot.slane %v347_v43, 1 }
  0x8e   :  { %v214_v34 = vadd.f32 %v213_v31, %v144_v30 }
  0x8f   :  { %v349_v46 = vadd.f32 %v348_v44, %v347_v43 }
  0x90   :  { %215 = vst [vmem:[#allocation2] sm:$0x1] %v214_v34 }
  0x91   :  { %v350_v47 = vadd.f32 %v349_v46, %v216_v45 }
  0x93   :  { %351 = vst [vmem:[#allocation3] sm:$0x1] %v350_v47 }
  0x97   :  { %v355_v41 = vld [vmem:[#allocation2] sm:$0x1] }
  0x98   :  { %356 = vst [vmem:[%s646_s1] sm:$0x1] %v355_v41 }
  0x9a   :  { %v357_v48 = vld [vmem:[#allocation3] sm:$0x1] }
  0x9b   :  { %358 = vst [vmem:[%s647_s2] sm:$0x1] %v357_v48 }

// kernel: resnet_generator_forward.34
= control target key start
LH: loop header
LB: loop body
LE: loop exit
PB: predicated region body
PF: predicated region fallthrough
CT: control target
= control target key end

     0   :  { %s1712_s12 = smov 0   ;;  %s1714_s13 = smov 0   ;;  %s1886_s0 = inlined_call_operand.vmem [shape: bf16[512,256], index: 0, kind: input, shape index: {}]   ;;  %s1887_s1 = inlined_call_operand.vmem [shape: bf16[256,128], index: 1, kind: input, shape index: {}]   ;;  %s1888_s2 = inlined_call_operand.vmem [shape: f32[1,128], index: 2, kind: input, shape index: {}]   ;;  %s1889_s3 = inlined_call_operand.vmem [shape: bf16[512,128], index: 3, kind: output, shape index: {}]  }
   0x1   :  { %s1716_s14 = smov 0  }
   0x2 LB: > { %s32_s15 = sadd.s32 1, %s1686_s13  ;;  %p1235_p0 = scmp.ge.s32.totalorder %s1690_s14, 1  ;;  %s1690_s14 = sphi %s1716_s14, %s13_s14   ;;  %s1686_s13 = sphi %s1714_s13, %s1891_s13   ;;  %s1682_s12 = sphi %s1712_s12, %s1890_s12  }
   0x3   : > { %p34_p1 = scmp.ge.s32.totalorder %s32_s15, 2  ;;  %p191_p2 = scmp.lt.s32.totalorder %s1690_s14, 3 }
   0x5   : > { %s1893_s15 = smov (%p34_p1, %s32_s15), 0  ;;  %p192_p3 = pnand %p1235_p0, %p191_p2 }
   0x6   : > { %v1604_v0 = vld [vmem:[%s1887_s1 + $0x40] sm:$0xff] (!%p192_p3)   ;;  %s1236_s18 = sshll.u32 (!%p192_p3), %s1682_s12, 5  ;;  %v1606_v2 = vld [vmem:[%s1887_s1 + $0x48] sm:$0xff] (!%p192_p3)   ;;  %v1608_v4 = vld [vmem:[%s1887_s1 + $0x50] sm:$0xff] (!%p192_p3)  }
   0x7   : > { %195 = sbr.rel (%p192_p3) target bundleno = 317 (0x13d), region = 32  ;;  %v1605_v1 = vld [vmem:[%s1887_s1] sm:$0xff] (!%p192_p3)   ;;  %1452 = vmatprep.subr.bf16.mxu0 (!%p192_p3), %v1604_v0  ;;  %1564 = vmatprep.subr.bf16.mxu1 (!%p192_p3), %v1604_v0  ;;  %v1607_v3 = vld [vmem:[%s1887_s1 + $0x8] sm:$0xff] (!%p192_p3)   ;;  %p236_p4 = scmp.lt.s32.totalorder (!%p192_p3), %s1236_s18, 63  ;;  %v1609_v5 = vld [vmem:[%s1887_s1 + $0x10] sm:$0xff] (!%p192_p3)  }
   0x8   : > { %1453 = vmatpush3.bf16.msra.mxu0 (!%p192_p3), %v1605_v1  ;;  %1572 = vmatpush3.bf16.msra.mxu1 (!%p192_p3), %v1605_v1  ;;  %v1610_v6 = vld [vmem:[%s1887_s1 + $0x58] sm:$0xff] (!%p192_p3)   ;;  %v1612_v8 = vld [vmem:[%s1887_s1 + $0x60] sm:$0xff] (!%p192_p3)   ;;  %v1614_v10 = vld [vmem:[%s1887_s1 + $0x68] sm:$0xff] (!%p192_p3)  }
   0x9   : > { %1454 = vmatprep.subr.bf16.mxu0 (!%p192_p3), %v1606_v2  ;;  %1565 = vmatprep.subr.bf16.mxu1 (!%p192_p3), %v1606_v2  ;;  %v1611_v7 = vld [vmem:[%s1887_s1 + $0x18] sm:$0xff] (!%p192_p3)   ;;  %v1613_v9 = vld [vmem:[%s1887_s1 + $0x20] sm:$0xff] (!%p192_p3)   ;;  %v1615_v13 = vld [vmem:[%s1887_s1 + $0x28] sm:$0xff] (!%p192_p3)  }
   0xa   : > { %v1616_v14 = vld [vmem:[%s1887_s1 + $0x70] sm:$0xff] (!%p192_p3)   ;;  %v1618_v16 = vld [vmem:[%s1887_s1 + $0x78] sm:$0xff] (!%p192_p3)   ;;  %v1821_v56 = vld [vmem:[%s1888_s2] ss:$0 sm:$0xff] (!%p192_p3) }
   0xb   : > { %v1617_v15 = vld [vmem:[%s1887_s1 + $0x30] sm:$0xff] (!%p192_p3)   ;;  %v1619_v17 = vld [vmem:[%s1887_s1 + $0x38] sm:$0xff] (!%p192_p3)  }
   0xc   : > { %1455 = vmatpush3.bf16.msra.mxu0 (!%p192_p3), %v1607_v3  ;;  %1573 = vmatpush3.bf16.msra.mxu1 (!%p192_p3), %v1607_v3 }
   0xd   : > { %1456 = vmatprep.subr.bf16.mxu0 (!%p192_p3), %v1608_v4  ;;  %1566 = vmatprep.subr.bf16.mxu1 (!%p192_p3), %v1608_v4 }
   0xe   : > { %s1895_s18 = smov (!%p236_p4, %s1236_s18), 63 }
   0xf   : > { %s1324_s6 = sshll.u32 %s1895_s18, 3  ;;  %s1240_s5 = sshll.u32 %s1895_s18, 2 }
  0x10   : > { %1457 = vmatpush3.bf16.msra.mxu0 %v1609_v5  ;;  %1574 = vmatpush3.bf16.msra.mxu1 %v1609_v5  ;;  %s1763_s11 = scalar_lea.vmem %s1886_s0, %s1324_s6  ;;  %s1831_s8 = scalar_lea.vmem %s1889_s3, %s1240_s5 }
  0x11   : > { %1458 = vmatprep.subr.bf16.mxu0 %v1610_v6  ;;  %1567 = vmatprep.subr.bf16.mxu1 %v1610_v6  ;;  %v1622_v11 = vld [vmem:[%s1763_s11 + $0x4] ss:$8 sps:$4 sm:$0xff]   ;;  %v1620_v18 = vld [vmem:[%s1763_s11] ss:$8 sps:$4 sm:$0xff]   ;;  %v1626_v20 = vld [vmem:[%s1763_s11 + $0x14] ss:$8 sps:$4 sm:$0xff]  }
  0x12   : > { %v1625_v12 = vld [vmem:[%s1763_s11 + $0x84] ss:$8 sps:$4 sm:$0xff]   ;;  %688 = vmatprep.mubr.bf16.mxu0 %v1622_v11  ;;  %v1623_v19 = vld [vmem:[%s1763_s11 + $0x80] ss:$8 sps:$4 sm:$0xff]   ;;  %v1628_v21 = vld [vmem:[%s1763_s11 + $0x94] ss:$8 sps:$4 sm:$0xff]  }
  0x13   : > { %752 = vmatprep.mubr.bf16.mxu1 %v1625_v12  ;;  %v1630_v22 = vld [vmem:[%s1763_s11 + $0x10] ss:$8 sps:$4 sm:$0xff]   ;;  %v1632_v24 = vld [vmem:[%s1763_s11 + $0x24] ss:$8 sps:$4 sm:$0xff]   ;;  %v1636_v26 = vld [vmem:[%s1763_s11 + $0x20] ss:$8 sps:$4 sm:$0xff]  }
  0x14   : > { %1459 = vmatpush3.bf16.msra.mxu0 %v1611_v7  ;;  %1575 = vmatpush3.bf16.msra.mxu1 %v1611_v7  ;;  %v1631_v23 = vld [vmem:[%s1763_s11 + $0x90] ss:$8 sps:$4 sm:$0xff]   ;;  %v1634_v25 = vld [vmem:[%s1763_s11 + $0xa4] ss:$8 sps:$4 sm:$0xff]   ;;  %v1637_v27 = vld [vmem:[%s1763_s11 + $0xa0] ss:$8 sps:$4 sm:$0xff]  }
  0x15   : > { %1460 = vmatprep.subr.bf16.mxu0 %v1612_v8  ;;  %1568 = vmatprep.subr.bf16.mxu1 %v1612_v8  ;;  %v1638_v28 = vld [vmem:[%s1763_s11 + $0x34] ss:$8 sps:$4 sm:$0xff]   ;;  %v1642_v30 = vld [vmem:[%s1763_s11 + $0x30] ss:$8 sps:$4 sm:$0xff]   ;;  %v1644_v32 = vld [vmem:[%s1763_s11 + $0x44] ss:$8 sps:$4 sm:$0xff]  }
  0x16   : > { %v1640_v29 = vld [vmem:[%s1763_s11 + $0xb4] ss:$8 sps:$4 sm:$0xff]   ;;  %v1643_v31 = vld [vmem:[%s1763_s11 + $0xb0] ss:$8 sps:$4 sm:$0xff]   ;;  %v1646_v33 = vld [vmem:[%s1763_s11 + $0xc4] ss:$8 sps:$4 sm:$0xff]  }
  0x17   : > { %v1648_v34 = vld [vmem:[%s1763_s11 + $0x40] ss:$8 sps:$4 sm:$0xff]   ;;  %v1650_v36 = vld [vmem:[%s1763_s11 + $0x54] ss:$8 sps:$4 sm:$0xff]   ;;  %v1654_v38 = vld [vmem:[%s1763_s11 + $0x50] ss:$8 sps:$4 sm:$0xff]  }
  0x18   : > { %1461 = vmatpush3.bf16.msra.mxu0 %v1613_v9  ;;  %1576 = vmatpush3.bf16.msra.mxu1 %v1613_v9  ;;  %v1649_v35 = vld [vmem:[%s1763_s11 + $0xc0] ss:$8 sps:$4 sm:$0xff]   ;;  %v1652_v37 = vld [vmem:[%s1763_s11 + $0xd4] ss:$8 sps:$4 sm:$0xff]   ;;  %v1655_v39 = vld [vmem:[%s1763_s11 + $0xd0] ss:$8 sps:$4 sm:$0xff]  }
  0x19   : > { %1462 = vmatprep.subr.bf16.mxu0 %v1614_v10  ;;  %1569 = vmatprep.subr.bf16.mxu1 %v1614_v10  ;;  %v1656_v40 = vld [vmem:[%s1763_s11 + $0x64] ss:$8 sps:$4 sm:$0xff]   ;;  %v1660_v42 = vld [vmem:[%s1763_s11 + $0x60] ss:$8 sps:$4 sm:$0xff]   ;;  %v1662_v44 = vld [vmem:[%s1763_s11 + $0x74] ss:$8 sps:$4 sm:$0xff]  }
  0x1a   : > { %v1658_v41 = vld [vmem:[%s1763_s11 + $0xe4] ss:$8 sps:$4 sm:$0xff]   ;;  %v1661_v43 = vld [vmem:[%s1763_s11 + $0xe0] ss:$8 sps:$4 sm:$0xff]   ;;  %v1664_v45 = vld [vmem:[%s1763_s11 + $0xf4] ss:$8 sps:$4 sm:$0xff]  }
  0x1b   : > { %v1666_v46 = vld [vmem:[%s1763_s11 + $0x70] ss:$8 sps:$4 sm:$0xff]  }
  0x1c   : > { %1463 = vmatpush3.bf16.msra.mxu0 %v1615_v13  ;;  %1577 = vmatpush3.bf16.msra.mxu1 %v1615_v13  ;;  %v1667_v47 = vld [vmem:[%s1763_s11 + $0xf0] ss:$8 sps:$4 sm:$0xff]  }
  0x1d   : > { %1464 = vmatprep.subr.bf16.mxu0 %v1616_v14  ;;  %1570 = vmatprep.subr.bf16.mxu1 %v1616_v14 }
  0x20   : > { %1465 = vmatpush3.bf16.msra.mxu0 %v1617_v15  ;;  %1578 = vmatpush3.bf16.msra.mxu1 %v1617_v15 }
  0x21   : > { %1466 = vmatprep.subr.bf16.mxu0 %v1618_v16  ;;  %1571 = vmatprep.subr.bf16.mxu1 %v1618_v16 }
  0x24   : > { %1467 = vmatpush3.bf16.msra.mxu0 %v1619_v17  ;;  %1579 = vmatpush3.bf16.msra.mxu1 %v1619_v17 }
  0x27   : > { %689 = vmatmul.mubr.bf16.vlgmr.msra.gmra.mrb[0].mxu0 %v1620_v18  ;;  %753 = vmatmul.mubr.bf16.vlgmr.msra.gmra.mrb[0].mxu1 %v1623_v19 }
  0x28   : > { %696 = vmatprep.mubr.bf16.mxu0 %v1626_v20  ;;  %760 = vmatprep.mubr.bf16.mxu1 %v1628_v21 }
  0x2f   : > { %697 = vmatmul.mubr.bf16.gmra.mrb[4].mxu0 %v1630_v22  ;;  %761 = vmatmul.mubr.bf16.gmra.mrb[4].mxu1 %v1631_v23 }
  0x30   : > { %704 = vmatprep.mubr.bf16.mxu0 %v1632_v24  ;;  %768 = vmatprep.mubr.bf16.mxu1 %v1634_v25 }
  0x37   : > { %705 = vmatmul.mubr.bf16.gmra.mrb[8].mxu0 %v1636_v26  ;;  %769 = vmatmul.mubr.bf16.gmra.mrb[8].mxu1 %v1637_v27 }
  0x38   : > { %712 = vmatprep.mubr.bf16.mxu0 %v1638_v28  ;;  %776 = vmatprep.mubr.bf16.mxu1 %v1640_v29 }
  0x3f   : > { %713 = vmatmul.mubr.bf16.gmra.mrb[12].mxu0 %v1642_v30  ;;  %777 = vmatmul.mubr.bf16.gmra.mrb[12].mxu1 %v1643_v31 }
  0x40   : > { %720 = vmatprep.mubr.bf16.mxu0 %v1644_v32  ;;  %784 = vmatprep.mubr.bf16.mxu1 %v1646_v33 }
  0x47   : > { %721 = vmatmul.mubr.bf16.gmra.mrb[16].mxu0 %v1648_v34  ;;  %785 = vmatmul.mubr.bf16.gmra.mrb[16].mxu1 %v1649_v35 }
  0x48   : > { %728 = vmatprep.mubr.bf16.mxu0 %v1650_v36  ;;  %792 = vmatprep.mubr.bf16.mxu1 %v1652_v37 }
  0x4f   : > { %729 = vmatmul.mubr.bf16.gmra.mrb[20].mxu0 %v1654_v38  ;;  %793 = vmatmul.mubr.bf16.gmra.mrb[20].mxu1 %v1655_v39 }
  0x50   : > { %736 = vmatprep.mubr.bf16.mxu0 %v1656_v40  ;;  %800 = vmatprep.mubr.bf16.mxu1 %v1658_v41 }
  0x57   : > { %737 = vmatmul.mubr.bf16.gmra.mrb[24].mxu0 %v1660_v42  ;;  %801 = vmatmul.mubr.bf16.gmra.mrb[24].mxu1 %v1661_v43 }
  0x58   : > { %744 = vmatprep.mubr.bf16.mxu0 %v1662_v44  ;;  %808 = vmatprep.mubr.bf16.mxu1 %v1664_v45 }
  0x5f   : > { %745 = vmatmul.mubr.bf16.gmra.mrb[28].mxu0 %v1666_v46  ;;  %809 = vmatmul.mubr.bf16.gmra.mrb[28].mxu1 %v1667_v47 }
  0xfa   : > { %v1468_v48 = vpop.f32.mrb[0].mxu0  ;;  %v1516_v49 = vpop.f32.mrb[0].mxu1 }
  0xfb   : > { %v1469_v50 = vpop.f32.mrb[1].mxu0  ;;  %v1517_v51 = vpop.f32.mrb[1].mxu1 }
  0xfc   : > { %v1470_v52 = vadd.f32 %v1469_v50, %v1468_v48  ;;  %v1518_v53 = vadd.f32 %v1517_v51, %v1516_v49  ;;  %v1471_v54 = vpop.f32.mrb[2].mxu0  ;;  %v1519_v55 = vpop.f32.mrb[2].mxu1 }
  0xfd   : > { %v1472_v57 = vpop.f32.mrb[3].mxu0  ;;  %v1520_v58 = vpop.f32.mrb[3].mxu1 }
  0xfe   : > { %v1473_v59 = vadd.f32 %v1472_v57, %v1471_v54  ;;  %v1521_v60 = vadd.f32 %v1520_v58, %v1519_v55  ;;  %v923_v61 = vadd.f32 %v1470_v52, %v1821_v56  ;;  %v939_v62 = vadd.f32 %v1518_v53, %v1821_v56 }
 0x100   : > { %v924_v63 = vadd.f32 %v1473_v59, %v1821_v56  ;;  %v940_v0 = vadd.f32 %v1521_v60, %v1821_v56 }
 0x102   : > { %v1360_v1 = vpack.c.bf16 %v924_v63, %v923_v61  ;;  %v1400_v2 = vpack.c.bf16 %v940_v0, %v939_v62  ;;  %v1474_v3 = vpop.f32.mrb[4].mxu0  ;;  %v1522_v4 = vpop.f32.mrb[4].mxu1 }
 0x103   : > { %v1475_v5 = vpop.f32.mrb[5].mxu0  ;;  %v1523_v6 = vpop.f32.mrb[5].mxu1 }
 0x104   : > { %1361 = vst [vmem:[%s1831_s8] sm:$0xff] %v1360_v1   ;;  %1444 = vst [vmem:[%s1831_s8 + $0x40] sm:$0xff] %v1400_v2   ;;  %v1476_v7 = vadd.f32 %v1475_v5, %v1474_v3  ;;  %v1524_v8 = vadd.f32 %v1523_v6, %v1522_v4  ;;  %v1477_v9 = vpop.f32.mrb[6].mxu0  ;;  %v1525_v10 = vpop.f32.mrb[6].mxu1 }
 0x105   : > { %v1478_v11 = vpop.f32.mrb[7].mxu0  ;;  %v1526_v12 = vpop.f32.mrb[7].mxu1 }
 0x106   : > { %v1479_v13 = vadd.f32 %v1478_v11, %v1477_v9  ;;  %v1527_v14 = vadd.f32 %v1526_v12, %v1525_v10  ;;  %v925_v15 = vadd.f32 %v1476_v7, %v1821_v56  ;;  %v941_v16 = vadd.f32 %v1524_v8, %v1821_v56 }
 0x108   : > { %v926_v17 = vadd.f32 %v1479_v13, %v1821_v56  ;;  %v942_v18 = vadd.f32 %v1527_v14, %v1821_v56 }
 0x10a   : > { %v1365_v19 = vpack.c.bf16 %v926_v17, %v925_v15  ;;  %v1405_v20 = vpack.c.bf16 %v942_v18, %v941_v16  ;;  %v1480_v21 = vpop.f32.mrb[8].mxu0  ;;  %v1528_v22 = vpop.f32.mrb[8].mxu1 }
 0x10b   : > { %v1481_v23 = vpop.f32.mrb[9].mxu0  ;;  %v1529_v24 = vpop.f32.mrb[9].mxu1 }
 0x10c   : > { %1437 = vst [vmem:[%s1831_s8 + $0x8] sm:$0xff] %v1365_v19   ;;  %1445 = vst [vmem:[%s1831_s8 + $0x48] sm:$0xff] %v1405_v20   ;;  %v1482_v25 = vadd.f32 %v1481_v23, %v1480_v21  ;;  %v1530_v26 = vadd.f32 %v1529_v24, %v1528_v22  ;;  %v1483_v27 = vpop.f32.mrb[10].mxu0  ;;  %v1531_v28 = vpop.f32.mrb[10].mxu1 }
 0x10d   : > { %v1484_v29 = vpop.f32.mrb[11].mxu0  ;;  %v1532_v30 = vpop.f32.mrb[11].mxu1 }
 0x10e   : > { %v1485_v31 = vadd.f32 %v1484_v29, %v1483_v27  ;;  %v1533_v32 = vadd.f32 %v1532_v30, %v1531_v28  ;;  %v927_v33 = vadd.f32 %v1482_v25, %v1821_v56  ;;  %v943_v34 = vadd.f32 %v1530_v26, %v1821_v56 }
 0x110   : > { %v928_v35 = vadd.f32 %v1485_v31, %v1821_v56  ;;  %v944_v36 = vadd.f32 %v1533_v32, %v1821_v56 }
 0x112   : > { %v1370_v37 = vpack.c.bf16 %v928_v35, %v927_v33  ;;  %v1410_v38 = vpack.c.bf16 %v944_v36, %v943_v34  ;;  %v1486_v39 = vpop.f32.mrb[12].mxu0  ;;  %v1534_v40 = vpop.f32.mrb[12].mxu1 }
 0x113   : > { %v1487_v41 = vpop.f32.mrb[13].mxu0  ;;  %v1535_v42 = vpop.f32.mrb[13].mxu1 }
 0x114   : > { %1438 = vst [vmem:[%s1831_s8 + $0x10] sm:$0xff] %v1370_v37   ;;  %1446 = vst [vmem:[%s1831_s8 + $0x50] sm:$0xff] %v1410_v38   ;;  %v1488_v43 = vadd.f32 %v1487_v41, %v1486_v39  ;;  %v1536_v44 = vadd.f32 %v1535_v42, %v1534_v40  ;;  %v1489_v45 = vpop.f32.mrb[14].mxu0  ;;  %v1537_v46 = vpop.f32.mrb[14].mxu1 }
 0x115   : > { %v1490_v47 = vpop.f32.mrb[15].mxu0  ;;  %v1538_v48 = vpop.f32.mrb[15].mxu1 }
 0x116   : > { %v1491_v49 = vadd.f32 %v1490_v47, %v1489_v45  ;;  %v1539_v50 = vadd.f32 %v1538_v48, %v1537_v46  ;;  %v929_v51 = vadd.f32 %v1488_v43, %v1821_v56  ;;  %v945_v52 = vadd.f32 %v1536_v44, %v1821_v56 }
 0x118   : > { %v930_v53 = vadd.f32 %v1491_v49, %v1821_v56  ;;  %v946_v54 = vadd.f32 %v1539_v50, %v1821_v56 }
 0x11a   : > { %v1375_v55 = vpack.c.bf16 %v930_v53, %v929_v51  ;;  %v1415_v57 = vpack.c.bf16 %v946_v54, %v945_v52  ;;  %v1492_v58 = vpop.f32.mrb[16].mxu0  ;;  %v1540_v59 = vpop.f32.mrb[16].mxu1 }
 0x11b   : > { %v1493_v60 = vpop.f32.mrb[17].mxu0  ;;  %v1541_v61 = vpop.f32.mrb[17].mxu1 }
 0x11c   : > { %1439 = vst [vmem:[%s1831_s8 + $0x18] sm:$0xff] %v1375_v55   ;;  %1447 = vst [vmem:[%s1831_s8 + $0x58] sm:$0xff] %v1415_v57   ;;  %v1494_v62 = vadd.f32 %v1493_v60, %v1492_v58  ;;  %v1542_v63 = vadd.f32 %v1541_v61, %v1540_v59  ;;  %v1495_v0 = vpop.f32.mrb[18].mxu0  ;;  %v1543_v1 = vpop.f32.mrb[18].mxu1 }
 0x11d   : > { %v1496_v2 = vpop.f32.mrb[19].mxu0  ;;  %v1544_v3 = vpop.f32.mrb[19].mxu1 }
 0x11e   : > { %v1497_v4 = vadd.f32 %v1496_v2, %v1495_v0  ;;  %v1545_v5 = vadd.f32 %v1544_v3, %v1543_v1  ;;  %v931_v6 = vadd.f32 %v1494_v62, %v1821_v56  ;;  %v947_v7 = vadd.f32 %v1542_v63, %v1821_v56 }
 0x120   : > { %v932_v8 = vadd.f32 %v1497_v4, %v1821_v56  ;;  %v948_v9 = vadd.f32 %v1545_v5, %v1821_v56 }
 0x122   : > { %v1380_v10 = vpack.c.bf16 %v932_v8, %v931_v6  ;;  %v1420_v11 = vpack.c.bf16 %v948_v9, %v947_v7  ;;  %v1498_v12 = vpop.f32.mrb[20].mxu0  ;;  %v1546_v13 = vpop.f32.mrb[20].mxu1 }
 0x123   : > { %v1499_v14 = vpop.f32.mrb[21].mxu0  ;;  %v1547_v15 = vpop.f32.mrb[21].mxu1 }
 0x124   : > { %1440 = vst [vmem:[%s1831_s8 + $0x20] sm:$0xff] %v1380_v10   ;;  %1448 = vst [vmem:[%s1831_s8 + $0x60] sm:$0xff] %v1420_v11   ;;  %v1500_v16 = vadd.f32 %v1499_v14, %v1498_v12  ;;  %v1548_v17 = vadd.f32 %v1547_v15, %v1546_v13  ;;  %v1501_v18 = vpop.f32.mrb[22].mxu0  ;;  %v1549_v19 = vpop.f32.mrb[22].mxu1 }
 0x125   : > { %v1502_v20 = vpop.f32.mrb[23].mxu0  ;;  %v1550_v21 = vpop.f32.mrb[23].mxu1 }
 0x126   : > { %v1503_v22 = vadd.f32 %v1502_v20, %v1501_v18  ;;  %v1551_v23 = vadd.f32 %v1550_v21, %v1549_v19  ;;  %v933_v24 = vadd.f32 %v1500_v16, %v1821_v56  ;;  %v949_v25 = vadd.f32 %v1548_v17, %v1821_v56 }
 0x128   : > { %v934_v26 = vadd.f32 %v1503_v22, %v1821_v56  ;;  %v950_v27 = vadd.f32 %v1551_v23, %v1821_v56 }
 0x12a   : > { %v1385_v28 = vpack.c.bf16 %v934_v26, %v933_v24  ;;  %v1425_v29 = vpack.c.bf16 %v950_v27, %v949_v25  ;;  %v1504_v30 = vpop.f32.mrb[24].mxu0  ;;  %v1552_v31 = vpop.f32.mrb[24].mxu1 }
 0x12b   : > { %v1505_v32 = vpop.f32.mrb[25].mxu0  ;;  %v1553_v33 = vpop.f32.mrb[25].mxu1 }
 0x12c   : > { %1441 = vst [vmem:[%s1831_s8 + $0x28] sm:$0xff] %v1385_v28   ;;  %1449 = vst [vmem:[%s1831_s8 + $0x68] sm:$0xff] %v1425_v29   ;;  %v1506_v34 = vadd.f32 %v1505_v32, %v1504_v30  ;;  %v1554_v35 = vadd.f32 %v1553_v33, %v1552_v31  ;;  %v1507_v36 = vpop.f32.mrb[26].mxu0  ;;  %v1555_v37 = vpop.f32.mrb[26].mxu1 }
 0x12d   : > { %v1508_v38 = vpop.f32.mrb[27].mxu0  ;;  %v1556_v39 = vpop.f32.mrb[27].mxu1 }
 0x12e   : > { %v1509_v40 = vadd.f32 %v1508_v38, %v1507_v36  ;;  %v1557_v41 = vadd.f32 %v1556_v39, %v1555_v37  ;;  %v935_v42 = vadd.f32 %v1506_v34, %v1821_v56  ;;  %v951_v43 = vadd.f32 %v1554_v35, %v1821_v56 }
 0x130   : > { %v936_v44 = vadd.f32 %v1509_v40, %v1821_v56  ;;  %v952_v45 = vadd.f32 %v1557_v41, %v1821_v56 }
 0x132   : > { %v1390_v46 = vpack.c.bf16 %v936_v44, %v935_v42  ;;  %v1430_v47 = vpack.c.bf16 %v952_v45, %v951_v43  ;;  %v1510_v48 = vpop.f32.mrb[28].mxu0  ;;  %v1558_v49 = vpop.f32.mrb[28].mxu1 }
 0x133   : > { %v1511_v50 = vpop.f32.mrb[29].mxu0  ;;  %v1559_v51 = vpop.f32.mrb[29].mxu1 }
 0x134   : > { %1442 = vst [vmem:[%s1831_s8 + $0x30] sm:$0xff] %v1390_v46   ;;  %1450 = vst [vmem:[%s1831_s8 + $0x70] sm:$0xff] %v1430_v47   ;;  %v1512_v52 = vadd.f32 %v1511_v50, %v1510_v48  ;;  %v1560_v53 = vadd.f32 %v1559_v51, %v1558_v49  ;;  %v1513_v54 = vpop.f32.mrb[30].mxu0  ;;  %v1561_v55 = vpop.f32.mrb[30].mxu1 }
 0x135   : > { %v1514_v57 = vpop.f32.mrb[31].mxu0  ;;  %v1562_v58 = vpop.f32.mrb[31].mxu1 }
 0x136   : > { %v1515_v59 = vadd.f32 %v1514_v57, %v1513_v54  ;;  %v1563_v60 = vadd.f32 %v1562_v58, %v1561_v55  ;;  %v937_v61 = vadd.f32 %v1512_v52, %v1821_v56  ;;  %v953_v62 = vadd.f32 %v1560_v53, %v1821_v56 }
 0x138   : > { %v938_v63 = vadd.f32 %v1515_v59, %v1821_v56  ;;  %v954_v0 = vadd.f32 %v1563_v60, %v1821_v56 }
 0x13a   : > { %v1395_v1 = vpack.c.bf16 %v938_v63, %v937_v61  ;;  %v1435_v2 = vpack.c.bf16 %v954_v0, %v953_v62 }
 0x13c   : > { %1443 = vst [vmem:[%s1831_s8 + $0x38] sm:$0xff] %v1395_v1   ;;  %1451 = vst [vmem:[%s1831_s8 + $0x78] sm:$0xff] %v1435_v2  }
 0x13d PF: > { %s13_s14 = sadd.s32 1, %s1690_s14   ;;  %s1890_s12 = smov %s1686_s13 }
 0x13e   : > { %p10_p5 = scmp.ge.s32.totalorder %s13_s14, 4   ;;  %s1891_s13 = smov %s1893_s15 }
 0x140   :  { %12 = sbr.rel (!%p10_p5) target bundleno = 2 (0x2), region = 76 }

// kernel: resnet_generator_forward.36
= control target key start
LH: loop header
LB: loop body
LE: loop exit
PB: predicated region body
PF: predicated region fallthrough
CT: control target
= control target key end

     0   :  { %vm604_vm0 = vcmask 60416   ;;  %s1472_s0 = inlined_call_operand.vmem [shape: bf16[512,128], index: 0, kind: input, shape index: {}]   ;;  %s1473_s1 = inlined_call_operand.vmem [shape: f32[1,128], index: 1, kind: input, shape index: {}]   ;;  %s1474_s2 = inlined_call_operand.vmem [shape: f32[1,128], index: 2, kind: input, shape index: {}]   ;;  %s1475_s3 = inlined_call_operand.vmem [shape: bf16[512,8], index: 3, kind: output, shape index: {}]  }
   0x1   :  { %v804_v0 = vld [vmem:[%s1472_s0] sm:$0xff]   ;;  %v931_v4 = vld [vmem:[%s1472_s0 + $0x8] sm:$0xff]   ;;  %v932_v5 = vld [vmem:[%s1472_s0 + $0x10] sm:$0xff]  }
   0x2   :  { %v988_v1 = vld [vmem:[%s1473_s1] ss:$0 sm:$0xff]  ;;  %v805_v2 = vunpack.c.l.bf16 %v804_v0  ;;  %v806_v3 = vunpack.c.h.bf16 %v804_v0  ;;  %v933_v6 = vld [vmem:[%s1472_s0 + $0x18] sm:$0xff]   ;;  %v809_v8 = vunpack.c.l.bf16 %v931_v4  ;;  %v810_v9 = vunpack.c.h.bf16 %v931_v4  ;;  %v935_v41 = vld [vmem:[%s1472_s0 + $0x28] sm:$0xff]  }
   0x3   :  { %v1002_v7 = vld [vmem:[%s1474_s2] ss:$0 sm:$0xff]  ;;  %v813_v10 = vunpack.c.l.bf16 %v932_v5  ;;  %v814_v11 = vunpack.c.h.bf16 %v932_v5  ;;  %v817_v14 = vunpack.c.l.bf16 %v933_v6  ;;  %v818_v15 = vunpack.c.h.bf16 %v933_v6  ;;  %v936_v42 = vld [vmem:[%s1472_s0 + $0x30] sm:$0xff]   ;;  %v937_v47 = vld [vmem:[%s1472_s0 + $0x38] sm:$0xff]  }
   0x4   :  { %v149_v12 = vmul.f32 %v805_v2, %v988_v1  ;;  %v150_v13 = vmul.f32 %v806_v3, %v988_v1  ;;  %v151_v16 = vmul.f32 %v809_v8, %v988_v1  ;;  %v152_v17 = vmul.f32 %v810_v9, %v988_v1  ;;  %v934_v36 = vld [vmem:[%s1472_s0 + $0x20] sm:$0xff]  }
   0x5   :  { %v153_v18 = vmul.f32 %v813_v10, %v988_v1  ;;  %v154_v19 = vmul.f32 %v814_v11, %v988_v1  ;;  %v155_v22 = vmul.f32 %v817_v14, %v988_v1  ;;  %v156_v23 = vmul.f32 %v818_v15, %v988_v1 }
   0x6   :  { %v220_v20 = vadd.f32 %v1002_v7, %v149_v12  ;;  %v221_v21 = vadd.f32 %v1002_v7, %v150_v13  ;;  %v222_v24 = vadd.f32 %v1002_v7, %v151_v16  ;;  %v223_v25 = vadd.f32 %v1002_v7, %v152_v17 }
   0x7   :  { %v224_v26 = vadd.f32 %v1002_v7, %v153_v18  ;;  %v225_v27 = vadd.f32 %v1002_v7, %v154_v19  ;;  %v226_v30 = vadd.f32 %v1002_v7, %v155_v22  ;;  %v227_v31 = vadd.f32 %v1002_v7, %v156_v23  ;;  %v938_v18 = vld [vmem:[%s1472_s0 + $0x40] sm:$0xff]   ;;  %v939_v23 = vld [vmem:[%s1472_s0 + $0x48] sm:$0xff]  }
   0x8   :  { %v284_v28 = vmax.f32 %v220_v20, 0.0  ;;  %v285_v29 = vmax.f32 %v221_v21, 0.0  ;;  %v286_v32 = vmax.f32 %v222_v24, 0.0  ;;  %v287_v33 = vmax.f32 %v223_v25, 0.0  ;;  %v940_v24 = vld [vmem:[%s1472_s0 + $0x50] sm:$0xff]  }
   0x9   :  { %v288_v34 = vmax.f32 %v224_v26, 0.0  ;;  %v289_v35 = vmax.f32 %v225_v27, 0.0  ;;  %v290_v39 = vmax.f32 %v226_v30, 0.0  ;;  %v291_v40 = vmax.f32 %v227_v31, 0.0 }
   0xa   :  { %v739_v37 = vpack.c.bf16 %v284_v28, %v284_v28  ;;  %v740_v38 = vpack.c.bf16 %v285_v29, %v285_v29  ;;  %v741_v43 = vpack.c.bf16 %v286_v32, %v286_v32  ;;  %v742_v44 = vpack.c.bf16 %v287_v33, %v287_v33  ;;  %v941_v29 = vld [vmem:[%s1472_s0 + $0x58] sm:$0xff]  }
   0xb   :  { %v743_v45 = vpack.c.bf16 %v288_v34, %v288_v34  ;;  %v744_v46 = vpack.c.bf16 %v289_v35, %v289_v35  ;;  %v745_v48 = vpack.c.bf16 %v290_v39, %v290_v39  ;;  %v746_v49 = vpack.c.bf16 %v291_v40, %v291_v40 }
   0xc   :  { %605 = vst.msk [vmem:[%s1475_s3] sm:$0xf] %vm604_vm0, %v739_v37  ;;  %606 = vst.msk [vmem:[%s1475_s3 + $0x4] sm:$0xf] %vm604_vm0, %v740_v38  ;;  %v821_v50 = vunpack.c.l.bf16 %v934_v36  ;;  %v822_v51 = vunpack.c.h.bf16 %v934_v36  ;;  %v825_v52 = vunpack.c.l.bf16 %v935_v41  ;;  %v826_v53 = vunpack.c.h.bf16 %v935_v41 }
   0xd   :  { %607 = vst.msk [vmem:[%s1475_s3 + $0x8] sm:$0xf] %vm604_vm0, %v741_v43  ;;  %608 = vst.msk [vmem:[%s1475_s3 + $0xc] sm:$0xf] %vm604_vm0, %v742_v44  ;;  %v829_v54 = vunpack.c.l.bf16 %v936_v42  ;;  %v830_v55 = vunpack.c.h.bf16 %v936_v42  ;;  %v833_v58 = vunpack.c.l.bf16 %v937_v47  ;;  %v834_v59 = vunpack.c.h.bf16 %v937_v47 }
   0xe   :  { %609 = vst.msk [vmem:[%s1475_s3 + $0x10] sm:$0xf] %vm604_vm0, %v743_v45  ;;  %610 = vst.msk [vmem:[%s1475_s3 + $0x14] sm:$0xf] %vm604_vm0, %v744_v46  ;;  %v157_v56 = vmul.f32 %v821_v50, %v988_v1  ;;  %v158_v57 = vmul.f32 %v822_v51, %v988_v1  ;;  %v159_v60 = vmul.f32 %v825_v52, %v988_v1  ;;  %v837_v32 = vunpack.c.l.bf16 %v938_v18 }
   0xf   :  { %611 = vst.msk [vmem:[%s1475_s3 + $0x18] sm:$0xf] %vm604_vm0, %v745_v48  ;;  %612 = vst.msk [vmem:[%s1475_s3 + $0x1c] sm:$0xf] %vm604_vm0, %v746_v49  ;;  %v160_v61 = vmul.f32 %v826_v53, %v988_v1  ;;  %v161_v62 = vmul.f32 %v829_v54, %v988_v1  ;;  %v162_v63 = vmul.f32 %v830_v55, %v988_v1  ;;  %v838_v33 = vunpack.c.h.bf16 %v938_v18 }
  0x10   :  { %v228_v0 = vadd.f32 %v1002_v7, %v157_v56  ;;  %v229_v2 = vadd.f32 %v1002_v7, %v158_v57  ;;  %v163_v3 = vmul.f32 %v833_v58, %v988_v1  ;;  %v164_v4 = vmul.f32 %v834_v59, %v988_v1 }
  0x11   :  { %v230_v5 = vadd.f32 %v1002_v7, %v159_v60  ;;  %v231_v6 = vadd.f32 %v1002_v7, %v160_v61  ;;  %v232_v8 = vadd.f32 %v1002_v7, %v161_v62  ;;  %v233_v9 = vadd.f32 %v1002_v7, %v162_v63  ;;  %v942_v62 = vld [vmem:[%s1472_s0 + $0x60] sm:$0xff]  }
  0x12   :  { %v292_v10 = vmax.f32 %v228_v0, 0.0  ;;  %v293_v11 = vmax.f32 %v229_v2, 0.0  ;;  %v234_v12 = vadd.f32 %v1002_v7, %v163_v3  ;;  %v235_v13 = vadd.f32 %v1002_v7, %v164_v4  ;;  %v943_v4 = vld [vmem:[%s1472_s0 + $0x68] sm:$0xff]  }
  0x13   :  { %v294_v14 = vmax.f32 %v230_v5, 0.0  ;;  %v295_v15 = vmax.f32 %v231_v6, 0.0  ;;  %v296_v16 = vmax.f32 %v232_v8, 0.0  ;;  %v297_v17 = vmax.f32 %v233_v9, 0.0  ;;  %v944_v5 = vld [vmem:[%s1472_s0 + $0x70] sm:$0xff]  }
  0x14   :  { %v747_v19 = vpack.c.bf16 %v292_v10, %v292_v10  ;;  %v748_v20 = vpack.c.bf16 %v293_v11, %v293_v11  ;;  %v298_v21 = vmax.f32 %v234_v12, 0.0  ;;  %v299_v22 = vmax.f32 %v235_v13, 0.0  ;;  %v945_v11 = vld [vmem:[%s1472_s0 + $0x78] sm:$0xff]  }
  0x15   :  { %v749_v25 = vpack.c.bf16 %v294_v14, %v294_v14  ;;  %v750_v26 = vpack.c.bf16 %v295_v15, %v295_v15  ;;  %v751_v27 = vpack.c.bf16 %v296_v16, %v296_v16  ;;  %v752_v28 = vpack.c.bf16 %v297_v17, %v297_v17 }
  0x16   :  { %613 = vst.msk [vmem:[%s1475_s3 + $0x20] sm:$0xf] %vm604_vm0, %v747_v19  ;;  %614 = vst.msk [vmem:[%s1475_s3 + $0x24] sm:$0xf] %vm604_vm0, %v748_v20  ;;  %v753_v30 = vpack.c.bf16 %v298_v21, %v298_v21  ;;  %v754_v31 = vpack.c.bf16 %v299_v22, %v299_v22  ;;  %v841_v34 = vunpack.c.l.bf16 %v939_v23  ;;  %v842_v35 = vunpack.c.h.bf16 %v939_v23 }
  0x17   :  { %615 = vst.msk [vmem:[%s1475_s3 + $0x28] sm:$0xf] %vm604_vm0, %v749_v25  ;;  %616 = vst.msk [vmem:[%s1475_s3 + $0x2c] sm:$0xf] %vm604_vm0, %v750_v26  ;;  %v845_v36 = vunpack.c.l.bf16 %v940_v24  ;;  %v846_v37 = vunpack.c.h.bf16 %v940_v24  ;;  %v165_v38 = vmul.f32 %v837_v32, %v988_v1  ;;  %v166_v39 = vmul.f32 %v838_v33, %v988_v1 }
  0x18   :  { %617 = vst.msk [vmem:[%s1475_s3 + $0x30] sm:$0xf] %vm604_vm0, %v751_v27  ;;  %618 = vst.msk [vmem:[%s1475_s3 + $0x34] sm:$0xf] %vm604_vm0, %v752_v28  ;;  %v849_v40 = vunpack.c.l.bf16 %v941_v29  ;;  %v850_v41 = vunpack.c.h.bf16 %v941_v29  ;;  %v167_v42 = vmul.f32 %v841_v34, %v988_v1  ;;  %v168_v43 = vmul.f32 %v842_v35, %v988_v1 }
  0x19   :  { %619 = vst.msk [vmem:[%s1475_s3 + $0x38] sm:$0xf] %vm604_vm0, %v753_v30  ;;  %620 = vst.msk [vmem:[%s1475_s3 + $0x3c] sm:$0xf] %vm604_vm0, %v754_v31  ;;  %v169_v44 = vmul.f32 %v845_v36, %v988_v1  ;;  %v170_v45 = vmul.f32 %v846_v37, %v988_v1  ;;  %v236_v46 = vadd.f32 %v1002_v7, %v165_v38  ;;  %v853_v14 = vunpack.c.l.bf16 %v942_v62 }
  0x1a   :  { %v237_v47 = vadd.f32 %v1002_v7, %v166_v39  ;;  %v171_v48 = vmul.f32 %v849_v40, %v988_v1  ;;  %v172_v49 = vmul.f32 %v850_v41, %v988_v1  ;;  %v238_v50 = vadd.f32 %v1002_v7, %v167_v42 }
  0x1b   :  { %v239_v51 = vadd.f32 %v1002_v7, %v168_v43  ;;  %v240_v52 = vadd.f32 %v1002_v7, %v169_v44  ;;  %v241_v53 = vadd.f32 %v1002_v7, %v170_v45  ;;  %v300_v54 = vmax.f32 %v236_v46, 0.0  ;;  %v946_v44 = vld [vmem:[%s1472_s0 + $0x80] sm:$0xff]  }
  0x1c   :  { %v301_v55 = vmax.f32 %v237_v47, 0.0  ;;  %v242_v56 = vadd.f32 %v1002_v7, %v171_v48  ;;  %v243_v57 = vadd.f32 %v1002_v7, %v172_v49  ;;  %v302_v58 = vmax.f32 %v238_v50, 0.0  ;;  %v947_v49 = vld [vmem:[%s1472_s0 + $0x88] sm:$0xff]   ;;  %v948_v50 = vld [vmem:[%s1472_s0 + $0x90] sm:$0xff]  }
  0x1d   :  { %v303_v59 = vmax.f32 %v239_v51, 0.0  ;;  %v304_v60 = vmax.f32 %v240_v52, 0.0  ;;  %v305_v61 = vmax.f32 %v241_v53, 0.0  ;;  %v755_v63 = vpack.c.bf16 %v300_v54, %v300_v54 }
  0x1e   :  { %v756_v0 = vpack.c.bf16 %v301_v55, %v301_v55  ;;  %v306_v2 = vmax.f32 %v242_v56, 0.0  ;;  %v307_v3 = vmax.f32 %v243_v57, 0.0  ;;  %v757_v6 = vpack.c.bf16 %v302_v58, %v302_v58  ;;  %v949_v55 = vld [vmem:[%s1472_s0 + $0x98] sm:$0xff]  }
  0x1f   :  { %v758_v8 = vpack.c.bf16 %v303_v59, %v303_v59  ;;  %v759_v9 = vpack.c.bf16 %v304_v60, %v304_v60  ;;  %v760_v10 = vpack.c.bf16 %v305_v61, %v305_v61  ;;  %621 = vst.msk [vmem:[%s1475_s3 + $0x40] sm:$0xf] %vm604_vm0, %v755_v63  ;;  %v854_v15 = vunpack.c.h.bf16 %v942_v62 }
  0x20   :  { %622 = vst.msk [vmem:[%s1475_s3 + $0x44] sm:$0xf] %vm604_vm0, %v756_v0  ;;  %v761_v12 = vpack.c.bf16 %v306_v2, %v306_v2  ;;  %v762_v13 = vpack.c.bf16 %v307_v3, %v307_v3  ;;  %623 = vst.msk [vmem:[%s1475_s3 + $0x48] sm:$0xf] %vm604_vm0, %v757_v6  ;;  %v857_v16 = vunpack.c.l.bf16 %v943_v4  ;;  %v858_v17 = vunpack.c.h.bf16 %v943_v4 }
  0x21   :  { %624 = vst.msk [vmem:[%s1475_s3 + $0x4c] sm:$0xf] %vm604_vm0, %v758_v8  ;;  %625 = vst.msk [vmem:[%s1475_s3 + $0x50] sm:$0xf] %vm604_vm0, %v759_v9  ;;  %v861_v18 = vunpack.c.l.bf16 %v944_v5  ;;  %v862_v19 = vunpack.c.h.bf16 %v944_v5  ;;  %v173_v20 = vmul.f32 %v853_v14, %v988_v1  ;;  %v174_v21 = vmul.f32 %v854_v15, %v988_v1 }
  0x22   :  { %626 = vst.msk [vmem:[%s1475_s3 + $0x54] sm:$0xf] %vm604_vm0, %v760_v10  ;;  %627 = vst.msk [vmem:[%s1475_s3 + $0x58] sm:$0xf] %vm604_vm0, %v761_v12  ;;  %v865_v22 = vunpack.c.l.bf16 %v945_v11  ;;  %v866_v23 = vunpack.c.h.bf16 %v945_v11  ;;  %v175_v24 = vmul.f32 %v857_v16, %v988_v1  ;;  %v176_v25 = vmul.f32 %v858_v17, %v988_v1 }
  0x23   :  { %628 = vst.msk [vmem:[%s1475_s3 + $0x5c] sm:$0xf] %vm604_vm0, %v762_v13  ;;  %v177_v26 = vmul.f32 %v861_v18, %v988_v1  ;;  %v178_v27 = vmul.f32 %v862_v19, %v988_v1  ;;  %v244_v28 = vadd.f32 %v1002_v7, %v173_v20  ;;  %v245_v29 = vadd.f32 %v1002_v7, %v174_v21 }
  0x24   :  { %v179_v30 = vmul.f32 %v865_v22, %v988_v1  ;;  %v180_v31 = vmul.f32 %v866_v23, %v988_v1  ;;  %v246_v32 = vadd.f32 %v1002_v7, %v175_v24  ;;  %v247_v33 = vadd.f32 %v1002_v7, %v176_v25 }
  0x25   :  { %v248_v34 = vadd.f32 %v1002_v7, %v177_v26  ;;  %v249_v35 = vadd.f32 %v1002_v7, %v178_v27  ;;  %v308_v36 = vmax.f32 %v244_v28, 0.0  ;;  %v309_v37 = vmax.f32 %v245_v29, 0.0  ;;  %v950_v26 = vld [vmem:[%s1472_s0 + $0xa0] sm:$0xff]  }
  0x26   :  { %v250_v38 = vadd.f32 %v1002_v7, %v179_v30  ;;  %v251_v39 = vadd.f32 %v1002_v7, %v180_v31  ;;  %v310_v40 = vmax.f32 %v246_v32, 0.0  ;;  %v311_v41 = vmax.f32 %v247_v33, 0.0  ;;  %v951_v31 = vld [vmem:[%s1472_s0 + $0xa8] sm:$0xff]   ;;  %v952_v32 = vld [vmem:[%s1472_s0 + $0xb0] sm:$0xff]  }
  0x27   :  { %v312_v42 = vmax.f32 %v248_v34, 0.0  ;;  %v313_v43 = vmax.f32 %v249_v35, 0.0  ;;  %v763_v45 = vpack.c.bf16 %v308_v36, %v308_v36  ;;  %v764_v46 = vpack.c.bf16 %v309_v37, %v309_v37  ;;  %v953_v37 = vld [vmem:[%s1472_s0 + $0xb8] sm:$0xff]  }
  0x28   :  { %v314_v47 = vmax.f32 %v250_v38, 0.0  ;;  %v315_v48 = vmax.f32 %v251_v39, 0.0  ;;  %v765_v51 = vpack.c.bf16 %v310_v40, %v310_v40  ;;  %v766_v52 = vpack.c.bf16 %v311_v41, %v311_v41 }
  0x29   :  { %v767_v53 = vpack.c.bf16 %v312_v42, %v312_v42  ;;  %v768_v54 = vpack.c.bf16 %v313_v43, %v313_v43  ;;  %629 = vst.msk [vmem:[%s1475_s3 + $0x60] sm:$0xf] %vm604_vm0, %v763_v45  ;;  %630 = vst.msk [vmem:[%s1475_s3 + $0x64] sm:$0xf] %vm604_vm0, %v764_v46  ;;  %v869_v58 = vunpack.c.l.bf16 %v946_v44  ;;  %v870_v59 = vunpack.c.h.bf16 %v946_v44 }
  0x2a   :  { %v769_v56 = vpack.c.bf16 %v314_v47, %v314_v47  ;;  %v770_v57 = vpack.c.bf16 %v315_v48, %v315_v48  ;;  %631 = vst.msk [vmem:[%s1475_s3 + $0x68] sm:$0xf] %vm604_vm0, %v765_v51  ;;  %632 = vst.msk [vmem:[%s1475_s3 + $0x6c] sm:$0xf] %vm604_vm0, %v766_v52  ;;  %v873_v60 = vunpack.c.l.bf16 %v947_v49  ;;  %v874_v61 = vunpack.c.h.bf16 %v947_v49 }
  0x2b   :  { %633 = vst.msk [vmem:[%s1475_s3 + $0x70] sm:$0xf] %vm604_vm0, %v767_v53  ;;  %634 = vst.msk [vmem:[%s1475_s3 + $0x74] sm:$0xf] %vm604_vm0, %v768_v54  ;;  %v877_v62 = vunpack.c.l.bf16 %v948_v50  ;;  %v878_v63 = vunpack.c.h.bf16 %v948_v50  ;;  %v181_v0 = vmul.f32 %v869_v58, %v988_v1  ;;  %v182_v2 = vmul.f32 %v870_v59, %v988_v1 }
  0x2c   :  { %635 = vst.msk [vmem:[%s1475_s3 + $0x78] sm:$0xf] %vm604_vm0, %v769_v56  ;;  %636 = vst.msk [vmem:[%s1475_s3 + $0x7c] sm:$0xf] %vm604_vm0, %v770_v57  ;;  %v881_v3 = vunpack.c.l.bf16 %v949_v55  ;;  %v882_v4 = vunpack.c.h.bf16 %v949_v55  ;;  %v183_v5 = vmul.f32 %v873_v60, %v988_v1  ;;  %v184_v6 = vmul.f32 %v874_v61, %v988_v1 }
  0x2d   :  { %v185_v8 = vmul.f32 %v877_v62, %v988_v1  ;;  %v186_v9 = vmul.f32 %v878_v63, %v988_v1  ;;  %v252_v10 = vadd.f32 %v1002_v7, %v181_v0  ;;  %v253_v11 = vadd.f32 %v1002_v7, %v182_v2 }
  0x2e   :  { %v187_v12 = vmul.f32 %v881_v3, %v988_v1  ;;  %v188_v13 = vmul.f32 %v882_v4, %v988_v1  ;;  %v254_v14 = vadd.f32 %v1002_v7, %v183_v5  ;;  %v255_v15 = vadd.f32 %v1002_v7, %v184_v6 }
  0x2f   :  { %v256_v16 = vadd.f32 %v1002_v7, %v185_v8  ;;  %v257_v17 = vadd.f32 %v1002_v7, %v186_v9  ;;  %v316_v18 = vmax.f32 %v252_v10, 0.0  ;;  %v317_v19 = vmax.f32 %v253_v11, 0.0  ;;  %v954_v8 = vld [vmem:[%s1472_s0 + $0xc0] sm:$0xff]  }
  0x30   :  { %v258_v20 = vadd.f32 %v1002_v7, %v187_v12  ;;  %v259_v21 = vadd.f32 %v1002_v7, %v188_v13  ;;  %v318_v22 = vmax.f32 %v254_v14, 0.0  ;;  %v319_v23 = vmax.f32 %v255_v15, 0.0  ;;  %v955_v13 = vld [vmem:[%s1472_s0 + $0xc8] sm:$0xff]   ;;  %v956_v14 = vld [vmem:[%s1472_s0 + $0xd0] sm:$0xff]  }
  0x31   :  { %v320_v24 = vmax.f32 %v256_v16, 0.0  ;;  %v321_v25 = vmax.f32 %v257_v17, 0.0  ;;  %v771_v27 = vpack.c.bf16 %v316_v18, %v316_v18  ;;  %v772_v28 = vpack.c.bf16 %v317_v19, %v317_v19  ;;  %v957_v19 = vld [vmem:[%s1472_s0 + $0xd8] sm:$0xff]  }
  0x32   :  { %v322_v29 = vmax.f32 %v258_v20, 0.0  ;;  %v323_v30 = vmax.f32 %v259_v21, 0.0  ;;  %v773_v33 = vpack.c.bf16 %v318_v22, %v318_v22  ;;  %v774_v34 = vpack.c.bf16 %v319_v23, %v319_v23 }
  0x33   :  { %v775_v35 = vpack.c.bf16 %v320_v24, %v320_v24  ;;  %v776_v36 = vpack.c.bf16 %v321_v25, %v321_v25  ;;  %637 = vst.msk [vmem:[%s1475_s3 + $0x80] sm:$0xf] %vm604_vm0, %v771_v27  ;;  %638 = vst.msk [vmem:[%s1475_s3 + $0x84] sm:$0xf] %vm604_vm0, %v772_v28  ;;  %v885_v40 = vunpack.c.l.bf16 %v950_v26  ;;  %v886_v41 = vunpack.c.h.bf16 %v950_v26 }
  0x34   :  { %v777_v38 = vpack.c.bf16 %v322_v29, %v322_v29  ;;  %v778_v39 = vpack.c.bf16 %v323_v30, %v323_v30  ;;  %639 = vst.msk [vmem:[%s1475_s3 + $0x88] sm:$0xf] %vm604_vm0, %v773_v33  ;;  %640 = vst.msk [vmem:[%s1475_s3 + $0x8c] sm:$0xf] %vm604_vm0, %v774_v34  ;;  %v889_v42 = vunpack.c.l.bf16 %v951_v31  ;;  %v890_v43 = vunpack.c.h.bf16 %v951_v31 }
  0x35   :  { %641 = vst.msk [vmem:[%s1475_s3 + $0x90] sm:$0xf] %vm604_vm0, %v775_v35  ;;  %642 = vst.msk [vmem:[%s1475_s3 + $0x94] sm:$0xf] %vm604_vm0, %v776_v36  ;;  %v893_v44 = vunpack.c.l.bf16 %v952_v32  ;;  %v894_v45 = vunpack.c.h.bf16 %v952_v32  ;;  %v189_v46 = vmul.f32 %v885_v40, %v988_v1  ;;  %v190_v47 = vmul.f32 %v886_v41, %v988_v1 }
  0x36   :  { %643 = vst.msk [vmem:[%s1475_s3 + $0x98] sm:$0xf] %vm604_vm0, %v777_v38  ;;  %644 = vst.msk [vmem:[%s1475_s3 + $0x9c] sm:$0xf] %vm604_vm0, %v778_v39  ;;  %v897_v48 = vunpack.c.l.bf16 %v953_v37  ;;  %v898_v49 = vunpack.c.h.bf16 %v953_v37  ;;  %v191_v50 = vmul.f32 %v889_v42, %v988_v1  ;;  %v192_v51 = vmul.f32 %v890_v43, %v988_v1 }
  0x37   :  { %v193_v52 = vmul.f32 %v893_v44, %v988_v1  ;;  %v194_v53 = vmul.f32 %v894_v45, %v988_v1  ;;  %v260_v54 = vadd.f32 %v1002_v7, %v189_v46  ;;  %v261_v55 = vadd.f32 %v1002_v7, %v190_v47 }
  0x38   :  { %v195_v56 = vmul.f32 %v897_v48, %v988_v1  ;;  %v196_v57 = vmul.f32 %v898_v49, %v988_v1  ;;  %v262_v58 = vadd.f32 %v1002_v7, %v191_v50  ;;  %v263_v59 = vadd.f32 %v1002_v7, %v192_v51 }
  0x39   :  { %v264_v60 = vadd.f32 %v1002_v7, %v193_v52  ;;  %v265_v61 = vadd.f32 %v1002_v7, %v194_v53  ;;  %v324_v62 = vmax.f32 %v260_v54, 0.0  ;;  %v325_v63 = vmax.f32 %v261_v55, 0.0  ;;  %v958_v52 = vld [vmem:[%s1472_s0 + $0xe0] sm:$0xff]  }
  0x3a   :  { %v266_v0 = vadd.f32 %v1002_v7, %v195_v56  ;;  %v267_v2 = vadd.f32 %v1002_v7, %v196_v57  ;;  %v326_v3 = vmax.f32 %v262_v58, 0.0  ;;  %v327_v4 = vmax.f32 %v263_v59, 0.0  ;;  %v959_v57 = vld [vmem:[%s1472_s0 + $0xe8] sm:$0xff]   ;;  %v960_v58 = vld [vmem:[%s1472_s0 + $0xf0] sm:$0xff]  }
  0x3b   :  { %v328_v5 = vmax.f32 %v264_v60, 0.0  ;;  %v329_v6 = vmax.f32 %v265_v61, 0.0  ;;  %v779_v9 = vpack.c.bf16 %v324_v62, %v324_v62  ;;  %v780_v10 = vpack.c.bf16 %v325_v63, %v325_v63  ;;  %v961_v63 = vld [vmem:[%s1472_s0 + $0xf8] sm:$0xff]  }
  0x3c   :  { %v330_v11 = vmax.f32 %v266_v0, 0.0  ;;  %v331_v12 = vmax.f32 %v267_v2, 0.0  ;;  %v781_v15 = vpack.c.bf16 %v326_v3, %v326_v3  ;;  %v782_v16 = vpack.c.bf16 %v327_v4, %v327_v4 }
  0x3d   :  { %v783_v17 = vpack.c.bf16 %v328_v5, %v328_v5  ;;  %v784_v18 = vpack.c.bf16 %v329_v6, %v329_v6  ;;  %645 = vst.msk [vmem:[%s1475_s3 + $0xa0] sm:$0xf] %vm604_vm0, %v779_v9  ;;  %646 = vst.msk [vmem:[%s1475_s3 + $0xa4] sm:$0xf] %vm604_vm0, %v780_v10  ;;  %v901_v22 = vunpack.c.l.bf16 %v954_v8  ;;  %v902_v23 = vunpack.c.h.bf16 %v954_v8 }
  0x3e   :  { %v785_v20 = vpack.c.bf16 %v330_v11, %v330_v11  ;;  %v786_v21 = vpack.c.bf16 %v331_v12, %v331_v12  ;;  %647 = vst.msk [vmem:[%s1475_s3 + $0xa8] sm:$0xf] %vm604_vm0, %v781_v15  ;;  %648 = vst.msk [vmem:[%s1475_s3 + $0xac] sm:$0xf] %vm604_vm0, %v782_v16  ;;  %v905_v24 = vunpack.c.l.bf16 %v955_v13  ;;  %v906_v25 = vunpack.c.h.bf16 %v955_v13 }
  0x3f   :  { %649 = vst.msk [vmem:[%s1475_s3 + $0xb0] sm:$0xf] %vm604_vm0, %v783_v17  ;;  %650 = vst.msk [vmem:[%s1475_s3 + $0xb4] sm:$0xf] %vm604_vm0, %v784_v18  ;;  %v909_v26 = vunpack.c.l.bf16 %v956_v14  ;;  %v910_v27 = vunpack.c.h.bf16 %v956_v14  ;;  %v197_v28 = vmul.f32 %v901_v22, %v988_v1  ;;  %v198_v29 = vmul.f32 %v902_v23, %v988_v1 }
  0x40   :  { %651 = vst.msk [vmem:[%s1475_s3 + $0xb8] sm:$0xf] %vm604_vm0, %v785_v20  ;;  %652 = vst.msk [vmem:[%s1475_s3 + $0xbc] sm:$0xf] %vm604_vm0, %v786_v21  ;;  %v913_v30 = vunpack.c.l.bf16 %v957_v19  ;;  %v914_v31 = vunpack.c.h.bf16 %v957_v19  ;;  %v199_v32 = vmul.f32 %v905_v24, %v988_v1  ;;  %v200_v33 = vmul.f32 %v906_v25, %v988_v1 }
  0x41   :  { %v201_v34 = vmul.f32 %v909_v26, %v988_v1  ;;  %v202_v35 = vmul.f32 %v910_v27, %v988_v1  ;;  %v268_v36 = vadd.f32 %v1002_v7, %v197_v28  ;;  %v269_v37 = vadd.f32 %v1002_v7, %v198_v29 }
  0x42   :  { %v203_v38 = vmul.f32 %v913_v30, %v988_v1  ;;  %v204_v39 = vmul.f32 %v914_v31, %v988_v1  ;;  %v270_v40 = vadd.f32 %v1002_v7, %v199_v32  ;;  %v271_v41 = vadd.f32 %v1002_v7, %v200_v33 }
  0x43   :  { %v272_v42 = vadd.f32 %v1002_v7, %v201_v34  ;;  %v273_v43 = vadd.f32 %v1002_v7, %v202_v35  ;;  %v332_v44 = vmax.f32 %v268_v36, 0.0  ;;  %v333_v45 = vmax.f32 %v269_v37, 0.0 }
  0x44   :  { %v274_v46 = vadd.f32 %v1002_v7, %v203_v38  ;;  %v275_v47 = vadd.f32 %v1002_v7, %v204_v39  ;;  %v334_v48 = vmax.f32 %v270_v40, 0.0  ;;  %v335_v49 = vmax.f32 %v271_v41, 0.0 }
  0x45   :  { %v336_v50 = vmax.f32 %v272_v42, 0.0  ;;  %v337_v51 = vmax.f32 %v273_v43, 0.0  ;;  %v787_v53 = vpack.c.bf16 %v332_v44, %v332_v44  ;;  %v788_v54 = vpack.c.bf16 %v333_v45, %v333_v45 }
  0x46   :  { %v338_v55 = vmax.f32 %v274_v46, 0.0  ;;  %v339_v56 = vmax.f32 %v275_v47, 0.0  ;;  %v789_v59 = vpack.c.bf16 %v334_v48, %v334_v48  ;;  %v790_v60 = vpack.c.bf16 %v335_v49, %v335_v49 }
  0x47   :  { %v791_v61 = vpack.c.bf16 %v336_v50, %v336_v50  ;;  %v792_v62 = vpack.c.bf16 %v337_v51, %v337_v51  ;;  %653 = vst.msk [vmem:[%s1475_s3 + $0xc0] sm:$0xf] %vm604_vm0, %v787_v53  ;;  %654 = vst.msk [vmem:[%s1475_s3 + $0xc4] sm:$0xf] %vm604_vm0, %v788_v54  ;;  %v917_v3 = vunpack.c.l.bf16 %v958_v52  ;;  %v918_v4 = vunpack.c.h.bf16 %v958_v52 }
  0x48   :  { %v793_v0 = vpack.c.bf16 %v338_v55, %v338_v55  ;;  %v794_v2 = vpack.c.bf16 %v339_v56, %v339_v56  ;;  %655 = vst.msk [vmem:[%s1475_s3 + $0xc8] sm:$0xf] %vm604_vm0, %v789_v59  ;;  %656 = vst.msk [vmem:[%s1475_s3 + $0xcc] sm:$0xf] %vm604_vm0, %v790_v60  ;;  %v921_v5 = vunpack.c.l.bf16 %v959_v57  ;;  %v922_v6 = vunpack.c.h.bf16 %v959_v57 }
  0x49   :  { %657 = vst.msk [vmem:[%s1475_s3 + $0xd0] sm:$0xf] %vm604_vm0, %v791_v61  ;;  %658 = vst.msk [vmem:[%s1475_s3 + $0xd4] sm:$0xf] %vm604_vm0, %v792_v62  ;;  %v925_v8 = vunpack.c.l.bf16 %v960_v58  ;;  %v926_v9 = vunpack.c.h.bf16 %v960_v58  ;;  %v205_v10 = vmul.f32 %v917_v3, %v988_v1  ;;  %v206_v11 = vmul.f32 %v918_v4, %v988_v1 }
  0x4a   :  { %659 = vst.msk [vmem:[%s1475_s3 + $0xd8] sm:$0xf] %vm604_vm0, %v793_v0  ;;  %660 = vst.msk [vmem:[%s1475_s3 + $0xdc] sm:$0xf] %vm604_vm0, %v794_v2  ;;  %v929_v12 = vunpack.c.l.bf16 %v961_v63  ;;  %v930_v13 = vunpack.c.h.bf16 %v961_v63  ;;  %v207_v14 = vmul.f32 %v921_v5, %v988_v1  ;;  %v208_v15 = vmul.f32 %v922_v6, %v988_v1 }
  0x4b   :  { %v209_v16 = vmul.f32 %v925_v8, %v988_v1  ;;  %v210_v17 = vmul.f32 %v926_v9, %v988_v1  ;;  %v276_v18 = vadd.f32 %v1002_v7, %v205_v10  ;;  %v277_v19 = vadd.f32 %v1002_v7, %v206_v11 }
  0x4c   :  { %v211_v20 = vmul.f32 %v929_v12, %v988_v1  ;;  %v212_v21 = vmul.f32 %v930_v13, %v988_v1  ;;  %v278_v22 = vadd.f32 %v1002_v7, %v207_v14  ;;  %v279_v23 = vadd.f32 %v1002_v7, %v208_v15 }
  0x4d   :  { %v280_v24 = vadd.f32 %v1002_v7, %v209_v16  ;;  %v281_v25 = vadd.f32 %v1002_v7, %v210_v17  ;;  %v340_v26 = vmax.f32 %v276_v18, 0.0  ;;  %v341_v27 = vmax.f32 %v277_v19, 0.0 }
  0x4e   :  { %v282_v28 = vadd.f32 %v1002_v7, %v211_v20  ;;  %v283_v29 = vadd.f32 %v1002_v7, %v212_v21  ;;  %v342_v30 = vmax.f32 %v278_v22, 0.0  ;;  %v343_v31 = vmax.f32 %v279_v23, 0.0 }
  0x4f   :  { %v344_v32 = vmax.f32 %v280_v24, 0.0  ;;  %v345_v33 = vmax.f32 %v281_v25, 0.0  ;;  %v795_v34 = vpack.c.bf16 %v340_v26, %v340_v26  ;;  %v796_v1 = vpack.c.bf16 %v341_v27, %v341_v27 }
  0x50   :  { %v346_v35 = vmax.f32 %v282_v28, 0.0  ;;  %v347_v36 = vmax.f32 %v283_v29, 0.0  ;;  %v797_v37 = vpack.c.bf16 %v342_v30, %v342_v30  ;;  %v798_v38 = vpack.c.bf16 %v343_v31, %v343_v31 }
  0x51   :  { %v799_v39 = vpack.c.bf16 %v344_v32, %v344_v32  ;;  %v800_v40 = vpack.c.bf16 %v345_v33, %v345_v33  ;;  %661 = vst.msk [vmem:[%s1475_s3 + $0xe0] sm:$0xf] %vm604_vm0, %v795_v34  ;;  %662 = vst.msk [vmem:[%s1475_s3 + $0xe4] sm:$0xf] %vm604_vm0, %v796_v1 }
  0x52   :  { %v801_v7 = vpack.c.bf16 %v346_v35, %v346_v35  ;;  %v802_v41 = vpack.c.bf16 %v347_v36, %v347_v36  ;;  %663 = vst.msk [vmem:[%s1475_s3 + $0xe8] sm:$0xf] %vm604_vm0, %v797_v37  ;;  %664 = vst.msk [vmem:[%s1475_s3 + $0xec] sm:$0xf] %vm604_vm0, %v798_v38 }
  0x53   :  { %665 = vst.msk [vmem:[%s1475_s3 + $0xf0] sm:$0xf] %vm604_vm0, %v799_v39  ;;  %666 = vst.msk [vmem:[%s1475_s3 + $0xf4] sm:$0xf] %vm604_vm0, %v800_v40 }
  0x54   :  { %667 = vst.msk [vmem:[%s1475_s3 + $0xf8] sm:$0xf] %vm604_vm0, %v801_v7  ;;  %668 = vst.msk [vmem:[%s1475_s3 + $0xfc] sm:$0xf] %vm604_vm0, %v802_v41 }

// kernel: resnet_generator_forward.37
= control target key start
LH: loop header
LB: loop body
LE: loop exit
PB: predicated region body
PF: predicated region fallthrough
CT: control target
= control target key end

     0   :  { %s705_s1 = inlined_call_operand.vmem [shape: bf16[128,128], index: 1, kind: input, shape index: {}]   ;;  %s706_s0 = inlined_call_operand.vmem [shape: bf16[128,128], index: 0, kind: input, shape index: {}]   ;;  %s707_s2 = inlined_call_operand.vmem [shape: f32[1,128], index: 2, kind: input, shape index: {}]   ;;  %s708_s3 = inlined_call_operand.vmem [shape: bf16[128,128], index: 3, kind: output, shape index: {}]  }
   0x1   :  { %v594_v0 = vld [vmem:[%s705_s1] sm:$0xff]   ;;  %v595_v1 = vld [vmem:[%s705_s1 + $0x8] sm:$0xff]   ;;  %v596_v2 = vld [vmem:[%s705_s1 + $0x10] sm:$0xff]  }
   0x2   :  { %546 = vmatprep.subr.bf16.mxu0 %v594_v0  ;;  %578 = vmatprep.subr.bf16.mxu1 %v594_v0  ;;  %v597_v3 = vld [vmem:[%s705_s1 + $0x18] sm:$0xff]   ;;  %v602_v4 = vld [vmem:[%s706_s0] sm:$0xff]   ;;  %v599_v7 = vld [vmem:[%s705_s1 + $0x28] sm:$0xff]  }
   0x3   :  { %547 = vmatpush3.bf16.msra.mxu0 %v594_v0  ;;  %586 = vmatpush3.bf16.msra.mxu1 %v594_v0  ;;  %v603_v5 = vld [vmem:[%s706_s0 + $0x20] sm:$0xff]   ;;  %v600_v8 = vld [vmem:[%s705_s1 + $0x30] sm:$0xff]   ;;  %v601_v9 = vld [vmem:[%s705_s1 + $0x38] sm:$0xff]  }
   0x4   :  { %548 = vmatprep.subr.bf16.mxu0 %v595_v1  ;;  %579 = vmatprep.subr.bf16.mxu1 %v595_v1  ;;  %v598_v6 = vld [vmem:[%s705_s1 + $0x20] sm:$0xff]   ;;  %v604_v10 = vld [vmem:[%s706_s0 + $0x8] sm:$0xff]   ;;  %v606_v12 = vld [vmem:[%s706_s0 + $0x10] sm:$0xff]  }
   0x5   :  { %562 = vmatprep.mubr.bf16.mxu0 %v602_v4  ;;  %570 = vmatprep.mubr.bf16.mxu1 %v603_v5  ;;  %v605_v11 = vld [vmem:[%s706_s0 + $0x28] sm:$0xff]   ;;  %v607_v13 = vld [vmem:[%s706_s0 + $0x30] sm:$0xff]   ;;  %v608_v14 = vld [vmem:[%s706_s0 + $0x18] sm:$0xff]  }
   0x6   :  { %v609_v15 = vld [vmem:[%s706_s0 + $0x38] sm:$0xff]   ;;  %v450_v17 = vld [vmem:[%s707_s2] ss:$0 sm:$0xff] }
   0x7   :  { %549 = vmatpush3.bf16.msra.mxu0 %v595_v1  ;;  %587 = vmatpush3.bf16.msra.mxu1 %v595_v1 }
   0x8   :  { %550 = vmatprep.subr.bf16.mxu0 %v596_v2  ;;  %580 = vmatprep.subr.bf16.mxu1 %v596_v2 }
   0xb   :  { %551 = vmatpush3.bf16.msra.mxu0 %v596_v2  ;;  %588 = vmatpush3.bf16.msra.mxu1 %v596_v2 }
   0xc   :  { %552 = vmatprep.subr.bf16.mxu0 %v597_v3  ;;  %581 = vmatprep.subr.bf16.mxu1 %v597_v3 }
   0xf   :  { %553 = vmatpush3.bf16.msra.mxu0 %v597_v3  ;;  %589 = vmatpush3.bf16.msra.mxu1 %v597_v3 }
  0x10   :  { %554 = vmatprep.subr.bf16.mxu0 %v598_v6  ;;  %582 = vmatprep.subr.bf16.mxu1 %v598_v6 }
  0x13   :  { %555 = vmatpush3.bf16.msra.mxu0 %v598_v6  ;;  %590 = vmatpush3.bf16.msra.mxu1 %v598_v6 }
  0x14   :  { %556 = vmatprep.subr.bf16.mxu0 %v599_v7  ;;  %583 = vmatprep.subr.bf16.mxu1 %v599_v7 }
  0x17   :  { %557 = vmatpush3.bf16.msra.mxu0 %v599_v7  ;;  %591 = vmatpush3.bf16.msra.mxu1 %v599_v7 }
  0x18   :  { %558 = vmatprep.subr.bf16.mxu0 %v600_v8  ;;  %584 = vmatprep.subr.bf16.mxu1 %v600_v8 }
  0x1b   :  { %559 = vmatpush3.bf16.msra.mxu0 %v600_v8  ;;  %592 = vmatpush3.bf16.msra.mxu1 %v600_v8 }
  0x1c   :  { %560 = vmatprep.subr.bf16.mxu0 %v601_v9  ;;  %585 = vmatprep.subr.bf16.mxu1 %v601_v9 }
  0x1f   :  { %561 = vmatpush3.bf16.msra.mxu0 %v601_v9  ;;  %593 = vmatpush3.bf16.msra.mxu1 %v601_v9 }
  0x22   :  { %563 = vmatmul.mubr.bf16.vlgmr.msra.gmra.mrb[0].mxu0 %v604_v10  ;;  %571 = vmatmul.mubr.bf16.vlgmr.msra.gmra.mrb[0].mxu1 %v605_v11 }
  0x23   :  { %566 = vmatprep.mubr.bf16.mxu0 %v606_v12  ;;  %574 = vmatprep.mubr.bf16.mxu1 %v607_v13 }
  0x2a   :  { %567 = vmatmul.mubr.bf16.gmra.mrb[4].mxu0 %v608_v14  ;;  %575 = vmatmul.mubr.bf16.gmra.mrb[4].mxu1 %v609_v15 }
  0xf5   :  { %v564_v16 = vpop.f32.mrb[0].mxu0  ;;  %v572_v18 = vpop.f32.mrb[0].mxu1 }
  0xf6   :  { %v213_v19 = vpop.f32.mrb[1].mxu0  ;;  %v245_v20 = vpop.f32.mrb[1].mxu1  ;;  %v336_v23 = vadd.f32 %v564_v16, %v450_v17  ;;  %v344_v24 = vadd.f32 %v572_v18, %v450_v17 }
  0xf7   :  { %v565_v21 = vpop.f32.mrb[2].mxu0  ;;  %v573_v22 = vpop.f32.mrb[2].mxu1  ;;  %v334_v29 = vadd.f32 %v450_v17, %v213_v19  ;;  %v342_v30 = vadd.f32 %v450_v17, %v245_v20 }
  0xf8   :  { %v337_v25 = vadd.f32 %v565_v21, %v450_v17  ;;  %v345_v26 = vadd.f32 %v573_v22, %v450_v17  ;;  %v216_v27 = vpop.f32.mrb[3].mxu0  ;;  %v248_v28 = vpop.f32.mrb[3].mxu1 }
  0xf9   :  { %v335_v31 = vadd.f32 %v450_v17, %v216_v27  ;;  %v343_v32 = vadd.f32 %v450_v17, %v248_v28 }
  0xfa   :  { %v491_v33 = vpack.c.bf16 %v337_v25, %v336_v23  ;;  %v511_v34 = vpack.c.bf16 %v345_v26, %v344_v24 }
  0xfb   :  { %v486_v35 = vpack.c.bf16 %v335_v31, %v334_v29  ;;  %v506_v36 = vpack.c.bf16 %v343_v32, %v342_v30 }
  0xfc   :  { %523 = vst [vmem:[%s708_s3 + $0x8] sm:$0xff] %v491_v33   ;;  %527 = vst [vmem:[%s708_s3 + $0x28] sm:$0xff] %v511_v34  }
  0xfd   :  { %487 = vst [vmem:[%s708_s3] sm:$0xff] %v486_v35   ;;  %526 = vst [vmem:[%s708_s3 + $0x20] sm:$0xff] %v506_v36   ;;  %v568_v37 = vpop.f32.mrb[4].mxu0  ;;  %v576_v38 = vpop.f32.mrb[4].mxu1 }
  0xfe   :  { %v229_v39 = vpop.f32.mrb[5].mxu0  ;;  %v261_v40 = vpop.f32.mrb[5].mxu1  ;;  %v340_v43 = vadd.f32 %v568_v37, %v450_v17  ;;  %v348_v44 = vadd.f32 %v576_v38, %v450_v17 }
  0xff   :  { %v569_v41 = vpop.f32.mrb[6].mxu0  ;;  %v577_v42 = vpop.f32.mrb[6].mxu1  ;;  %v338_v49 = vadd.f32 %v450_v17, %v229_v39  ;;  %v346_v50 = vadd.f32 %v450_v17, %v261_v40 }
 0x100   :  { %v341_v45 = vadd.f32 %v569_v41, %v450_v17  ;;  %v349_v46 = vadd.f32 %v577_v42, %v450_v17  ;;  %v232_v47 = vpop.f32.mrb[7].mxu0  ;;  %v264_v48 = vpop.f32.mrb[7].mxu1 }
 0x101   :  { %v339_v51 = vadd.f32 %v450_v17, %v232_v47  ;;  %v347_v52 = vadd.f32 %v450_v17, %v264_v48 }
 0x102   :  { %v501_v53 = vpack.c.bf16 %v341_v45, %v340_v43  ;;  %v521_v54 = vpack.c.bf16 %v349_v46, %v348_v44 }
 0x103   :  { %v496_v55 = vpack.c.bf16 %v339_v51, %v338_v49  ;;  %v516_v56 = vpack.c.bf16 %v347_v52, %v346_v50 }
 0x104   :  { %525 = vst [vmem:[%s708_s3 + $0x18] sm:$0xff] %v501_v53   ;;  %529 = vst [vmem:[%s708_s3 + $0x38] sm:$0xff] %v521_v54  }
 0x105   :  { %524 = vst [vmem:[%s708_s3 + $0x10] sm:$0xff] %v496_v55   ;;  %528 = vst [vmem:[%s708_s3 + $0x30] sm:$0xff] %v516_v56  }

// kernel: resnet_generator_forward.38
= control target key start
LH: loop header
LB: loop body
LE: loop exit
PB: predicated region body
PF: predicated region fallthrough
CT: control target
= control target key end

     0   :  { %v167_v0 = vmov 0.0   ;;  %s213_s0 = inlined_call_operand.vmem [shape: bf16[128,128], index: 0, kind: input, shape index: {}]   ;;  %s214_s1 = inlined_call_operand.vmem [shape: f32[1,128], index: 1, kind: output, shape index: {0}]   ;;  %s215_s2 = inlined_call_operand.vmem [shape: f32[1,128], index: 2, kind: output, shape index: {1}]  }
   0x1   :  { %14 = vst [vmem:[#allocation2] sm:$0x1] %v167_v0  ;;  %15 = vst [vmem:[#allocation3] sm:$0x1] %v167_v0  ;;  %v128_v1 = vld [vmem:[%s213_s0] sm:$0xff]   ;;  %v159_v2 = vld [vmem:[%s213_s0 + $0x8] sm:$0xff]  }
   0x2   :  { %v129_v3 = vunpack.c.l.bf16 %v128_v1  ;;  %v130_v4 = vunpack.c.h.bf16 %v128_v1  ;;  %v133_v5 = vunpack.c.l.bf16 %v159_v2  ;;  %v160_v6 = vld [vmem:[%s213_s0 + $0x10] sm:$0xff]   ;;  %v134_v7 = vunpack.c.h.bf16 %v159_v2  ;;  %v161_v14 = vld [vmem:[%s213_s0 + $0x18] sm:$0xff]   ;;  %v162_v23 = vld [vmem:[%s213_s0 + $0x20] sm:$0xff]  }
   0x3   :  { %v137_v11 = vunpack.c.l.bf16 %v160_v6  ;;  %v138_v15 = vunpack.c.h.bf16 %v160_v6  ;;  %v141_v19 = vunpack.c.l.bf16 %v161_v14  ;;  %v142_v24 = vunpack.c.h.bf16 %v161_v14  ;;  %v163_v32 = vld [vmem:[%s213_s0 + $0x28] sm:$0xff]   ;;  %v164_v41 = vld [vmem:[%s213_s0 + $0x30] sm:$0xff]   ;;  %v165_v50 = vld [vmem:[%s213_s0 + $0x38] sm:$0xff]  }
   0x4   :  { %v49_v8 = vadd.f32 %v130_v4, %v129_v3  ;;  %v73_v9 = vmul.f32 %v129_v3, %v129_v3  ;;  %v74_v10 = vmul.f32 %v130_v4, %v130_v4  ;;  %v75_v13 = vmul.f32 %v133_v5, %v133_v5 }
   0x5   :  { %v76_v17 = vmul.f32 %v134_v7, %v134_v7  ;;  %v77_v21 = vmul.f32 %v137_v11, %v137_v11  ;;  %v78_v26 = vmul.f32 %v138_v15, %v138_v15  ;;  %v145_v28 = vunpack.c.l.bf16 %v162_v23 }
   0x6   :  { %v50_v12 = vadd.f32 %v133_v5, %v49_v8  ;;  %v89_v18 = vadd.f32 %v74_v10, %v73_v9  ;;  %v79_v30 = vmul.f32 %v141_v19, %v141_v19  ;;  %v146_v33 = vunpack.c.h.bf16 %v162_v23 }
   0x7   :  { %v80_v35 = vmul.f32 %v142_v24, %v142_v24  ;;  %v149_v37 = vunpack.c.l.bf16 %v163_v32  ;;  %v81_v39 = vmul.f32 %v145_v28, %v145_v28  ;;  %v150_v42 = vunpack.c.h.bf16 %v163_v32 }
   0x8   :  { %v51_v16 = vadd.f32 %v134_v7, %v50_v12  ;;  %v90_v22 = vadd.f32 %v89_v18, %v75_v13  ;;  %v82_v44 = vmul.f32 %v146_v33, %v146_v33  ;;  %v153_v46 = vunpack.c.l.bf16 %v164_v41 }
   0x9   :  { %v83_v48 = vmul.f32 %v149_v37, %v149_v37  ;;  %v154_v51 = vunpack.c.h.bf16 %v164_v41  ;;  %v84_v53 = vmul.f32 %v150_v42, %v150_v42  ;;  %v157_v55 = vunpack.c.l.bf16 %v165_v50 }
   0xa   :  { %v52_v20 = vadd.f32 %v137_v11, %v51_v16  ;;  %v91_v27 = vadd.f32 %v90_v22, %v76_v17  ;;  %v85_v57 = vmul.f32 %v153_v46, %v153_v46  ;;  %v158_v59 = vunpack.c.h.bf16 %v165_v50 }
   0xb   :  { %v86_v61 = vmul.f32 %v154_v51, %v154_v51  ;;  %v87_v0 = vmul.f32 %v157_v55, %v157_v55 }
   0xc   :  { %v53_v25 = vadd.f32 %v138_v15, %v52_v20  ;;  %v92_v31 = vadd.f32 %v91_v27, %v77_v21  ;;  %v88_v3 = vmul.f32 %v158_v59, %v158_v59  ;;  %v48_v15 = vld [vmem:[#allocation2] sm:$0x1]  ;;  %v72_v20 = vld [vmem:[#allocation3] sm:$0x1] }
   0xe   :  { %v54_v29 = vadd.f32 %v141_v19, %v53_v25  ;;  %v93_v36 = vadd.f32 %v92_v31, %v78_v26 }
  0x10   :  { %v55_v34 = vadd.f32 %v142_v24, %v54_v29  ;;  %v94_v40 = vadd.f32 %v93_v36, %v79_v30 }
  0x12   :  { %v56_v38 = vadd.f32 %v145_v28, %v55_v34  ;;  %v95_v45 = vadd.f32 %v94_v40, %v80_v35 }
  0x14   :  { %v57_v43 = vadd.f32 %v146_v33, %v56_v38  ;;  %v96_v49 = vadd.f32 %v95_v45, %v81_v39 }
  0x16   :  { %v58_v47 = vadd.f32 %v149_v37, %v57_v43  ;;  %v97_v54 = vadd.f32 %v96_v49, %v82_v44 }
  0x18   :  { %v59_v52 = vadd.f32 %v150_v42, %v58_v47  ;;  %v98_v58 = vadd.f32 %v97_v54, %v83_v48 }
  0x1a   :  { %v60_v56 = vadd.f32 %v153_v46, %v59_v52  ;;  %v99_v62 = vadd.f32 %v98_v58, %v84_v53 }
  0x1c   :  { %v61_v60 = vadd.f32 %v154_v51, %v60_v56  ;;  %v100_v1 = vadd.f32 %v99_v62, %v85_v57 }
  0x1e   :  { %v62_v63 = vadd.f32 %v157_v55, %v61_v60  ;;  %v101_v4 = vadd.f32 %v100_v1, %v86_v61 }
  0x20   :  { %v63_v2 = vadd.f32 %v158_v59, %v62_v63  ;;  %v102_v6 = vadd.f32 %v101_v4, %v87_v0 }
  0x22   :  { %v64_v5 = vrot.slane %v63_v2, 4  ;;  %v103_v8 = vadd.f32 %v102_v6, %v88_v3 }
  0x24   :  { %v65_v7 = vadd.f32 %v64_v5, %v63_v2  ;;  %v104_v10 = vrot.slane %v103_v8, 4 }
  0x26   :  { %v66_v9 = vrot.slane %v65_v7, 2  ;;  %v105_v12 = vadd.f32 %v104_v10, %v103_v8 }
  0x28   :  { %v67_v11 = vadd.f32 %v66_v9, %v65_v7  ;;  %v106_v14 = vrot.slane %v105_v12, 2 }
  0x2a   :  { %v68_v13 = vrot.slane %v67_v11, 1  ;;  %v107_v17 = vadd.f32 %v106_v14, %v105_v12 }
  0x2c   :  { %v69_v16 = vadd.f32 %v68_v13, %v67_v11  ;;  %v108_v19 = vrot.slane %v107_v17, 1 }
  0x2e   :  { %v70_v18 = vadd.f32 %v69_v16, %v48_v15  ;;  %v109_v21 = vadd.f32 %v108_v19, %v107_v17 }
  0x30   :  { %71 = vst [vmem:[#allocation2] sm:$0x1] %v70_v18  ;;  %v110_v22 = vadd.f32 %v109_v21, %v72_v20 }
  0x32   :  { %111 = vst [vmem:[#allocation3] sm:$0x1] %v110_v22 }
  0x37   :  { %v115_v23 = vld [vmem:[#allocation2] sm:$0x1] }
  0x38   :  { %116 = vst [vmem:[%s214_s1] sm:$0x1] %v115_v23 }
  0x39   :  { %v117_v24 = vld [vmem:[#allocation3] sm:$0x1] }
  0x3a   :  { %118 = vst [vmem:[%s215_s2] sm:$0x1] %v117_v24 }

// kernel: resnet_generator_forward.39
= control target key start
LH: loop header
LB: loop body
LE: loop exit
PB: predicated region body
PF: predicated region fallthrough
CT: control target
= control target key end

     0   :  { %vm172_vm0 = vcmask 125952   ;;  %s416_s0 = inlined_call_operand.vmem [shape: bf16[128,128], index: 0, kind: input, shape index: {}]   ;;  %s417_s1 = inlined_call_operand.vmem [shape: f32[1,128], index: 1, kind: input, shape index: {}]   ;;  %s418_s2 = inlined_call_operand.vmem [shape: f32[1,128], index: 2, kind: input, shape index: {}]   ;;  %s419_s3 = inlined_call_operand.vmem [shape: bf16[128,16], index: 3, kind: output, shape index: {}]  }
   0x1   :  { %v228_v0 = vld [vmem:[%s416_s0] sm:$0xff]   ;;  %v259_v4 = vld [vmem:[%s416_s0 + $0x8] sm:$0xff]   ;;  %v260_v5 = vld [vmem:[%s416_s0 + $0x10] sm:$0xff]  }
   0x2   :  { %v292_v1 = vld [vmem:[%s417_s1] ss:$0 sm:$0xff]  ;;  %v229_v2 = vunpack.c.l.bf16 %v228_v0  ;;  %v230_v3 = vunpack.c.h.bf16 %v228_v0  ;;  %v261_v6 = vld [vmem:[%s416_s0 + $0x18] sm:$0xff]   ;;  %v233_v8 = vunpack.c.l.bf16 %v259_v4  ;;  %v234_v9 = vunpack.c.h.bf16 %v259_v4  ;;  %v263_v41 = vld [vmem:[%s416_s0 + $0x28] sm:$0xff]  }
   0x3   :  { %v306_v7 = vld [vmem:[%s418_s2] ss:$0 sm:$0xff]  ;;  %v237_v10 = vunpack.c.l.bf16 %v260_v5  ;;  %v238_v11 = vunpack.c.h.bf16 %v260_v5  ;;  %v241_v14 = vunpack.c.l.bf16 %v261_v6  ;;  %v242_v15 = vunpack.c.h.bf16 %v261_v6  ;;  %v264_v42 = vld [vmem:[%s416_s0 + $0x30] sm:$0xff]   ;;  %v265_v47 = vld [vmem:[%s416_s0 + $0x38] sm:$0xff]  }
   0x4   :  { %v53_v12 = vmul.f32 %v229_v2, %v292_v1  ;;  %v54_v13 = vmul.f32 %v230_v3, %v292_v1  ;;  %v55_v16 = vmul.f32 %v233_v8, %v292_v1  ;;  %v56_v17 = vmul.f32 %v234_v9, %v292_v1  ;;  %v262_v36 = vld [vmem:[%s416_s0 + $0x20] sm:$0xff]  }
   0x5   :  { %v57_v18 = vmul.f32 %v237_v10, %v292_v1  ;;  %v58_v19 = vmul.f32 %v238_v11, %v292_v1  ;;  %v59_v22 = vmul.f32 %v241_v14, %v292_v1  ;;  %v60_v23 = vmul.f32 %v242_v15, %v292_v1 }
   0x6   :  { %v76_v20 = vadd.f32 %v306_v7, %v53_v12  ;;  %v77_v21 = vadd.f32 %v306_v7, %v54_v13  ;;  %v78_v24 = vadd.f32 %v306_v7, %v55_v16  ;;  %v79_v25 = vadd.f32 %v306_v7, %v56_v17 }
   0x7   :  { %v80_v26 = vadd.f32 %v306_v7, %v57_v18  ;;  %v81_v27 = vadd.f32 %v306_v7, %v58_v19  ;;  %v82_v30 = vadd.f32 %v306_v7, %v59_v22  ;;  %v83_v31 = vadd.f32 %v306_v7, %v60_v23 }
   0x8   :  { %v92_v28 = vmax.f32 %v76_v20, 0.0  ;;  %v93_v29 = vmax.f32 %v77_v21, 0.0  ;;  %v94_v32 = vmax.f32 %v78_v24, 0.0  ;;  %v95_v33 = vmax.f32 %v79_v25, 0.0 }
   0x9   :  { %v96_v34 = vmax.f32 %v80_v26, 0.0  ;;  %v97_v35 = vmax.f32 %v81_v27, 0.0  ;;  %v98_v39 = vmax.f32 %v82_v30, 0.0  ;;  %v99_v40 = vmax.f32 %v83_v31, 0.0 }
   0xa   :  { %v211_v37 = vpack.c.bf16 %v92_v28, %v92_v28  ;;  %v212_v38 = vpack.c.bf16 %v93_v29, %v93_v29  ;;  %v213_v43 = vpack.c.bf16 %v94_v32, %v94_v32  ;;  %v214_v44 = vpack.c.bf16 %v95_v33, %v95_v33 }
   0xb   :  { %v215_v45 = vpack.c.bf16 %v96_v34, %v96_v34  ;;  %v216_v46 = vpack.c.bf16 %v97_v35, %v97_v35  ;;  %v217_v48 = vpack.c.bf16 %v98_v39, %v98_v39  ;;  %v218_v49 = vpack.c.bf16 %v99_v40, %v99_v40 }
   0xc   :  { %173 = vst.msk [vmem:[%s419_s3] sm:$0xf] %vm172_vm0, %v211_v37  ;;  %174 = vst.msk [vmem:[%s419_s3 + $0x4] sm:$0xf] %vm172_vm0, %v212_v38  ;;  %v245_v50 = vunpack.c.l.bf16 %v262_v36  ;;  %v246_v51 = vunpack.c.h.bf16 %v262_v36  ;;  %v249_v52 = vunpack.c.l.bf16 %v263_v41  ;;  %v250_v53 = vunpack.c.h.bf16 %v263_v41 }
   0xd   :  { %175 = vst.msk [vmem:[%s419_s3 + $0x8] sm:$0xf] %vm172_vm0, %v213_v43  ;;  %176 = vst.msk [vmem:[%s419_s3 + $0xc] sm:$0xf] %vm172_vm0, %v214_v44  ;;  %v253_v54 = vunpack.c.l.bf16 %v264_v42  ;;  %v254_v55 = vunpack.c.h.bf16 %v264_v42  ;;  %v257_v58 = vunpack.c.l.bf16 %v265_v47  ;;  %v258_v59 = vunpack.c.h.bf16 %v265_v47 }
   0xe   :  { %177 = vst.msk [vmem:[%s419_s3 + $0x10] sm:$0xf] %vm172_vm0, %v215_v45  ;;  %178 = vst.msk [vmem:[%s419_s3 + $0x14] sm:$0xf] %vm172_vm0, %v216_v46  ;;  %v61_v56 = vmul.f32 %v245_v50, %v292_v1  ;;  %v62_v57 = vmul.f32 %v246_v51, %v292_v1  ;;  %v63_v60 = vmul.f32 %v249_v52, %v292_v1 }
   0xf   :  { %179 = vst.msk [vmem:[%s419_s3 + $0x18] sm:$0xf] %vm172_vm0, %v217_v48  ;;  %180 = vst.msk [vmem:[%s419_s3 + $0x1c] sm:$0xf] %vm172_vm0, %v218_v49  ;;  %v64_v61 = vmul.f32 %v250_v53, %v292_v1  ;;  %v65_v62 = vmul.f32 %v253_v54, %v292_v1  ;;  %v66_v63 = vmul.f32 %v254_v55, %v292_v1 }
  0x10   :  { %v84_v0 = vadd.f32 %v306_v7, %v61_v56  ;;  %v85_v2 = vadd.f32 %v306_v7, %v62_v57  ;;  %v67_v3 = vmul.f32 %v257_v58, %v292_v1  ;;  %v68_v4 = vmul.f32 %v258_v59, %v292_v1 }
  0x11   :  { %v86_v5 = vadd.f32 %v306_v7, %v63_v60  ;;  %v87_v6 = vadd.f32 %v306_v7, %v64_v61  ;;  %v88_v8 = vadd.f32 %v306_v7, %v65_v62  ;;  %v89_v9 = vadd.f32 %v306_v7, %v66_v63 }
  0x12   :  { %v100_v10 = vmax.f32 %v84_v0, 0.0  ;;  %v101_v11 = vmax.f32 %v85_v2, 0.0  ;;  %v90_v12 = vadd.f32 %v306_v7, %v67_v3  ;;  %v91_v13 = vadd.f32 %v306_v7, %v68_v4 }
  0x13   :  { %v102_v14 = vmax.f32 %v86_v5, 0.0  ;;  %v103_v15 = vmax.f32 %v87_v6, 0.0  ;;  %v104_v16 = vmax.f32 %v88_v8, 0.0  ;;  %v105_v17 = vmax.f32 %v89_v9, 0.0 }
  0x14   :  { %v219_v18 = vpack.c.bf16 %v100_v10, %v100_v10  ;;  %v220_v1 = vpack.c.bf16 %v101_v11, %v101_v11  ;;  %v106_v19 = vmax.f32 %v90_v12, 0.0  ;;  %v107_v20 = vmax.f32 %v91_v13, 0.0 }
  0x15   :  { %v221_v21 = vpack.c.bf16 %v102_v14, %v102_v14  ;;  %v222_v22 = vpack.c.bf16 %v103_v15, %v103_v15  ;;  %v223_v23 = vpack.c.bf16 %v104_v16, %v104_v16  ;;  %v224_v24 = vpack.c.bf16 %v105_v17, %v105_v17 }
  0x16   :  { %181 = vst.msk [vmem:[%s419_s3 + $0x20] sm:$0xf] %vm172_vm0, %v219_v18  ;;  %182 = vst.msk [vmem:[%s419_s3 + $0x24] sm:$0xf] %vm172_vm0, %v220_v1  ;;  %v225_v7 = vpack.c.bf16 %v106_v19, %v106_v19  ;;  %v226_v25 = vpack.c.bf16 %v107_v20, %v107_v20 }
  0x17   :  { %183 = vst.msk [vmem:[%s419_s3 + $0x28] sm:$0xf] %vm172_vm0, %v221_v21  ;;  %184 = vst.msk [vmem:[%s419_s3 + $0x2c] sm:$0xf] %vm172_vm0, %v222_v22 }
  0x18   :  { %185 = vst.msk [vmem:[%s419_s3 + $0x30] sm:$0xf] %vm172_vm0, %v223_v23  ;;  %186 = vst.msk [vmem:[%s419_s3 + $0x34] sm:$0xf] %vm172_vm0, %v224_v24 }
  0x19   :  { %187 = vst.msk [vmem:[%s419_s3 + $0x38] sm:$0xf] %vm172_vm0, %v225_v7  ;;  %188 = vst.msk [vmem:[%s419_s3 + $0x3c] sm:$0xf] %vm172_vm0, %v226_v25 }

// kernel: resnet_generator_forward.41
= control target key start
LH: loop header
LB: loop body
LE: loop exit
PB: predicated region body
PF: predicated region fallthrough
CT: control target
= control target key end

     0   :  { %v77_v0 = vmov 0.0   ;;  %s105_s0 = inlined_call_operand.vmem [shape: bf16[32,128], index: 0, kind: input, shape index: {}]   ;;  %s106_s1 = inlined_call_operand.vmem [shape: f32[1,128], index: 1, kind: output, shape index: {0}]   ;;  %s107_s2 = inlined_call_operand.vmem [shape: f32[1,128], index: 2, kind: output, shape index: {1}]  }
   0x1   :  { %14 = vst [vmem:[#allocation2] sm:$0x1] %v77_v0  ;;  %15 = vst [vmem:[#allocation3] sm:$0x1] %v77_v0  ;;  %v68_v1 = vld [vmem:[%s105_s0] sm:$0xff]   ;;  %v75_v2 = vld [vmem:[%s105_s0 + $0x8] sm:$0xff]  }
   0x2   :  { %v69_v3 = vunpack.c.l.bf16 %v68_v1  ;;  %v70_v4 = vunpack.c.h.bf16 %v68_v1  ;;  %v73_v5 = vunpack.c.l.bf16 %v75_v2  ;;  %v74_v6 = vunpack.c.h.bf16 %v75_v2 }
   0x4   :  { %v25_v7 = vadd.f32 %v70_v4, %v69_v3  ;;  %v37_v8 = vmul.f32 %v69_v3, %v69_v3  ;;  %v38_v9 = vmul.f32 %v70_v4, %v70_v4  ;;  %v39_v10 = vmul.f32 %v73_v5, %v73_v5 }
   0x5   :  { %v40_v12 = vmul.f32 %v74_v6, %v74_v6 }
   0x6   :  { %v26_v11 = vadd.f32 %v73_v5, %v25_v7  ;;  %v41_v13 = vadd.f32 %v38_v9, %v37_v8 }
   0x8   :  { %v27_v14 = vadd.f32 %v74_v6, %v26_v11  ;;  %v42_v15 = vadd.f32 %v41_v13, %v39_v10  ;;  %v24_v26 = vld [vmem:[#allocation2] sm:$0x1]  ;;  %v36_v29 = vld [vmem:[#allocation3] sm:$0x1] }
   0xa   :  { %v28_v16 = vrot.slane %v27_v14, 4  ;;  %v43_v17 = vadd.f32 %v42_v15, %v40_v12 }
   0xc   :  { %v29_v18 = vadd.f32 %v28_v16, %v27_v14  ;;  %v44_v19 = vrot.slane %v43_v17, 4 }
   0xe   :  { %v30_v20 = vrot.slane %v29_v18, 2  ;;  %v45_v21 = vadd.f32 %v44_v19, %v43_v17 }
  0x10   :  { %v31_v22 = vadd.f32 %v30_v20, %v29_v18  ;;  %v46_v23 = vrot.slane %v45_v21, 2 }
  0x12   :  { %v32_v24 = vrot.slane %v31_v22, 1  ;;  %v47_v25 = vadd.f32 %v46_v23, %v45_v21 }
  0x14   :  { %v33_v27 = vadd.f32 %v32_v24, %v31_v22  ;;  %v48_v28 = vrot.slane %v47_v25, 1 }
  0x16   :  { %v34_v30 = vadd.f32 %v33_v27, %v24_v26  ;;  %v49_v31 = vadd.f32 %v48_v28, %v47_v25 }
  0x18   :  { %35 = vst [vmem:[#allocation2] sm:$0x1] %v34_v30  ;;  %v50_v32 = vadd.f32 %v49_v31, %v36_v29 }
  0x1a   :  { %51 = vst [vmem:[#allocation3] sm:$0x1] %v50_v32 }
  0x1f   :  { %v55_v33 = vld [vmem:[#allocation2] sm:$0x1] }
  0x20   :  { %56 = vst [vmem:[%s106_s1] sm:$0x1] %v55_v33 }
  0x21   :  { %v57_v34 = vld [vmem:[#allocation3] sm:$0x1] }
  0x22   :  { %58 = vst [vmem:[%s107_s2] sm:$0x1] %v57_v34 }

// kernel: resnet_generator_forward.42
= control target key start
LH: loop header
LB: loop body
LE: loop exit
PB: predicated region body
PF: predicated region fallthrough
CT: control target
= control target key end

     0   :  { %vm64_vm0 = vcmask 257024   ;;  %s136_s0 = inlined_call_operand.vmem [shape: bf16[32,128], index: 0, kind: input, shape index: {}]   ;;  %s137_s1 = inlined_call_operand.vmem [shape: f32[1,128], index: 1, kind: input, shape index: {}]   ;;  %s138_s2 = inlined_call_operand.vmem [shape: f32[1,128], index: 2, kind: input, shape index: {}]   ;;  %s139_s3 = inlined_call_operand.vmem [shape: bf16[32,32], index: 3, kind: output, shape index: {}]  }
   0x1   :  { %v84_v0 = vld [vmem:[%s136_s0] sm:$0xff]   ;;  %v91_v4 = vld [vmem:[%s136_s0 + $0x8] sm:$0xff]  }
   0x2   :  { %v73_v1 = vld [vmem:[%s137_s1] ss:$0 sm:$0xff]  ;;  %v85_v2 = vunpack.c.l.bf16 %v84_v0  ;;  %v86_v3 = vunpack.c.h.bf16 %v84_v0  ;;  %v89_v6 = vunpack.c.l.bf16 %v91_v4  ;;  %v90_v7 = vunpack.c.h.bf16 %v91_v4 }
   0x3   :  { %v74_v5 = vld [vmem:[%s138_s2] ss:$0 sm:$0xff] }
   0x4   :  { %v29_v8 = vmul.f32 %v85_v2, %v73_v1  ;;  %v30_v9 = vmul.f32 %v86_v3, %v73_v1  ;;  %v31_v10 = vmul.f32 %v89_v6, %v73_v1  ;;  %v32_v11 = vmul.f32 %v90_v7, %v73_v1 }
   0x6   :  { %v40_v12 = vadd.f32 %v74_v5, %v29_v8  ;;  %v41_v13 = vadd.f32 %v74_v5, %v30_v9  ;;  %v42_v14 = vadd.f32 %v74_v5, %v31_v10  ;;  %v43_v15 = vadd.f32 %v74_v5, %v32_v11 }
   0x8   :  { %v44_v16 = vmax.f32 %v40_v12, 0.0  ;;  %v45_v17 = vmax.f32 %v41_v13, 0.0  ;;  %v46_v18 = vmax.f32 %v42_v14, 0.0  ;;  %v47_v19 = vmax.f32 %v43_v15, 0.0 }
   0xa   :  { %v79_v20 = vpack.c.bf16 %v44_v16, %v44_v16  ;;  %v80_v21 = vpack.c.bf16 %v45_v17, %v45_v17  ;;  %v81_v22 = vpack.c.bf16 %v46_v18, %v46_v18  ;;  %v82_v23 = vpack.c.bf16 %v47_v19, %v47_v19 }
   0xc   :  { %65 = vst.msk [vmem:[%s139_s3] sm:$0xf] %vm64_vm0, %v79_v20  ;;  %66 = vst.msk [vmem:[%s139_s3 + $0x4] sm:$0xf] %vm64_vm0, %v80_v21 }
   0xd   :  { %67 = vst.msk [vmem:[%s139_s3 + $0x8] sm:$0xf] %vm64_vm0, %v81_v22  ;;  %68 = vst.msk [vmem:[%s139_s3 + $0xc] sm:$0xf] %vm64_vm0, %v82_v23 }

// kernel: resnet_generator_forward.40
= control target key start
LH: loop header
LB: loop body
LE: loop exit
PB: predicated region body
PF: predicated region fallthrough
CT: control target
= control target key end

     0   :  { %s473_s1 = inlined_call_operand.vmem [shape: bf16[256,128], index: 1, kind: input, shape index: {}]   ;;  %s474_s0 = inlined_call_operand.vmem [shape: bf16[32,256], index: 0, kind: input, shape index: {}]   ;;  %s475_s2 = inlined_call_operand.vmem [shape: f32[1,128], index: 2, kind: input, shape index: {}]   ;;  %s476_s3 = inlined_call_operand.vmem [shape: bf16[32,128], index: 3, kind: output, shape index: {}]  }
   0x1   :  { %v362_v0 = vld [vmem:[%s473_s1 + $0x40] sm:$0xff]   ;;  %v364_v2 = vld [vmem:[%s473_s1 + $0x48] sm:$0xff]   ;;  %v366_v4 = vld [vmem:[%s473_s1 + $0x50] sm:$0xff]  }
   0x2   :  { %v363_v1 = vld [vmem:[%s473_s1] sm:$0xff]   ;;  %318 = vmatprep.subr.bf16.mxu0 %v362_v0  ;;  %346 = vmatprep.subr.bf16.mxu1 %v362_v0  ;;  %v365_v3 = vld [vmem:[%s473_s1 + $0x8] sm:$0xff]   ;;  %v367_v5 = vld [vmem:[%s473_s1 + $0x10] sm:$0xff]  }
   0x3   :  { %319 = vmatpush3.bf16.msra.mxu0 %v363_v1  ;;  %354 = vmatpush3.bf16.msra.mxu1 %v363_v1  ;;  %v368_v6 = vld [vmem:[%s473_s1 + $0x58] sm:$0xff]   ;;  %v370_v8 = vld [vmem:[%s473_s1 + $0x60] sm:$0xff]   ;;  %v372_v10 = vld [vmem:[%s473_s1 + $0x68] sm:$0xff]  }
   0x4   :  { %320 = vmatprep.subr.bf16.mxu0 %v364_v2  ;;  %347 = vmatprep.subr.bf16.mxu1 %v364_v2  ;;  %v369_v7 = vld [vmem:[%s473_s1 + $0x18] sm:$0xff]   ;;  %v371_v9 = vld [vmem:[%s473_s1 + $0x20] sm:$0xff]   ;;  %v373_v13 = vld [vmem:[%s473_s1 + $0x28] sm:$0xff]  }
   0x5   :  { %v380_v11 = vld [vmem:[%s474_s0 + $0x4] ss:$8 sps:$4 sm:$0xff]   ;;  %v383_v12 = vld [vmem:[%s474_s0 + $0x14] ss:$8 sps:$4 sm:$0xff]   ;;  %v378_v18 = vld [vmem:[%s474_s0] ss:$8 sps:$4 sm:$0xff]  }
   0x6   :  { %v374_v14 = vld [vmem:[%s473_s1 + $0x70] sm:$0xff]   ;;  %211 = vmatprep.mubr.bf16.mxu0 %v380_v11  ;;  %219 = vmatprep.mubr.bf16.mxu1 %v383_v12  ;;  %v376_v16 = vld [vmem:[%s473_s1 + $0x78] sm:$0xff]   ;;  %v298_v28 = vld [vmem:[%s475_s2] ss:$0 sm:$0xff] }
   0x7   :  { %321 = vmatpush3.bf16.msra.mxu0 %v365_v3  ;;  %355 = vmatpush3.bf16.msra.mxu1 %v365_v3  ;;  %v375_v15 = vld [vmem:[%s473_s1 + $0x30] sm:$0xff]   ;;  %v377_v17 = vld [vmem:[%s473_s1 + $0x38] sm:$0xff]  }
   0x8   :  { %322 = vmatprep.subr.bf16.mxu0 %v366_v4  ;;  %348 = vmatprep.subr.bf16.mxu1 %v366_v4  ;;  %v381_v19 = vld [vmem:[%s474_s0 + $0x10] ss:$8 sps:$4 sm:$0xff]  }
   0xb   :  { %323 = vmatpush3.bf16.msra.mxu0 %v367_v5  ;;  %356 = vmatpush3.bf16.msra.mxu1 %v367_v5 }
   0xc   :  { %324 = vmatprep.subr.bf16.mxu0 %v368_v6  ;;  %349 = vmatprep.subr.bf16.mxu1 %v368_v6 }
   0xf   :  { %325 = vmatpush3.bf16.msra.mxu0 %v369_v7  ;;  %357 = vmatpush3.bf16.msra.mxu1 %v369_v7 }
  0x10   :  { %326 = vmatprep.subr.bf16.mxu0 %v370_v8  ;;  %350 = vmatprep.subr.bf16.mxu1 %v370_v8 }
  0x13   :  { %327 = vmatpush3.bf16.msra.mxu0 %v371_v9  ;;  %358 = vmatpush3.bf16.msra.mxu1 %v371_v9 }
  0x14   :  { %328 = vmatprep.subr.bf16.mxu0 %v372_v10  ;;  %351 = vmatprep.subr.bf16.mxu1 %v372_v10 }
  0x17   :  { %329 = vmatpush3.bf16.msra.mxu0 %v373_v13  ;;  %359 = vmatpush3.bf16.msra.mxu1 %v373_v13 }
  0x18   :  { %330 = vmatprep.subr.bf16.mxu0 %v374_v14  ;;  %352 = vmatprep.subr.bf16.mxu1 %v374_v14 }
  0x1b   :  { %331 = vmatpush3.bf16.msra.mxu0 %v375_v15  ;;  %360 = vmatpush3.bf16.msra.mxu1 %v375_v15 }
  0x1c   :  { %332 = vmatprep.subr.bf16.mxu0 %v376_v16  ;;  %353 = vmatprep.subr.bf16.mxu1 %v376_v16 }
  0x1f   :  { %333 = vmatpush3.bf16.msra.mxu0 %v377_v17  ;;  %361 = vmatpush3.bf16.msra.mxu1 %v377_v17 }
  0x22   :  { %212 = vmatmul.mubr.bf16.vlgmr.msra.gmra.mrb[0].mxu0 %v378_v18  ;;  %220 = vmatmul.mubr.bf16.vlgmr.msra.gmra.mrb[0].mxu1 %v381_v19 }
  0xf5   :  { %v334_v20 = vpop.f32.mrb[0].mxu0  ;;  %v340_v21 = vpop.f32.mrb[0].mxu1 }
  0xf6   :  { %v335_v22 = vpop.f32.mrb[1].mxu0  ;;  %v341_v23 = vpop.f32.mrb[1].mxu1 }
  0xf7   :  { %v336_v24 = vadd.f32 %v335_v22, %v334_v20  ;;  %v342_v25 = vadd.f32 %v341_v23, %v340_v21  ;;  %v337_v26 = vpop.f32.mrb[2].mxu0  ;;  %v343_v27 = vpop.f32.mrb[2].mxu1 }
  0xf8   :  { %v338_v29 = vpop.f32.mrb[3].mxu0  ;;  %v344_v30 = vpop.f32.mrb[3].mxu1 }
  0xf9   :  { %v339_v31 = vadd.f32 %v338_v29, %v337_v26  ;;  %v345_v32 = vadd.f32 %v344_v30, %v343_v27  ;;  %v250_v33 = vadd.f32 %v336_v24, %v298_v28  ;;  %v252_v34 = vadd.f32 %v342_v25, %v298_v28 }
  0xfb   :  { %v251_v35 = vadd.f32 %v339_v31, %v298_v28  ;;  %v253_v36 = vadd.f32 %v345_v32, %v298_v28 }
  0xfd   :  { %v310_v37 = vpack.c.bf16 %v251_v35, %v250_v33  ;;  %v315_v38 = vpack.c.bf16 %v253_v36, %v252_v34 }
  0xff   :  { %311 = vst [vmem:[%s476_s3] sm:$0xff] %v310_v37   ;;  %317 = vst [vmem:[%s476_s3 + $0x8] sm:$0xff] %v315_v38  }

// kernel: resnet_generator_forward.43
= control target key start
LH: loop header
LB: loop body
LE: loop exit
PB: predicated region body
PF: predicated region fallthrough
CT: control target
= control target key end

     0   :  { %s666_s1 = inlined_call_operand.vmem [shape: bf16[384,128], index: 1, kind: input, shape index: {}]   ;;  %s667_s0 = inlined_call_operand.vmem [shape: bf16[32,384], index: 0, kind: input, shape index: {}]   ;;  %s668_s2 = inlined_call_operand.vmem [shape: f32[1,128], index: 2, kind: input, shape index: {}]   ;;  %s669_s3 = inlined_call_operand.vmem [shape: bf16[32,128], index: 3, kind: output, shape index: {}]  }
   0x1   :  { %v515_v0 = vld [vmem:[%s666_s1 + $0x40] sm:$0xff]   ;;  %v518_v3 = vld [vmem:[%s666_s1 + $0x48] sm:$0xff]   ;;  %v521_v6 = vld [vmem:[%s666_s1 + $0x50] sm:$0xff]  }
   0x2   :  { %v516_v1 = vld [vmem:[%s666_s1] sm:$0xff]   ;;  %457 = vmatprep.subr.bf16.mxu0 %v515_v0  ;;  %v519_v4 = vld [vmem:[%s666_s1 + $0x8] sm:$0xff]   ;;  %v522_v7 = vld [vmem:[%s666_s1 + $0x10] sm:$0xff]  }
   0x3   :  { %v517_v2 = vld [vmem:[%s666_s1 + $0x80] sm:$0xff]   ;;  %458 = vmatpush3.bf16.msra.mxu0 %v516_v1  ;;  %v520_v5 = vld [vmem:[%s666_s1 + $0x88] sm:$0xff]   ;;  %v523_v8 = vld [vmem:[%s666_s1 + $0x90] sm:$0xff]  }
   0x4   :  { %495 = vmatprep.subr.bf16.mxu1 %v517_v2  ;;  %459 = vmatprep.subr.bf16.mxu0 %v518_v3  ;;  %v524_v9 = vld [vmem:[%s666_s1 + $0x58] sm:$0xff]   ;;  %v527_v12 = vld [vmem:[%s666_s1 + $0x60] sm:$0xff]   ;;  %v530_v15 = vld [vmem:[%s666_s1 + $0x68] sm:$0xff]  }
   0x5   :  { %496 = vmatpush3.bf16.msra.mxu1 %v517_v2  ;;  %v525_v10 = vld [vmem:[%s666_s1 + $0x18] sm:$0xff]   ;;  %v529_v13 = vld [vmem:[%s666_s1 + $0xa0] sm:$0xff]   ;;  %v532_v16 = vld [vmem:[%s666_s1 + $0xa8] sm:$0xff]  }
   0x6   :  { %497 = vmatprep.subr.bf16.mxu1 %v520_v5  ;;  %v526_v11 = vld [vmem:[%s666_s1 + $0x98] sm:$0xff]   ;;  %v528_v14 = vld [vmem:[%s666_s1 + $0x20] sm:$0xff]   ;;  %v531_v17 = vld [vmem:[%s666_s1 + $0x28] sm:$0xff]  }
   0x7   :  { %460 = vmatpush3.bf16.msra.mxu0 %v519_v4  ;;  %v533_v18 = vld [vmem:[%s666_s1 + $0x70] sm:$0xff]   ;;  %v536_v21 = vld [vmem:[%s666_s1 + $0x78] sm:$0xff]   ;;  %v539_v26 = vld [vmem:[%s667_s0] ss:$12 sps:$4 sm:$0xff]  }
   0x8   :  { %461 = vmatprep.subr.bf16.mxu0 %v521_v6  ;;  %v534_v19 = vld [vmem:[%s666_s1 + $0x30] sm:$0xff]   ;;  %v538_v22 = vld [vmem:[%s666_s1 + $0xb8] sm:$0xff]   ;;  %v543_v28 = vld [vmem:[%s667_s0 + $0x20] ss:$12 sps:$4 sm:$0xff]  }
   0x9   :  { %498 = vmatpush3.bf16.msra.mxu1 %v520_v5  ;;  %v535_v20 = vld [vmem:[%s666_s1 + $0xb0] sm:$0xff]   ;;  %v537_v25 = vld [vmem:[%s666_s1 + $0x38] sm:$0xff]   ;;  %v437_v40 = vld [vmem:[%s668_s2] ss:$0 sm:$0xff] }
   0xa   :  { %499 = vmatprep.subr.bf16.mxu1 %v523_v8  ;;  %v541_v23 = vld [vmem:[%s667_s0 + $0x4] ss:$12 sps:$4 sm:$0xff]   ;;  %v542_v24 = vld [vmem:[%s667_s0 + $0x8] ss:$12 sps:$4 sm:$0xff]  }
   0xb   :  { %462 = vmatpush3.bf16.msra.mxu0 %v522_v7  ;;  %291 = vmatprep.mubr.bf16.mxu0 %v541_v23  ;;  %v544_v27 = vld [vmem:[%s667_s0 + $0x1c] ss:$12 sps:$4 sm:$0xff]   ;;  %v546_v29 = vld [vmem:[%s667_s0 + $0x18] ss:$12 sps:$4 sm:$0xff]  }
   0xc   :  { %463 = vmatprep.subr.bf16.mxu0 %v524_v9  ;;  %511 = vmatprep.mubr.bf16.mxu1 %v542_v24 }
   0xd   :  { %500 = vmatpush3.bf16.msra.mxu1 %v523_v8 }
   0xe   :  { %501 = vmatprep.subr.bf16.mxu1 %v526_v11 }
   0xf   :  { %464 = vmatpush3.bf16.msra.mxu0 %v525_v10 }
  0x10   :  { %465 = vmatprep.subr.bf16.mxu0 %v527_v12 }
  0x11   :  { %502 = vmatpush3.bf16.msra.mxu1 %v526_v11 }
  0x12   :  { %503 = vmatprep.subr.bf16.mxu1 %v529_v13 }
  0x13   :  { %466 = vmatpush3.bf16.msra.mxu0 %v528_v14 }
  0x14   :  { %467 = vmatprep.subr.bf16.mxu0 %v530_v15 }
  0x15   :  { %504 = vmatpush3.bf16.msra.mxu1 %v529_v13 }
  0x16   :  { %505 = vmatprep.subr.bf16.mxu1 %v532_v16 }
  0x17   :  { %468 = vmatpush3.bf16.msra.mxu0 %v531_v17 }
  0x18   :  { %469 = vmatprep.subr.bf16.mxu0 %v533_v18 }
  0x19   :  { %506 = vmatpush3.bf16.msra.mxu1 %v532_v16 }
  0x1a   :  { %507 = vmatprep.subr.bf16.mxu1 %v535_v20 }
  0x1b   :  { %470 = vmatpush3.bf16.msra.mxu0 %v534_v19 }
  0x1c   :  { %471 = vmatprep.subr.bf16.mxu0 %v536_v21 }
  0x1d   :  { %508 = vmatpush3.bf16.msra.mxu1 %v535_v20 }
  0x1e   :  { %509 = vmatprep.subr.bf16.mxu1 %v538_v22 }
  0x1f   :  { %472 = vmatpush3.bf16.msra.mxu0 %v537_v25 }
  0x21   :  { %510 = vmatpush3.bf16.msra.mxu1 %v538_v22 }
  0x22   :  { %292 = vmatmul.mubr.bf16.vlgmr.msra.gmra.mrb[0].mxu0 %v539_v26 }
  0x23   :  { %299 = vmatprep.mubr.bf16.mxu0 %v544_v27 }
  0x24   :  { %512 = vmatmul.mubr.bf16.vlgmr.msra.gmra.mrb[0].mxu1 %v543_v28 }
  0x2a   :  { %300 = vmatmul.mubr.bf16.gmra.mrb[4].mxu0 %v546_v29 }
  0xf5   :  { %v473_v30 = vpop.f32.mrb[0].mxu0 }
  0xf6   :  { %v474_v31 = vpop.f32.mrb[1].mxu0 }
  0xf7   :  { %v475_v32 = vadd.f32 %v474_v31, %v473_v30  ;;  %v476_v33 = vpop.f32.mrb[2].mxu0  ;;  %v513_v34 = vpop.f32.mrb[0].mxu1 }
  0xf8   :  { %v477_v35 = vpop.f32.mrb[3].mxu0  ;;  %v342_v36 = vpop.f32.mrb[1].mxu1 }
  0xf9   :  { %v478_v37 = vadd.f32 %v477_v35, %v476_v33  ;;  %v343_v38 = vadd.f32 %v475_v32, %v342_v36  ;;  %v514_v39 = vpop.f32.mrb[2].mxu1 }
  0xfa   :  { %v345_v41 = vpop.f32.mrb[3].mxu1 }
  0xfb   :  { %v346_v42 = vadd.f32 %v478_v37, %v345_v41  ;;  %v379_v43 = vadd.f32 %v437_v40, %v343_v38 }
  0xfd   :  { %v380_v44 = vadd.f32 %v437_v40, %v346_v42  ;;  %v479_v45 = vpop.f32.mrb[4].mxu0 }
  0xfe   :  { %v480_v46 = vpop.f32.mrb[5].mxu0 }
  0xff   :  { %v449_v47 = vpack.c.bf16 %v380_v44, %v379_v43  ;;  %v481_v48 = vadd.f32 %v480_v46, %v479_v45  ;;  %v482_v49 = vpop.f32.mrb[6].mxu0 }
 0x100   :  { %v483_v50 = vpop.f32.mrb[7].mxu0 }
 0x101   :  { %450 = vst [vmem:[%s669_s3] sm:$0xff] %v449_v47   ;;  %v351_v51 = vadd.f32 %v513_v34, %v481_v48  ;;  %v484_v52 = vadd.f32 %v483_v50, %v482_v49 }
 0x103   :  { %v354_v53 = vadd.f32 %v514_v39, %v484_v52  ;;  %v381_v54 = vadd.f32 %v437_v40, %v351_v51 }
 0x105   :  { %v382_v55 = vadd.f32 %v437_v40, %v354_v53 }
 0x107   :  { %v454_v56 = vpack.c.bf16 %v382_v55, %v381_v54 }
 0x109   :  { %456 = vst [vmem:[%s669_s3 + $0x8] sm:$0xff] %v454_v56  }

// kernel: resnet_generator_forward.48
= control target key start
LH: loop header
LB: loop body
LE: loop exit
PB: predicated region body
PF: predicated region fallthrough
CT: control target
= control target key end

     0   :  { %vm75_vm0 = vcmask 257024   ;;  %s167_s0 = inlined_call_operand.vmem [shape: bf16[32,128], index: 0, kind: input, shape index: {}]   ;;  %s168_s1 = inlined_call_operand.vmem [shape: f32[1,128], index: 1, kind: input, shape index: {}]   ;;  %s169_s2 = inlined_call_operand.vmem [shape: f32[1,128], index: 2, kind: input, shape index: {}]   ;;  %s170_s3 = inlined_call_operand.vmem [shape: bf16[32,32], index: 3, kind: input, shape index: {}]   ;;  %s171_s4 = inlined_call_operand.vmem [shape: bf16[32,32], index: 4, kind: output, shape index: {}]  }
   0x1   :  { %v95_v0 = vld [vmem:[%s167_s0] sm:$0xff]   ;;  %v110_v5 = vld [vmem:[%s167_s0 + $0x8] sm:$0xff]  }
   0x2   :  { %v84_v1 = vld [vmem:[%s168_s1] ss:$0 sm:$0xff]  ;;  %v96_v2 = vunpack.c.l.bf16 %v95_v0  ;;  %v97_v4 = vunpack.c.h.bf16 %v95_v0  ;;  %v111_v6 = vld [vmem:[%s170_s3 + $0x8] sm:$0xff]   ;;  %v100_v9 = vunpack.c.l.bf16 %v110_v5  ;;  %v101_v13 = vunpack.c.h.bf16 %v110_v5 }
   0x3   :  { %v103_v3 = vld [vmem:[%s170_s3] sm:$0xff]   ;;  %v108_v15 = vunpack.c.l.bf16 %v111_v6  ;;  %v109_v19 = vunpack.c.h.bf16 %v111_v6 }
   0x4   :  { %v85_v7 = vld [vmem:[%s169_s2] ss:$0 sm:$0xff]  ;;  %v104_v8 = vunpack.c.l.bf16 %v103_v3  ;;  %v32_v10 = vmul.f32 %v96_v2, %v84_v1  ;;  %v33_v11 = vmul.f32 %v97_v4, %v84_v1  ;;  %v105_v12 = vunpack.c.h.bf16 %v103_v3 }
   0x5   :  { %v34_v14 = vmul.f32 %v100_v9, %v84_v1  ;;  %v35_v18 = vmul.f32 %v101_v13, %v84_v1 }
   0x6   :  { %v43_v16 = vadd.f32 %v85_v7, %v32_v10  ;;  %v44_v17 = vadd.f32 %v85_v7, %v33_v11 }
   0x7   :  { %v45_v20 = vadd.f32 %v85_v7, %v34_v14  ;;  %v46_v23 = vadd.f32 %v85_v7, %v35_v18 }
   0x8   :  { %v55_v21 = vadd.f32 %v104_v8, %v43_v16  ;;  %v56_v22 = vadd.f32 %v105_v12, %v44_v17 }
   0x9   :  { %v57_v24 = vadd.f32 %v108_v15, %v45_v20  ;;  %v58_v27 = vadd.f32 %v109_v19, %v46_v23 }
   0xa   :  { %v90_v25 = vpack.c.bf16 %v55_v21, %v55_v21  ;;  %v91_v26 = vpack.c.bf16 %v56_v22, %v56_v22 }
   0xb   :  { %v92_v28 = vpack.c.bf16 %v57_v24, %v57_v24  ;;  %v93_v29 = vpack.c.bf16 %v58_v27, %v58_v27 }
   0xc   :  { %76 = vst.msk [vmem:[%s171_s4] sm:$0xf] %vm75_vm0, %v90_v25  ;;  %77 = vst.msk [vmem:[%s171_s4 + $0x4] sm:$0xf] %vm75_vm0, %v91_v26 }
   0xd   :  { %78 = vst.msk [vmem:[%s171_s4 + $0x8] sm:$0xf] %vm75_vm0, %v92_v28  ;;  %79 = vst.msk [vmem:[%s171_s4 + $0xc] sm:$0xf] %vm75_vm0, %v93_v29 }

// kernel: resnet_generator_forward.56
= control target key start
LH: loop header
LB: loop body
LE: loop exit
PB: predicated region body
PF: predicated region fallthrough
CT: control target
= control target key end

     0   :  { %s335_s1 = inlined_call_operand.vmem [shape: bf16[128,128], index: 1, kind: input, shape index: {}]   ;;  %s336_s0 = inlined_call_operand.vmem [shape: bf16[32,128], index: 0, kind: input, shape index: {}]   ;;  %s337_s2 = inlined_call_operand.vmem [shape: f32[1,128], index: 2, kind: input, shape index: {}]   ;;  %s338_s3 = inlined_call_operand.vmem [shape: bf16[32,128], index: 3, kind: output, shape index: {}]  }
   0x1   :  { %v266_v0 = vld [vmem:[%s335_s1] sm:$0xff]   ;;  %v267_v1 = vld [vmem:[%s335_s1 + $0x8] sm:$0xff]   ;;  %v268_v2 = vld [vmem:[%s335_s1 + $0x10] sm:$0xff]  }
   0x2   :  { %246 = vmatprep.subr.bf16.mxu0 %v266_v0  ;;  %v269_v3 = vld [vmem:[%s335_s1 + $0x18] sm:$0xff]   ;;  %v274_v4 = vld [vmem:[%s336_s0] sm:$0xff]   ;;  %v271_v6 = vld [vmem:[%s335_s1 + $0x28] sm:$0xff]  }
   0x3   :  { %247 = vmatpush3.bf16.msra.mxu0 %v266_v0  ;;  %262 = vmatprep.mubr.bf16.mxu0 %v274_v4  ;;  %v270_v5 = vld [vmem:[%s335_s1 + $0x20] sm:$0xff]   ;;  %v272_v7 = vld [vmem:[%s335_s1 + $0x30] sm:$0xff]   ;;  %v273_v8 = vld [vmem:[%s335_s1 + $0x38] sm:$0xff]  }
   0x4   :  { %248 = vmatprep.subr.bf16.mxu0 %v267_v1  ;;  %v275_v9 = vld [vmem:[%s336_s0 + $0x8] sm:$0xff]   ;;  %v216_v11 = vld [vmem:[%s337_s2] ss:$0 sm:$0xff] }
   0x7   :  { %249 = vmatpush3.bf16.msra.mxu0 %v267_v1 }
   0x8   :  { %250 = vmatprep.subr.bf16.mxu0 %v268_v2 }
   0xb   :  { %251 = vmatpush3.bf16.msra.mxu0 %v268_v2 }
   0xc   :  { %252 = vmatprep.subr.bf16.mxu0 %v269_v3 }
   0xf   :  { %253 = vmatpush3.bf16.msra.mxu0 %v269_v3 }
  0x10   :  { %254 = vmatprep.subr.bf16.mxu0 %v270_v5 }
  0x13   :  { %255 = vmatpush3.bf16.msra.mxu0 %v270_v5 }
  0x14   :  { %256 = vmatprep.subr.bf16.mxu0 %v271_v6 }
  0x17   :  { %257 = vmatpush3.bf16.msra.mxu0 %v271_v6 }
  0x18   :  { %258 = vmatprep.subr.bf16.mxu0 %v272_v7 }
  0x1b   :  { %259 = vmatpush3.bf16.msra.mxu0 %v272_v7 }
  0x1c   :  { %260 = vmatprep.subr.bf16.mxu0 %v273_v8 }
  0x1f   :  { %261 = vmatpush3.bf16.msra.mxu0 %v273_v8 }
  0x22   :  { %263 = vmatmul.mubr.bf16.vlgmr.msra.gmra.mrb[0].mxu0 %v275_v9 }
  0xf5   :  { %v264_v10 = vpop.f32.mrb[0].mxu0 }
  0xf6   :  { %v141_v12 = vpop.f32.mrb[1].mxu0  ;;  %v180_v14 = vadd.f32 %v264_v10, %v216_v11 }
  0xf7   :  { %v265_v13 = vpop.f32.mrb[2].mxu0  ;;  %v178_v17 = vadd.f32 %v216_v11, %v141_v12 }
  0xf8   :  { %v181_v15 = vadd.f32 %v265_v13, %v216_v11  ;;  %v144_v16 = vpop.f32.mrb[3].mxu0 }
  0xf9   :  { %v179_v18 = vadd.f32 %v216_v11, %v144_v16 }
  0xfa   :  { %v233_v19 = vpack.c.bf16 %v181_v15, %v180_v14 }
  0xfb   :  { %v228_v20 = vpack.c.bf16 %v179_v18, %v178_v17 }
  0xfc   :  { %235 = vst [vmem:[%s338_s3 + $0x8] sm:$0xff] %v233_v19  }
  0xfd   :  { %229 = vst [vmem:[%s338_s3] sm:$0xff] %v228_v20  }

// kernel: resnet_generator_forward.67
= control target key start
LH: loop header
LB: loop body
LE: loop exit
PB: predicated region body
PF: predicated region fallthrough
CT: control target
= control target key end

     0   :  { %s2497_s12 = smov 0   ;;  %s2499_s13 = smov 0   ;;  %s2754_s0 = inlined_call_operand.vmem [shape: bf16[512,512], index: 0, kind: input, shape index: {}]   ;;  %s2755_s1 = inlined_call_operand.vmem [shape: bf16[512,128], index: 1, kind: input, shape index: {}]   ;;  %s2756_s2 = inlined_call_operand.vmem [shape: f32[1,128], index: 2, kind: input, shape index: {}]   ;;  %s2757_s3 = inlined_call_operand.vmem [shape: bf16[512,128], index: 3, kind: output, shape index: {}]  }
   0x1   :  { %s2501_s14 = smov 0  }
   0x2 LB: > { %s32_s15 = sadd.s32 1, %s2471_s13  ;;  %p1748_p0 = scmp.ge.s32.totalorder %s2475_s14, 1  ;;  %s2475_s14 = sphi %s2501_s14, %s13_s14   ;;  %s2471_s13 = sphi %s2499_s13, %s2759_s13   ;;  %s2467_s12 = sphi %s2497_s12, %s2758_s12  }
   0x3   : > { %p34_p1 = scmp.ge.s32.totalorder %s32_s15, 2  ;;  %p191_p2 = scmp.lt.s32.totalorder %s2475_s14, 3 }
   0x5   : > { %s2761_s15 = smov (%p34_p1, %s32_s15), 0  ;;  %p192_p3 = pnand %p1748_p0, %p191_p2 }
   0x6   : > { %v2261_v0 = vld [vmem:[%s2755_s1 + $0x40] sm:$0xff] (!%p192_p3)   ;;  %v2265_v4 = vld [vmem:[%s2755_s1 + $0x48] sm:$0xff] (!%p192_p3)   ;;  %v2269_v8 = vld [vmem:[%s2755_s1 + $0x50] sm:$0xff] (!%p192_p3)   ;;  %s1749_s25 = sshll.u32 (!%p192_p3), %s2467_s12, 5 }
   0x7   : > { %195 = sbr.rel (%p192_p3) target bundleno = 396 (0x18c), region = 32  ;;  %v2262_v1 = vld [vmem:[%s2755_s1 + $0xc0] sm:$0xff] (!%p192_p3)   ;;  %2013 = vmatprep.subr.bf16.mxu0 (!%p192_p3), %v2261_v0  ;;  %v2266_v5 = vld [vmem:[%s2755_s1 + $0xc8] sm:$0xff] (!%p192_p3)   ;;  %v2270_v9 = vld [vmem:[%s2755_s1 + $0xd0] sm:$0xff] (!%p192_p3)   ;;  %p236_p4 = scmp.lt.s32.totalorder (!%p192_p3), %s1749_s25, 63 }
   0x8   : > { %v2263_v2 = vld [vmem:[%s2755_s1] sm:$0xff] (!%p192_p3)   ;;  %2125 = vmatprep.subr.bf16.mxu1 (!%p192_p3), %v2262_v1  ;;  %v2267_v6 = vld [vmem:[%s2755_s1 + $0x8] sm:$0xff] (!%p192_p3)   ;;  %v2271_v10 = vld [vmem:[%s2755_s1 + $0x10] sm:$0xff] (!%p192_p3)  }
   0x9   : > { %v2264_v3 = vld [vmem:[%s2755_s1 + $0x80] sm:$0xff] (!%p192_p3)   ;;  %2014 = vmatpush3.bf16.msra.mxu0 (!%p192_p3), %v2263_v2  ;;  %v2268_v7 = vld [vmem:[%s2755_s1 + $0x88] sm:$0xff] (!%p192_p3)   ;;  %v2272_v11 = vld [vmem:[%s2755_s1 + $0x90] sm:$0xff] (!%p192_p3)  }
   0xa   : > { %2126 = vmatpush3.bf16.msra.mxu1 (!%p192_p3), %v2264_v3  ;;  %2015 = vmatprep.subr.bf16.mxu0 (!%p192_p3), %v2265_v4  ;;  %v2273_v12 = vld [vmem:[%s2755_s1 + $0x58] sm:$0xff] (!%p192_p3)   ;;  %v2277_v16 = vld [vmem:[%s2755_s1 + $0x60] sm:$0xff] (!%p192_p3)   ;;  %v2281_v20 = vld [vmem:[%s2755_s1 + $0x68] sm:$0xff] (!%p192_p3)  }
   0xb   : > { %2127 = vmatprep.subr.bf16.mxu1 (!%p192_p3), %v2266_v5  ;;  %v2274_v13 = vld [vmem:[%s2755_s1 + $0xd8] sm:$0xff] (!%p192_p3)   ;;  %v2278_v17 = vld [vmem:[%s2755_s1 + $0xe0] sm:$0xff] (!%p192_p3)   ;;  %v2282_v21 = vld [vmem:[%s2755_s1 + $0xe8] sm:$0xff] (!%p192_p3)  }
   0xc   : > { %v2275_v14 = vld [vmem:[%s2755_s1 + $0x18] sm:$0xff] (!%p192_p3)   ;;  %v2279_v18 = vld [vmem:[%s2755_s1 + $0x20] sm:$0xff] (!%p192_p3)   ;;  %v2283_v22 = vld [vmem:[%s2755_s1 + $0x28] sm:$0xff] (!%p192_p3)  }
   0xd   : > { %2016 = vmatpush3.bf16.msra.mxu0 (!%p192_p3), %v2267_v6  ;;  %v2276_v15 = vld [vmem:[%s2755_s1 + $0x98] sm:$0xff] (!%p192_p3)   ;;  %v2280_v19 = vld [vmem:[%s2755_s1 + $0xa0] sm:$0xff] (!%p192_p3)   ;;  %v2284_v23 = vld [vmem:[%s2755_s1 + $0xa8] sm:$0xff] (!%p192_p3)  }
   0xe   : > { %2128 = vmatpush3.bf16.msra.mxu1 %v2268_v7  ;;  %2017 = vmatprep.subr.bf16.mxu0 %v2269_v8  ;;  %s2763_s25 = smov (!%p236_p4, %s1749_s25), 63  ;;  %v2285_v24 = vld [vmem:[%s2755_s1 + $0x70] sm:$0xff]   ;;  %v2289_v28 = vld [vmem:[%s2755_s1 + $0x78] sm:$0xff]  }
   0xf   : > { %2129 = vmatprep.subr.bf16.mxu1 %v2270_v9  ;;  %v2286_v25 = vld [vmem:[%s2755_s1 + $0xf0] sm:$0xff]   ;;  %s1885_s24 = sshll.u32 %s2763_s25, 4  ;;  %v2290_v29 = vld [vmem:[%s2755_s1 + $0xf8] sm:$0xff]   ;;  %s1753_s17 = sshll.u32 %s2763_s25, 2 }
  0x10   : > { %v2287_v26 = vld [vmem:[%s2755_s1 + $0x30] sm:$0xff]   ;;  %s2614_s12 = scalar_lea.vmem %s2754_s0, %s1885_s24  ;;  %v2291_v30 = vld [vmem:[%s2755_s1 + $0x38] sm:$0xff]   ;;  %s2699_s20 = scalar_lea.vmem %s2757_s3, %s1753_s17 }
  0x11   : > { %2018 = vmatpush3.bf16.msra.mxu0 %v2271_v10  ;;  %v2288_v27 = vld [vmem:[%s2755_s1 + $0xb0] sm:$0xff]   ;;  %v2292_v31 = vld [vmem:[%s2755_s1 + $0xb8] sm:$0xff]  }
  0x12   : > { %2130 = vmatpush3.bf16.msra.mxu1 %v2272_v11  ;;  %2019 = vmatprep.subr.bf16.mxu0 %v2273_v12  ;;  %v2293_v32 = vld [vmem:[%s2614_s12] ss:$16 sps:$4 sm:$0xff]   ;;  %v2295_v33 = vld [vmem:[%s2614_s12 + $0x4] ss:$16 sps:$4 sm:$0xff]   ;;  %v2296_v34 = vld [vmem:[%s2614_s12 + $0x8] ss:$16 sps:$4 sm:$0xff]  }
  0x13   : > { %2131 = vmatprep.subr.bf16.mxu1 %v2274_v13  ;;  %v2298_v35 = vld [vmem:[%s2614_s12 + $0xc] ss:$16 sps:$4 sm:$0xff]   ;;  %1008 = vmatprep.mubr.bf16.mxu0 %v2295_v33  ;;  %v2299_v36 = vld [vmem:[%s2614_s12 + $0x24] ss:$16 sps:$4 sm:$0xff]   ;;  %v2303_v38 = vld [vmem:[%s2614_s12 + $0x20] ss:$16 sps:$4 sm:$0xff]  }
  0x14   : > { %1169 = vmatprep.mubr.bf16.mxu1 %v2298_v35  ;;  %v2301_v37 = vld [vmem:[%s2614_s12 + $0x2c] ss:$16 sps:$4 sm:$0xff]   ;;  %v2304_v39 = vld [vmem:[%s2614_s12 + $0x28] ss:$16 sps:$4 sm:$0xff]   ;;  %v2305_v40 = vld [vmem:[%s2614_s12 + $0x44] ss:$16 sps:$4 sm:$0xff]  }
  0x15   : > { %2020 = vmatpush3.bf16.msra.mxu0 %v2275_v14  ;;  %v2307_v41 = vld [vmem:[%s2614_s12 + $0x4c] ss:$16 sps:$4 sm:$0xff]   ;;  %v2309_v42 = vld [vmem:[%s2614_s12 + $0x40] ss:$16 sps:$4 sm:$0xff]   ;;  %v2310_v43 = vld [vmem:[%s2614_s12 + $0x48] ss:$16 sps:$4 sm:$0xff]  }
  0x16   : > { %2132 = vmatpush3.bf16.msra.mxu1 %v2276_v15  ;;  %2021 = vmatprep.subr.bf16.mxu0 %v2277_v16  ;;  %v2311_v44 = vld [vmem:[%s2614_s12 + $0x64] ss:$16 sps:$4 sm:$0xff]   ;;  %v2313_v45 = vld [vmem:[%s2614_s12 + $0x6c] ss:$16 sps:$4 sm:$0xff]   ;;  %v2315_v46 = vld [vmem:[%s2614_s12 + $0x60] ss:$16 sps:$4 sm:$0xff]  }
  0x17   : > { %2133 = vmatprep.subr.bf16.mxu1 %v2278_v17  ;;  %v2316_v47 = vld [vmem:[%s2614_s12 + $0x68] ss:$16 sps:$4 sm:$0xff]   ;;  %v2317_v48 = vld [vmem:[%s2614_s12 + $0x84] ss:$16 sps:$4 sm:$0xff]   ;;  %v2319_v49 = vld [vmem:[%s2614_s12 + $0x8c] ss:$16 sps:$4 sm:$0xff]  }
  0x18   : > { %v2321_v50 = vld [vmem:[%s2614_s12 + $0x80] ss:$16 sps:$4 sm:$0xff]   ;;  %v2322_v51 = vld [vmem:[%s2614_s12 + $0x88] ss:$16 sps:$4 sm:$0xff]   ;;  %v2323_v52 = vld [vmem:[%s2614_s12 + $0xa4] ss:$16 sps:$4 sm:$0xff]  }
  0x19   : > { %2022 = vmatpush3.bf16.msra.mxu0 %v2279_v18  ;;  %v2325_v53 = vld [vmem:[%s2614_s12 + $0xac] ss:$16 sps:$4 sm:$0xff]   ;;  %v2327_v54 = vld [vmem:[%s2614_s12 + $0xa0] ss:$16 sps:$4 sm:$0xff]   ;;  %v2328_v55 = vld [vmem:[%s2614_s12 + $0xa8] ss:$16 sps:$4 sm:$0xff]  }
  0x1a   : > { %2134 = vmatpush3.bf16.msra.mxu1 %v2280_v19  ;;  %2023 = vmatprep.subr.bf16.mxu0 %v2281_v20  ;;  %v2329_v56 = vld [vmem:[%s2614_s12 + $0xc4] ss:$16 sps:$4 sm:$0xff]   ;;  %v2331_v57 = vld [vmem:[%s2614_s12 + $0xcc] ss:$16 sps:$4 sm:$0xff]   ;;  %v2333_v58 = vld [vmem:[%s2614_s12 + $0xc0] ss:$16 sps:$4 sm:$0xff]  }
  0x1b   : > { %2135 = vmatprep.subr.bf16.mxu1 %v2282_v21  ;;  %v2334_v59 = vld [vmem:[%s2614_s12 + $0xc8] ss:$16 sps:$4 sm:$0xff]   ;;  %v2335_v60 = vld [vmem:[%s2614_s12 + $0xe4] ss:$16 sps:$4 sm:$0xff]   ;;  %v2337_v61 = vld [vmem:[%s2614_s12 + $0xec] ss:$16 sps:$4 sm:$0xff]  }
  0x1c   : > { %v2339_v62 = vld [vmem:[%s2614_s12 + $0xe0] ss:$16 sps:$4 sm:$0xff]   ;;  %v2340_v63 = vld [vmem:[%s2614_s12 + $0xe8] ss:$16 sps:$4 sm:$0xff]   ;;  %v2341_v0 = vld [vmem:[%s2614_s12 + $0x104] ss:$16 sps:$4 sm:$0xff]  }
  0x1d   : > { %2024 = vmatpush3.bf16.msra.mxu0 %v2283_v22  ;;  %v2343_v1 = vld [vmem:[%s2614_s12 + $0x10c] ss:$16 sps:$4 sm:$0xff]   ;;  %v2345_v2 = vld [vmem:[%s2614_s12 + $0x100] ss:$16 sps:$4 sm:$0xff]   ;;  %v2346_v3 = vld [vmem:[%s2614_s12 + $0x108] ss:$16 sps:$4 sm:$0xff]  }
  0x1e   : > { %2136 = vmatpush3.bf16.msra.mxu1 %v2284_v23  ;;  %2025 = vmatprep.subr.bf16.mxu0 %v2285_v24  ;;  %v2347_v4 = vld [vmem:[%s2614_s12 + $0x124] ss:$16 sps:$4 sm:$0xff]   ;;  %v2349_v5 = vld [vmem:[%s2614_s12 + $0x12c] ss:$16 sps:$4 sm:$0xff]   ;;  %v2351_v6 = vld [vmem:[%s2614_s12 + $0x120] ss:$16 sps:$4 sm:$0xff]  }
  0x1f   : > { %2137 = vmatprep.subr.bf16.mxu1 %v2286_v25  ;;  %v2352_v7 = vld [vmem:[%s2614_s12 + $0x128] ss:$16 sps:$4 sm:$0xff]   ;;  %v2353_v8 = vld [vmem:[%s2614_s12 + $0x144] ss:$16 sps:$4 sm:$0xff]   ;;  %v2355_v9 = vld [vmem:[%s2614_s12 + $0x14c] ss:$16 sps:$4 sm:$0xff]  }
  0x20   : > { %v2357_v10 = vld [vmem:[%s2614_s12 + $0x140] ss:$16 sps:$4 sm:$0xff]   ;;  %v2358_v11 = vld [vmem:[%s2614_s12 + $0x148] ss:$16 sps:$4 sm:$0xff]   ;;  %v2359_v12 = vld [vmem:[%s2614_s12 + $0x164] ss:$16 sps:$4 sm:$0xff]  }
  0x21   : > { %2026 = vmatpush3.bf16.msra.mxu0 %v2287_v26  ;;  %v2361_v13 = vld [vmem:[%s2614_s12 + $0x16c] ss:$16 sps:$4 sm:$0xff]   ;;  %v2363_v14 = vld [vmem:[%s2614_s12 + $0x160] ss:$16 sps:$4 sm:$0xff]   ;;  %v2364_v15 = vld [vmem:[%s2614_s12 + $0x168] ss:$16 sps:$4 sm:$0xff]  }
  0x22   : > { %2138 = vmatpush3.bf16.msra.mxu1 %v2288_v27  ;;  %2027 = vmatprep.subr.bf16.mxu0 %v2289_v28  ;;  %v2365_v16 = vld [vmem:[%s2614_s12 + $0x184] ss:$16 sps:$4 sm:$0xff]   ;;  %v2367_v17 = vld [vmem:[%s2614_s12 + $0x18c] ss:$16 sps:$4 sm:$0xff]   ;;  %v2369_v18 = vld [vmem:[%s2614_s12 + $0x180] ss:$16 sps:$4 sm:$0xff]  }
  0x23   : > { %2139 = vmatprep.subr.bf16.mxu1 %v2290_v29  ;;  %v2370_v19 = vld [vmem:[%s2614_s12 + $0x188] ss:$16 sps:$4 sm:$0xff]   ;;  %v2371_v20 = vld [vmem:[%s2614_s12 + $0x1a4] ss:$16 sps:$4 sm:$0xff]   ;;  %v2373_v21 = vld [vmem:[%s2614_s12 + $0x1ac] ss:$16 sps:$4 sm:$0xff]  }
  0x24   : > { %v2375_v22 = vld [vmem:[%s2614_s12 + $0x1a0] ss:$16 sps:$4 sm:$0xff]   ;;  %v2376_v23 = vld [vmem:[%s2614_s12 + $0x1a8] ss:$16 sps:$4 sm:$0xff]   ;;  %v2377_v24 = vld [vmem:[%s2614_s12 + $0x1c4] ss:$16 sps:$4 sm:$0xff]  }
  0x25   : > { %2028 = vmatpush3.bf16.msra.mxu0 %v2291_v30  ;;  %v2379_v25 = vld [vmem:[%s2614_s12 + $0x1cc] ss:$16 sps:$4 sm:$0xff]   ;;  %v2381_v26 = vld [vmem:[%s2614_s12 + $0x1c0] ss:$16 sps:$4 sm:$0xff]   ;;  %v2382_v27 = vld [vmem:[%s2614_s12 + $0x1c8] ss:$16 sps:$4 sm:$0xff]  }
  0x26   : > { %2140 = vmatpush3.bf16.msra.mxu1 %v2292_v31  ;;  %v2383_v28 = vld [vmem:[%s2614_s12 + $0x1e4] ss:$16 sps:$4 sm:$0xff]   ;;  %v2385_v29 = vld [vmem:[%s2614_s12 + $0x1ec] ss:$16 sps:$4 sm:$0xff]   ;;  %v2387_v30 = vld [vmem:[%s2614_s12 + $0x1e0] ss:$16 sps:$4 sm:$0xff]  }
  0x27   : > { %v2388_v31 = vld [vmem:[%s2614_s12 + $0x1e8] ss:$16 sps:$4 sm:$0xff]  }
  0x28   : > { %1009 = vmatmul.mubr.bf16.vlgmr.msra.gmra.mrb[0].mxu0 %v2293_v32 }
  0x29   : > { %1170 = vmatmul.mubr.bf16.vlgmr.msra.gmra.mrb[0].mxu1 %v2296_v34  ;;  %1016 = vmatprep.mubr.bf16.mxu0 %v2299_v36 }
  0x2a   : > { %1177 = vmatprep.mubr.bf16.mxu1 %v2301_v37 }
  0x30   : > { %1017 = vmatmul.mubr.bf16.gmra.mrb[4].mxu0 %v2303_v38 }
  0x31   : > { %1178 = vmatmul.mubr.bf16.gmra.mrb[4].mxu1 %v2304_v39  ;;  %1024 = vmatprep.mubr.bf16.mxu0 %v2305_v40 }
  0x32   : > { %1185 = vmatprep.mubr.bf16.mxu1 %v2307_v41  ;;  %v2689_v41 = vld [vmem:[%s2756_s2] ss:$0 sm:$0xff] }
  0x38   : > { %1025 = vmatmul.mubr.bf16.gmra.mrb[8].mxu0 %v2309_v42 }
  0x39   : > { %1186 = vmatmul.mubr.bf16.gmra.mrb[8].mxu1 %v2310_v43  ;;  %1032 = vmatprep.mubr.bf16.mxu0 %v2311_v44 }
  0x3a   : > { %1193 = vmatprep.mubr.bf16.mxu1 %v2313_v45 }
  0x40   : > { %1033 = vmatmul.mubr.bf16.gmra.mrb[12].mxu0 %v2315_v46 }
  0x41   : > { %1194 = vmatmul.mubr.bf16.gmra.mrb[12].mxu1 %v2316_v47  ;;  %1040 = vmatprep.mubr.bf16.mxu0 %v2317_v48 }
  0x42   : > { %1201 = vmatprep.mubr.bf16.mxu1 %v2319_v49 }
  0x48   : > { %1041 = vmatmul.mubr.bf16.gmra.mrb[16].mxu0 %v2321_v50 }
  0x49   : > { %1202 = vmatmul.mubr.bf16.gmra.mrb[16].mxu1 %v2322_v51  ;;  %1048 = vmatprep.mubr.bf16.mxu0 %v2323_v52 }
  0x4a   : > { %1209 = vmatprep.mubr.bf16.mxu1 %v2325_v53 }
  0x50   : > { %1049 = vmatmul.mubr.bf16.gmra.mrb[20].mxu0 %v2327_v54 }
  0x51   : > { %1210 = vmatmul.mubr.bf16.gmra.mrb[20].mxu1 %v2328_v55  ;;  %1056 = vmatprep.mubr.bf16.mxu0 %v2329_v56 }
  0x52   : > { %1217 = vmatprep.mubr.bf16.mxu1 %v2331_v57 }
  0x58   : > { %1057 = vmatmul.mubr.bf16.gmra.mrb[24].mxu0 %v2333_v58 }
  0x59   : > { %1218 = vmatmul.mubr.bf16.gmra.mrb[24].mxu1 %v2334_v59  ;;  %1064 = vmatprep.mubr.bf16.mxu0 %v2335_v60 }
  0x5a   : > { %1225 = vmatprep.mubr.bf16.mxu1 %v2337_v61 }
  0x60   : > { %1065 = vmatmul.mubr.bf16.gmra.mrb[28].mxu0 %v2339_v62 }
  0x61   : > { %1226 = vmatmul.mubr.bf16.gmra.mrb[28].mxu1 %v2340_v63  ;;  %1072 = vmatprep.mubr.bf16.mxu0 %v2341_v0 }
  0x62   : > { %1233 = vmatprep.mubr.bf16.mxu1 %v2343_v1 }
  0x68   : > { %1073 = vmatmul.mubr.bf16.gmra.mrb[32].mxu0 %v2345_v2 }
  0x69   : > { %1234 = vmatmul.mubr.bf16.gmra.mrb[32].mxu1 %v2346_v3  ;;  %1080 = vmatprep.mubr.bf16.mxu0 %v2347_v4 }
  0x6a   : > { %1241 = vmatprep.mubr.bf16.mxu1 %v2349_v5 }
  0x70   : > { %1081 = vmatmul.mubr.bf16.gmra.mrb[36].mxu0 %v2351_v6 }
  0x71   : > { %1242 = vmatmul.mubr.bf16.gmra.mrb[36].mxu1 %v2352_v7  ;;  %1088 = vmatprep.mubr.bf16.mxu0 %v2353_v8 }
  0x72   : > { %1249 = vmatprep.mubr.bf16.mxu1 %v2355_v9 }
  0x78   : > { %1089 = vmatmul.mubr.bf16.gmra.mrb[40].mxu0 %v2357_v10 }
  0x79   : > { %1250 = vmatmul.mubr.bf16.gmra.mrb[40].mxu1 %v2358_v11  ;;  %1096 = vmatprep.mubr.bf16.mxu0 %v2359_v12 }
  0x7a   : > { %1257 = vmatprep.mubr.bf16.mxu1 %v2361_v13 }
  0x80   : > { %1097 = vmatmul.mubr.bf16.gmra.mrb[44].mxu0 %v2363_v14 }
  0x81   : > { %1258 = vmatmul.mubr.bf16.gmra.mrb[44].mxu1 %v2364_v15  ;;  %1104 = vmatprep.mubr.bf16.mxu0 %v2365_v16 }
  0x82   : > { %1265 = vmatprep.mubr.bf16.mxu1 %v2367_v17 }
  0x88   : > { %1105 = vmatmul.mubr.bf16.gmra.mrb[48].mxu0 %v2369_v18 }
  0x89   : > { %1266 = vmatmul.mubr.bf16.gmra.mrb[48].mxu1 %v2370_v19  ;;  %1112 = vmatprep.mubr.bf16.mxu0 %v2371_v20 }
  0x8a   : > { %1273 = vmatprep.mubr.bf16.mxu1 %v2373_v21 }
  0x90   : > { %1113 = vmatmul.mubr.bf16.gmra.mrb[52].mxu0 %v2375_v22 }
  0x91   : > { %1274 = vmatmul.mubr.bf16.gmra.mrb[52].mxu1 %v2376_v23  ;;  %1120 = vmatprep.mubr.bf16.mxu0 %v2377_v24 }
  0x92   : > { %1281 = vmatprep.mubr.bf16.mxu1 %v2379_v25 }
  0x98   : > { %1121 = vmatmul.mubr.bf16.gmra.mrb[56].mxu0 %v2381_v26 }
  0x99   : > { %1282 = vmatmul.mubr.bf16.gmra.mrb[56].mxu1 %v2382_v27  ;;  %1128 = vmatprep.mubr.bf16.mxu0 %v2383_v28 }
  0x9a   : > { %1289 = vmatprep.mubr.bf16.mxu1 %v2385_v29 }
  0xa0   : > { %1129 = vmatmul.mubr.bf16.gmra.mrb[60].mxu0 %v2387_v30 }
  0xa1   : > { %1290 = vmatmul.mubr.bf16.gmra.mrb[60].mxu1 %v2388_v31 }
  0xfb   : > { %v2029_v32 = vpop.f32.mrb[0].mxu0 }
  0xfc   : > { %v2141_v33 = vpop.f32.mrb[0].mxu1  ;;  %v2030_v34 = vpop.f32.mrb[1].mxu0 }
  0xfd   : > { %v2031_v35 = vadd.f32 %v2030_v34, %v2029_v32  ;;  %v2142_v36 = vpop.f32.mrb[1].mxu1  ;;  %v2032_v37 = vpop.f32.mrb[2].mxu0 }
  0xfe   : > { %v2143_v38 = vadd.f32 %v2142_v36, %v2141_v33  ;;  %v2144_v39 = vpop.f32.mrb[2].mxu1  ;;  %v2033_v40 = vpop.f32.mrb[3].mxu0 }
  0xff   : > { %v2034_v42 = vadd.f32 %v2033_v40, %v2032_v37  ;;  %v2145_v43 = vpop.f32.mrb[3].mxu1 }
 0x100   : > { %v1172_v44 = vadd.f32 %v2143_v38, %v2031_v35  ;;  %v2146_v45 = vadd.f32 %v2145_v43, %v2144_v39 }
 0x102   : > { %v1404_v46 = vadd.f32 %v2689_v41, %v1172_v44  ;;  %v1175_v47 = vadd.f32 %v2146_v45, %v2034_v42 }
 0x103   : > { %v2035_v48 = vpop.f32.mrb[4].mxu0 }
 0x104   : > { %v1405_v49 = vadd.f32 %v2689_v41, %v1175_v47  ;;  %v2147_v50 = vpop.f32.mrb[4].mxu1  ;;  %v2036_v51 = vpop.f32.mrb[5].mxu0  ;;  %2389 = vtanh.f32 %v1404_v46 }
 0x105   : > { %v2037_v52 = vadd.f32 %v2036_v51, %v2035_v48  ;;  %v2148_v53 = vpop.f32.mrb[5].mxu1  ;;  %v2038_v54 = vpop.f32.mrb[6].mxu0 }
 0x106   : > { %2391 = vtanh.f32 %v1405_v49  ;;  %v2149_v55 = vadd.f32 %v2148_v53, %v2147_v50  ;;  %v2150_v56 = vpop.f32.mrb[6].mxu1  ;;  %v2039_v57 = vpop.f32.mrb[7].mxu0 }
 0x107   : > { %v2040_v58 = vadd.f32 %v2039_v57, %v2038_v54  ;;  %v2151_v59 = vpop.f32.mrb[7].mxu1 }
 0x108   : > { %v1180_v60 = vadd.f32 %v2149_v55, %v2037_v52  ;;  %v2152_v61 = vadd.f32 %v2151_v59, %v2150_v56 }
 0x10a   : > { %v1406_v62 = vadd.f32 %v2689_v41, %v1180_v60  ;;  %v1183_v63 = vadd.f32 %v2152_v61, %v2040_v58 }
 0x10b   : > { %v2041_v0 = vpop.f32.mrb[8].mxu0 }
 0x10c   : > { %v1407_v1 = vadd.f32 %v2689_v41, %v1183_v63  ;;  %v2153_v2 = vpop.f32.mrb[8].mxu1  ;;  %v2042_v3 = vpop.f32.mrb[9].mxu0  ;;  %2393 = vtanh.f32 %v1406_v62 }
 0x10d   : > { %v2043_v4 = vadd.f32 %v2042_v3, %v2041_v0  ;;  %v2154_v5 = vpop.f32.mrb[9].mxu1  ;;  %v2044_v6 = vpop.f32.mrb[10].mxu0 }
 0x10e   : > { %2395 = vtanh.f32 %v1407_v1  ;;  %v2155_v7 = vadd.f32 %v2154_v5, %v2153_v2  ;;  %v2156_v8 = vpop.f32.mrb[10].mxu1  ;;  %v2045_v9 = vpop.f32.mrb[11].mxu0 }
 0x10f   : > { %v2390_v10 = vpop.eup %2389  ;;  %v2046_v11 = vadd.f32 %v2045_v9, %v2044_v6  ;;  %v2157_v12 = vpop.f32.mrb[11].mxu1 }
 0x110   : > { %v2392_v13 = vpop.eup %2391  ;;  %v1188_v14 = vadd.f32 %v2155_v7, %v2043_v4  ;;  %v2158_v15 = vadd.f32 %v2157_v12, %v2156_v8 }
 0x111   : > { %v1921_v16 = vpack.c.bf16 %v2392_v13, %v2390_v10 }
 0x112   : > { %v1408_v17 = vadd.f32 %v2689_v41, %v1188_v14  ;;  %v1191_v18 = vadd.f32 %v2158_v15, %v2046_v11 }
 0x113   : > { %1922 = vst [vmem:[%s2699_s20] sm:$0xff] %v1921_v16   ;;  %v2047_v19 = vpop.f32.mrb[12].mxu0 }
 0x114   : > { %v1409_v20 = vadd.f32 %v2689_v41, %v1191_v18  ;;  %v2159_v21 = vpop.f32.mrb[12].mxu1  ;;  %v2048_v22 = vpop.f32.mrb[13].mxu0  ;;  %2397 = vtanh.f32 %v1408_v17 }
 0x115   : > { %v2049_v23 = vadd.f32 %v2048_v22, %v2047_v19  ;;  %v2160_v24 = vpop.f32.mrb[13].mxu1  ;;  %v2050_v25 = vpop.f32.mrb[14].mxu0 }
 0x116   : > { %2399 = vtanh.f32 %v1409_v20  ;;  %v2161_v26 = vadd.f32 %v2160_v24, %v2159_v21  ;;  %v2162_v27 = vpop.f32.mrb[14].mxu1  ;;  %v2051_v28 = vpop.f32.mrb[15].mxu0 }
 0x117   : > { %v2394_v29 = vpop.eup %2393  ;;  %v2052_v30 = vadd.f32 %v2051_v28, %v2050_v25  ;;  %v2163_v31 = vpop.f32.mrb[15].mxu1 }
 0x118   : > { %v2396_v32 = vpop.eup %2395  ;;  %v1196_v33 = vadd.f32 %v2161_v26, %v2049_v23  ;;  %v2164_v34 = vadd.f32 %v2163_v31, %v2162_v27 }
 0x119   : > { %v1926_v35 = vpack.c.bf16 %v2396_v32, %v2394_v29 }
 0x11a   : > { %v1410_v36 = vadd.f32 %v2689_v41, %v1196_v33  ;;  %v1199_v37 = vadd.f32 %v2164_v34, %v2052_v30 }
 0x11b   : > { %1998 = vst [vmem:[%s2699_s20 + $0x8] sm:$0xff] %v1926_v35   ;;  %v2053_v38 = vpop.f32.mrb[16].mxu0 }
 0x11c   : > { %v1411_v39 = vadd.f32 %v2689_v41, %v1199_v37  ;;  %v2165_v40 = vpop.f32.mrb[16].mxu1  ;;  %v2054_v42 = vpop.f32.mrb[17].mxu0  ;;  %2401 = vtanh.f32 %v1410_v36 }
 0x11d   : > { %v2055_v43 = vadd.f32 %v2054_v42, %v2053_v38  ;;  %v2166_v44 = vpop.f32.mrb[17].mxu1  ;;  %v2056_v45 = vpop.f32.mrb[18].mxu0 }
 0x11e   : > { %2403 = vtanh.f32 %v1411_v39  ;;  %v2167_v46 = vadd.f32 %v2166_v44, %v2165_v40  ;;  %v2168_v47 = vpop.f32.mrb[18].mxu1  ;;  %v2057_v48 = vpop.f32.mrb[19].mxu0 }
 0x11f   : > { %v2398_v49 = vpop.eup %2397  ;;  %v2058_v50 = vadd.f32 %v2057_v48, %v2056_v45  ;;  %v2169_v51 = vpop.f32.mrb[19].mxu1 }
 0x120   : > { %v2400_v52 = vpop.eup %2399  ;;  %v1204_v53 = vadd.f32 %v2167_v46, %v2055_v43  ;;  %v2170_v54 = vadd.f32 %v2169_v51, %v2168_v47 }
 0x121   : > { %v1931_v55 = vpack.c.bf16 %v2400_v52, %v2398_v49 }
 0x122   : > { %v1412_v56 = vadd.f32 %v2689_v41, %v1204_v53  ;;  %v1207_v57 = vadd.f32 %v2170_v54, %v2058_v50 }
 0x123   : > { %1999 = vst [vmem:[%s2699_s20 + $0x10] sm:$0xff] %v1931_v55   ;;  %v2059_v58 = vpop.f32.mrb[20].mxu0 }
 0x124   : > { %v1413_v59 = vadd.f32 %v2689_v41, %v1207_v57  ;;  %v2171_v60 = vpop.f32.mrb[20].mxu1  ;;  %v2060_v61 = vpop.f32.mrb[21].mxu0  ;;  %2405 = vtanh.f32 %v1412_v56 }
 0x125   : > { %v2061_v62 = vadd.f32 %v2060_v61, %v2059_v58  ;;  %v2172_v63 = vpop.f32.mrb[21].mxu1  ;;  %v2062_v0 = vpop.f32.mrb[22].mxu0 }
 0x126   : > { %2407 = vtanh.f32 %v1413_v59  ;;  %v2173_v1 = vadd.f32 %v2172_v63, %v2171_v60  ;;  %v2174_v2 = vpop.f32.mrb[22].mxu1  ;;  %v2063_v3 = vpop.f32.mrb[23].mxu0 }
 0x127   : > { %v2402_v4 = vpop.eup %2401  ;;  %v2064_v5 = vadd.f32 %v2063_v3, %v2062_v0  ;;  %v2175_v6 = vpop.f32.mrb[23].mxu1 }
 0x128   : > { %v2404_v7 = vpop.eup %2403  ;;  %v1212_v8 = vadd.f32 %v2173_v1, %v2061_v62  ;;  %v2176_v9 = vadd.f32 %v2175_v6, %v2174_v2 }
 0x129   : > { %v1936_v10 = vpack.c.bf16 %v2404_v7, %v2402_v4 }
 0x12a   : > { %v1414_v11 = vadd.f32 %v2689_v41, %v1212_v8  ;;  %v1215_v12 = vadd.f32 %v2176_v9, %v2064_v5 }
 0x12b   : > { %2000 = vst [vmem:[%s2699_s20 + $0x18] sm:$0xff] %v1936_v10   ;;  %v2065_v13 = vpop.f32.mrb[24].mxu0 }
 0x12c   : > { %v1415_v14 = vadd.f32 %v2689_v41, %v1215_v12  ;;  %v2177_v15 = vpop.f32.mrb[24].mxu1  ;;  %v2066_v16 = vpop.f32.mrb[25].mxu0  ;;  %2409 = vtanh.f32 %v1414_v11 }
 0x12d   : > { %v2067_v17 = vadd.f32 %v2066_v16, %v2065_v13  ;;  %v2178_v18 = vpop.f32.mrb[25].mxu1  ;;  %v2068_v19 = vpop.f32.mrb[26].mxu0 }
 0x12e   : > { %2411 = vtanh.f32 %v1415_v14  ;;  %v2179_v20 = vadd.f32 %v2178_v18, %v2177_v15  ;;  %v2180_v21 = vpop.f32.mrb[26].mxu1  ;;  %v2069_v22 = vpop.f32.mrb[27].mxu0 }
 0x12f   : > { %v2406_v23 = vpop.eup %2405  ;;  %v2070_v24 = vadd.f32 %v2069_v22, %v2068_v19  ;;  %v2181_v25 = vpop.f32.mrb[27].mxu1 }
 0x130   : > { %v2408_v26 = vpop.eup %2407  ;;  %v1220_v27 = vadd.f32 %v2179_v20, %v2067_v17  ;;  %v2182_v28 = vadd.f32 %v2181_v25, %v2180_v21 }
 0x131   : > { %v1941_v29 = vpack.c.bf16 %v2408_v26, %v2406_v23 }
 0x132   : > { %v1416_v30 = vadd.f32 %v2689_v41, %v1220_v27  ;;  %v1223_v31 = vadd.f32 %v2182_v28, %v2070_v24 }
 0x133   : > { %2001 = vst [vmem:[%s2699_s20 + $0x20] sm:$0xff] %v1941_v29   ;;  %v2071_v32 = vpop.f32.mrb[28].mxu0 }
 0x134   : > { %v1417_v33 = vadd.f32 %v2689_v41, %v1223_v31  ;;  %v2183_v34 = vpop.f32.mrb[28].mxu1  ;;  %v2072_v35 = vpop.f32.mrb[29].mxu0  ;;  %2413 = vtanh.f32 %v1416_v30 }
 0x135   : > { %v2073_v36 = vadd.f32 %v2072_v35, %v2071_v32  ;;  %v2184_v37 = vpop.f32.mrb[29].mxu1  ;;  %v2074_v38 = vpop.f32.mrb[30].mxu0 }
 0x136   : > { %2415 = vtanh.f32 %v1417_v33  ;;  %v2185_v39 = vadd.f32 %v2184_v37, %v2183_v34  ;;  %v2186_v40 = vpop.f32.mrb[30].mxu1  ;;  %v2075_v42 = vpop.f32.mrb[31].mxu0 }
 0x137   : > { %v2410_v43 = vpop.eup %2409  ;;  %v2076_v44 = vadd.f32 %v2075_v42, %v2074_v38  ;;  %v2187_v45 = vpop.f32.mrb[31].mxu1 }
 0x138   : > { %v2412_v46 = vpop.eup %2411  ;;  %v1228_v47 = vadd.f32 %v2185_v39, %v2073_v36  ;;  %v2188_v48 = vadd.f32 %v2187_v45, %v2186_v40 }
 0x139   : > { %v1946_v49 = vpack.c.bf16 %v2412_v46, %v2410_v43 }
 0x13a   : > { %v1418_v50 = vadd.f32 %v2689_v41, %v1228_v47  ;;  %v1231_v51 = vadd.f32 %v2188_v48, %v2076_v44 }
 0x13b   : > { %2002 = vst [vmem:[%s2699_s20 + $0x28] sm:$0xff] %v1946_v49   ;;  %v2077_v52 = vpop.f32.mrb[32].mxu0 }
 0x13c   : > { %v1419_v53 = vadd.f32 %v2689_v41, %v1231_v51  ;;  %v2189_v54 = vpop.f32.mrb[32].mxu1  ;;  %v2078_v55 = vpop.f32.mrb[33].mxu0  ;;  %2417 = vtanh.f32 %v1418_v50 }
 0x13d   : > { %v2079_v56 = vadd.f32 %v2078_v55, %v2077_v52  ;;  %v2190_v57 = vpop.f32.mrb[33].mxu1  ;;  %v2080_v58 = vpop.f32.mrb[34].mxu0 }
 0x13e   : > { %2419 = vtanh.f32 %v1419_v53  ;;  %v2191_v59 = vadd.f32 %v2190_v57, %v2189_v54  ;;  %v2192_v60 = vpop.f32.mrb[34].mxu1  ;;  %v2081_v61 = vpop.f32.mrb[35].mxu0 }
 0x13f   : > { %v2414_v62 = vpop.eup %2413  ;;  %v2082_v63 = vadd.f32 %v2081_v61, %v2080_v58  ;;  %v2193_v0 = vpop.f32.mrb[35].mxu1 }
 0x140   : > { %v2416_v1 = vpop.eup %2415  ;;  %v1236_v2 = vadd.f32 %v2191_v59, %v2079_v56  ;;  %v2194_v3 = vadd.f32 %v2193_v0, %v2192_v60 }
 0x141   : > { %v1951_v4 = vpack.c.bf16 %v2416_v1, %v2414_v62 }
 0x142   : > { %v1420_v5 = vadd.f32 %v2689_v41, %v1236_v2  ;;  %v1239_v6 = vadd.f32 %v2194_v3, %v2082_v63 }
 0x143   : > { %2003 = vst [vmem:[%s2699_s20 + $0x30] sm:$0xff] %v1951_v4   ;;  %v2083_v7 = vpop.f32.mrb[36].mxu0 }
 0x144   : > { %v1421_v8 = vadd.f32 %v2689_v41, %v1239_v6  ;;  %v2195_v9 = vpop.f32.mrb[36].mxu1  ;;  %v2084_v10 = vpop.f32.mrb[37].mxu0  ;;  %2421 = vtanh.f32 %v1420_v5 }
 0x145   : > { %v2085_v11 = vadd.f32 %v2084_v10, %v2083_v7  ;;  %v2196_v12 = vpop.f32.mrb[37].mxu1  ;;  %v2086_v13 = vpop.f32.mrb[38].mxu0 }
 0x146   : > { %2423 = vtanh.f32 %v1421_v8  ;;  %v2197_v14 = vadd.f32 %v2196_v12, %v2195_v9  ;;  %v2198_v15 = vpop.f32.mrb[38].mxu1  ;;  %v2087_v16 = vpop.f32.mrb[39].mxu0 }
 0x147   : > { %v2418_v17 = vpop.eup %2417  ;;  %v2088_v18 = vadd.f32 %v2087_v16, %v2086_v13  ;;  %v2199_v19 = vpop.f32.mrb[39].mxu1 }
 0x148   : > { %v2420_v20 = vpop.eup %2419  ;;  %v1244_v21 = vadd.f32 %v2197_v14, %v2085_v11  ;;  %v2200_v22 = vadd.f32 %v2199_v19, %v2198_v15 }
 0x149   : > { %v1956_v23 = vpack.c.bf16 %v2420_v20, %v2418_v17 }
 0x14a   : > { %v1422_v24 = vadd.f32 %v2689_v41, %v1244_v21  ;;  %v1247_v25 = vadd.f32 %v2200_v22, %v2088_v18 }
 0x14b   : > { %2004 = vst [vmem:[%s2699_s20 + $0x38] sm:$0xff] %v1956_v23   ;;  %v2089_v26 = vpop.f32.mrb[40].mxu0 }
 0x14c   : > { %v1423_v27 = vadd.f32 %v2689_v41, %v1247_v25  ;;  %v2201_v28 = vpop.f32.mrb[40].mxu1  ;;  %v2090_v29 = vpop.f32.mrb[41].mxu0  ;;  %2425 = vtanh.f32 %v1422_v24 }
 0x14d   : > { %v2091_v30 = vadd.f32 %v2090_v29, %v2089_v26  ;;  %v2202_v31 = vpop.f32.mrb[41].mxu1  ;;  %v2092_v32 = vpop.f32.mrb[42].mxu0 }
 0x14e   : > { %2427 = vtanh.f32 %v1423_v27  ;;  %v2203_v33 = vadd.f32 %v2202_v31, %v2201_v28  ;;  %v2204_v34 = vpop.f32.mrb[42].mxu1  ;;  %v2093_v35 = vpop.f32.mrb[43].mxu0 }
 0x14f   : > { %v2422_v36 = vpop.eup %2421  ;;  %v2094_v37 = vadd.f32 %v2093_v35, %v2092_v32  ;;  %v2205_v38 = vpop.f32.mrb[43].mxu1 }
 0x150   : > { %v2424_v39 = vpop.eup %2423  ;;  %v1252_v40 = vadd.f32 %v2203_v33, %v2091_v30  ;;  %v2206_v42 = vadd.f32 %v2205_v38, %v2204_v34 }
 0x151   : > { %v1961_v43 = vpack.c.bf16 %v2424_v39, %v2422_v36 }
 0x152   : > { %v1424_v44 = vadd.f32 %v2689_v41, %v1252_v40  ;;  %v1255_v45 = vadd.f32 %v2206_v42, %v2094_v37 }
 0x153   : > { %2005 = vst [vmem:[%s2699_s20 + $0x40] sm:$0xff] %v1961_v43   ;;  %v2095_v46 = vpop.f32.mrb[44].mxu0 }
 0x154   : > { %v1425_v47 = vadd.f32 %v2689_v41, %v1255_v45  ;;  %v2207_v48 = vpop.f32.mrb[44].mxu1  ;;  %v2096_v49 = vpop.f32.mrb[45].mxu0  ;;  %2429 = vtanh.f32 %v1424_v44 }
 0x155   : > { %v2097_v50 = vadd.f32 %v2096_v49, %v2095_v46  ;;  %v2208_v51 = vpop.f32.mrb[45].mxu1  ;;  %v2098_v52 = vpop.f32.mrb[46].mxu0 }
 0x156   : > { %2431 = vtanh.f32 %v1425_v47  ;;  %v2209_v53 = vadd.f32 %v2208_v51, %v2207_v48  ;;  %v2210_v54 = vpop.f32.mrb[46].mxu1  ;;  %v2099_v55 = vpop.f32.mrb[47].mxu0 }
 0x157   : > { %v2426_v56 = vpop.eup %2425  ;;  %v2100_v57 = vadd.f32 %v2099_v55, %v2098_v52  ;;  %v2211_v58 = vpop.f32.mrb[47].mxu1 }
 0x158   : > { %v2428_v59 = vpop.eup %2427  ;;  %v1260_v60 = vadd.f32 %v2209_v53, %v2097_v50  ;;  %v2212_v61 = vadd.f32 %v2211_v58, %v2210_v54 }
 0x159   : > { %v1966_v62 = vpack.c.bf16 %v2428_v59, %v2426_v56 }
 0x15a   : > { %v1426_v63 = vadd.f32 %v2689_v41, %v1260_v60  ;;  %v1263_v0 = vadd.f32 %v2212_v61, %v2100_v57 }
 0x15b   : > { %2006 = vst [vmem:[%s2699_s20 + $0x48] sm:$0xff] %v1966_v62   ;;  %v2101_v1 = vpop.f32.mrb[48].mxu0 }
 0x15c   : > { %v1427_v2 = vadd.f32 %v2689_v41, %v1263_v0  ;;  %v2213_v3 = vpop.f32.mrb[48].mxu1  ;;  %v2102_v4 = vpop.f32.mrb[49].mxu0  ;;  %2433 = vtanh.f32 %v1426_v63 }
 0x15d   : > { %v2103_v5 = vadd.f32 %v2102_v4, %v2101_v1  ;;  %v2214_v6 = vpop.f32.mrb[49].mxu1  ;;  %v2104_v7 = vpop.f32.mrb[50].mxu0 }
 0x15e   : > { %2435 = vtanh.f32 %v1427_v2  ;;  %v2215_v8 = vadd.f32 %v2214_v6, %v2213_v3  ;;  %v2216_v9 = vpop.f32.mrb[50].mxu1  ;;  %v2105_v10 = vpop.f32.mrb[51].mxu0 }
 0x15f   : > { %v2430_v11 = vpop.eup %2429  ;;  %v2106_v12 = vadd.f32 %v2105_v10, %v2104_v7  ;;  %v2217_v13 = vpop.f32.mrb[51].mxu1 }
 0x160   : > { %v2432_v14 = vpop.eup %2431  ;;  %v1268_v15 = vadd.f32 %v2215_v8, %v2103_v5  ;;  %v2218_v16 = vadd.f32 %v2217_v13, %v2216_v9 }
 0x161   : > { %v1971_v17 = vpack.c.bf16 %v2432_v14, %v2430_v11 }
 0x162   : > { %v1428_v18 = vadd.f32 %v2689_v41, %v1268_v15  ;;  %v1271_v19 = vadd.f32 %v2218_v16, %v2106_v12 }
 0x163   : > { %2007 = vst [vmem:[%s2699_s20 + $0x50] sm:$0xff] %v1971_v17   ;;  %v2107_v20 = vpop.f32.mrb[52].mxu0 }
 0x164   : > { %v1429_v21 = vadd.f32 %v2689_v41, %v1271_v19  ;;  %v2219_v22 = vpop.f32.mrb[52].mxu1  ;;  %v2108_v23 = vpop.f32.mrb[53].mxu0  ;;  %2437 = vtanh.f32 %v1428_v18 }
 0x165   : > { %v2109_v24 = vadd.f32 %v2108_v23, %v2107_v20  ;;  %v2220_v25 = vpop.f32.mrb[53].mxu1  ;;  %v2110_v26 = vpop.f32.mrb[54].mxu0 }
 0x166   : > { %2439 = vtanh.f32 %v1429_v21  ;;  %v2221_v27 = vadd.f32 %v2220_v25, %v2219_v22  ;;  %v2222_v28 = vpop.f32.mrb[54].mxu1  ;;  %v2111_v29 = vpop.f32.mrb[55].mxu0 }
 0x167   : > { %v2434_v30 = vpop.eup %2433  ;;  %v2112_v31 = vadd.f32 %v2111_v29, %v2110_v26  ;;  %v2223_v32 = vpop.f32.mrb[55].mxu1 }
 0x168   : > { %v2436_v33 = vpop.eup %2435  ;;  %v1276_v34 = vadd.f32 %v2221_v27, %v2109_v24  ;;  %v2224_v35 = vadd.f32 %v2223_v32, %v2222_v28 }
 0x169   : > { %v1976_v36 = vpack.c.bf16 %v2436_v33, %v2434_v30 }
 0x16a   : > { %v1430_v37 = vadd.f32 %v2689_v41, %v1276_v34  ;;  %v1279_v38 = vadd.f32 %v2224_v35, %v2112_v31 }
 0x16b   : > { %2008 = vst [vmem:[%s2699_s20 + $0x58] sm:$0xff] %v1976_v36   ;;  %v2113_v39 = vpop.f32.mrb[56].mxu0 }
 0x16c   : > { %v1431_v40 = vadd.f32 %v2689_v41, %v1279_v38  ;;  %v2225_v42 = vpop.f32.mrb[56].mxu1  ;;  %v2114_v43 = vpop.f32.mrb[57].mxu0  ;;  %2441 = vtanh.f32 %v1430_v37 }
 0x16d   : > { %v2115_v44 = vadd.f32 %v2114_v43, %v2113_v39  ;;  %v2226_v45 = vpop.f32.mrb[57].mxu1  ;;  %v2116_v46 = vpop.f32.mrb[58].mxu0 }
 0x16e   : > { %2443 = vtanh.f32 %v1431_v40  ;;  %v2227_v47 = vadd.f32 %v2226_v45, %v2225_v42  ;;  %v2228_v48 = vpop.f32.mrb[58].mxu1  ;;  %v2117_v49 = vpop.f32.mrb[59].mxu0 }
 0x16f   : > { %v2438_v50 = vpop.eup %2437  ;;  %v2118_v51 = vadd.f32 %v2117_v49, %v2116_v46  ;;  %v2229_v52 = vpop.f32.mrb[59].mxu1 }
 0x170   : > { %v2440_v53 = vpop.eup %2439  ;;  %v1284_v54 = vadd.f32 %v2227_v47, %v2115_v44  ;;  %v2230_v55 = vadd.f32 %v2229_v52, %v2228_v48 }
 0x171   : > { %v1981_v56 = vpack.c.bf16 %v2440_v53, %v2438_v50 }
 0x172   : > { %v1432_v57 = vadd.f32 %v2689_v41, %v1284_v54  ;;  %v1287_v58 = vadd.f32 %v2230_v55, %v2118_v51 }
 0x173   : > { %2009 = vst [vmem:[%s2699_s20 + $0x60] sm:$0xff] %v1981_v56   ;;  %v2119_v59 = vpop.f32.mrb[60].mxu0 }
 0x174   : > { %v1433_v60 = vadd.f32 %v2689_v41, %v1287_v58  ;;  %v2231_v61 = vpop.f32.mrb[60].mxu1  ;;  %v2120_v62 = vpop.f32.mrb[61].mxu0  ;;  %2445 = vtanh.f32 %v1432_v57 }
 0x175   : > { %v2121_v63 = vadd.f32 %v2120_v62, %v2119_v59  ;;  %v2232_v0 = vpop.f32.mrb[61].mxu1  ;;  %v2122_v1 = vpop.f32.mrb[62].mxu0 }
 0x176   : > { %2447 = vtanh.f32 %v1433_v60  ;;  %v2233_v2 = vadd.f32 %v2232_v0, %v2231_v61  ;;  %v2234_v3 = vpop.f32.mrb[62].mxu1  ;;  %v2123_v4 = vpop.f32.mrb[63].mxu0 }
 0x177   : > { %v2442_v5 = vpop.eup %2441  ;;  %v2124_v6 = vadd.f32 %v2123_v4, %v2122_v1  ;;  %v2235_v7 = vpop.f32.mrb[63].mxu1 }
 0x178   : > { %v2444_v8 = vpop.eup %2443  ;;  %v1292_v9 = vadd.f32 %v2233_v2, %v2121_v63  ;;  %v2236_v10 = vadd.f32 %v2235_v7, %v2234_v3 }
 0x179   : > { %v1986_v11 = vpack.c.bf16 %v2444_v8, %v2442_v5 }
 0x17a   : > { %v1434_v12 = vadd.f32 %v2689_v41, %v1292_v9  ;;  %v1295_v13 = vadd.f32 %v2236_v10, %v2124_v6 }
 0x17b   : > { %2010 = vst [vmem:[%s2699_s20 + $0x68] sm:$0xff] %v1986_v11  }
 0x17c   : > { %v1435_v14 = vadd.f32 %v2689_v41, %v1295_v13  ;;  %2449 = vtanh.f32 %v1434_v12 }
 0x17e   : > { %2451 = vtanh.f32 %v1435_v14  ;;  %v2446_v15 = vpop.eup %2445 }
 0x180   : > { %v2448_v16 = vpop.eup %2447 }
 0x181   : > { %v1991_v17 = vpack.c.bf16 %v2448_v16, %v2446_v15 }
 0x183   : > { %2011 = vst [vmem:[%s2699_s20 + $0x70] sm:$0xff] %v1991_v17  }
 0x186   : > { %v2450_v18 = vpop.eup %2449 }
 0x188   : > { %v2452_v19 = vpop.eup %2451 }
 0x189   : > { %v1996_v20 = vpack.c.bf16 %v2452_v19, %v2450_v18 }
 0x18b   : > { %2012 = vst [vmem:[%s2699_s20 + $0x78] sm:$0xff] %v1996_v20  }
 0x18c PF: > { %s13_s14 = sadd.s32 1, %s2475_s14   ;;  %s2758_s12 = smov %s2471_s13 }
 0x18d   : > { %p10_p5 = scmp.ge.s32.totalorder %s13_s14, 4   ;;  %s2759_s13 = smov %s2761_s15 }
 0x18f   :  { %12 = sbr.rel (!%p10_p5) target bundleno = 2 (0x2), region = 76 }

</bundles_post_ra>
